<compile_context>
chip_gen: v7x
topology: tpu7x:2x2x1
jax: 0.10.0
libtpu: 0.0.40
codegen_flags: <defaults>
</compile_context>

<pallas_src>
import functools

import jax
import jax.numpy as jnp
import numpy as np
from jax.experimental import pallas as pl
from jax.experimental.pallas import tpu as pltpu


def _conv_out(n, k, s):
    return (n - k) // s + 1


# ----------------------------- fused Pallas kernel --------------------------
def _fused_trunk_kernel(cols1_ref, w1_ref, b1_ref, w2_ref, b2_ref,
                        w3_ref, b3_ref, wfc_ref, bfc_ref, o_ref,
                        *, conv1_hw, k2, s2, k3, s3):
    H1, W1 = conv1_hw
    TB, P1, K1 = cols1_ref.shape           # batch tile, conv1 out pixels, 8*8*C
    C1 = w1_ref.shape[1]
    H2, W2 = _conv_out(H1, k2, s2), _conv_out(W1, k2, s2)
    H3, W3 = _conv_out(H2, k3, s3), _conv_out(W2, k3, s3)

    # ---- conv1 + ReLU (uint8 -> bf16 cast happens here, /255 folded in w1) ----
    x = cols1_ref[...].reshape(TB * P1, K1)
    x = x.astype(jnp.int32).astype(jnp.float32).astype(jnp.bfloat16)
    h1 = jnp.dot(x, w1_ref[...], preferred_element_type=jnp.float32)
    h1 = jnp.maximum(h1 + b1_ref[...], 0.0)
    h1 = h1.astype(jnp.bfloat16).reshape(TB, P1, C1)

    # Extract each conv1 output pixel once: (TB, C1), channels on lanes.
    pix1 = [h1[:, p, :] for p in range(P1)]

    # ---- conv2 + ReLU: one lane-dense GEMM per output pixel ----
    w2, b2 = w2_ref[...], b2_ref[...]
    pix2 = {}
    for ho in range(H2):
        for wo in range(W2):
            taps = [pix1[(s2 * ho + i) * W1 + (s2 * wo + j)]
                    for i in range(k2) for j in range(k2)]
            col = jnp.concatenate(taps, axis=-1)            # (TB, k2*k2*C1)
            acc = jnp.dot(col, w2, preferred_element_type=jnp.float32)
            pix2[(ho, wo)] = jnp.maximum(acc + b2, 0.0).astype(jnp.bfloat16)

    # ---- conv3 + ReLU ----
    w3, b3 = w3_ref[...], b3_ref[...]
    pix3 = []
    for ho in range(H3):
        for wo in range(W3):
            taps = [pix2[(s3 * ho + i, s3 * wo + j)]
                    for i in range(k3) for j in range(k3)]
            col = jnp.concatenate(taps, axis=-1)            # (TB, k3*k3*C2)
            acc = jnp.dot(col, w3, preferred_element_type=jnp.float32)
            pix3.append(jnp.maximum(acc + b3, 0.0).astype(jnp.bfloat16))

    # ---- flatten + Linear(512) + ReLU ----
    # pix3 is in (h, w, c) order; wfc rows were pre-permuted from torch's
    # NCHW-flatten (c, h, w) order in prepare_params(), so this is just a dot.
    feat = pix3[0] if len(pix3) == 1 else jnp.concatenate(pix3, axis=-1)
    out = jnp.dot(feat, wfc_ref[...], preferred_element_type=jnp.float32)
    o_ref[...] = jnp.maximum(out + bfc_ref[...], 0.0)       # lane-dense (TB, 512)


# ------------------------------- XLA-side glue -------------------------------
def im2col_nhwc(x, kh, kw, stride):
    """(B,H,W,C) -> (B, Ho*Wo, kh*kw*C) in the *input dtype* (K order = kh,kw,ci)."""
    B, H, W, C = x.shape
    Ho, Wo = _conv_out(H, kh, stride), _conv_out(W, kw, stride)
    cols = []
    for i in range(kh):
        for j in range(kw):
            sl = jax.lax.slice(
                x, (0, i, j, 0),
                (B, i + (Ho - 1) * stride + 1, j + (Wo - 1) * stride + 1, C),
                (1, stride, stride, 1))
            cols.append(sl)
    cols = jnp.concatenate(cols, axis=-1)                    # (B, Ho, Wo, kh*kw*C)
    return cols.reshape(B, Ho * Wo, kh * kw * C), (Ho, Wo)


def conv_w_to_mat(w_oihw):
    """PyTorch (O,I,KH,KW) conv weight -> (KH*KW*I, O) matmul weight."""
    O, I, KH, KW = w_oihw.shape
    return jnp.transpose(w_oihw, (2, 3, 1, 0)).reshape(KH * KW * I, O)


def init_params(key, c_in):
    ks = jax.random.split(key, 8)

    def u(k, shape, fan_in):
        bound = 1.0 / np.sqrt(fan_in)
        return jax.random.uniform(k, shape, jnp.float32, -bound, bound)

    return {
        "w1_oihw": u(ks[0], (32, c_in, 8, 8), c_in * 8 * 8),
        "b1": u(ks[1], (32,), c_in * 8 * 8),
        "w2_oihw": u(ks[2], (64, 32, 4, 4), 32 * 4 * 4),
        "b2": u(ks[3], (64,), 32 * 4 * 4),
        "w3_oihw": u(ks[4], (64, 64, 3, 3), 64 * 3 * 3),
        "b3": u(ks[5], (64,), 64 * 3 * 3),
        "wfc": u(ks[6], (64, 512), 64),      # stored as (in, out) = torch W.T
        "bfc": u(ks[7], (512,), 64),
    }


def prepare_params(p, input_hw):
    """One-time weight prep (hoisted out of the forward):
    conv weights -> im2col bf16 matrices (1/255 folded into w1), FC weight rows
    permuted from torch's NCHW-flatten (c,h,w) order to the kernel's (h,w,c)
    order, biases -> (1, N) f32."""
    H, W = input_hw
    H1, W1 = _conv_out(H, 8, 4), _conv_out(W, 8, 4)
    H2, W2 = _conv_out(H1, 4, 2), _conv_out(W1, 4, 2)
    H3, W3 = _conv_out(H2, 3, 1), _conv_out(W2, 3, 1)
    C3 = p["w3_oihw"].shape[0]

    perm = np.empty(H3 * W3 * C3, dtype=np.int32)
    for h in range(H3):
        for w in range(W3):
            for c in range(C3):
                perm[(h * W3 + w) * C3 + c] = c * H3 * W3 + h * W3 + w

    return {
        "w1": (conv_w_to_mat(p["w1_oihw"]) / 255.0).astype(jnp.bfloat16),
        "b1": p["b1"].reshape(1, -1).astype(jnp.float32),
        "w2": conv_w_to_mat(p["w2_oihw"]).astype(jnp.bfloat16),
        "b2": p["b2"].reshape(1, -1).astype(jnp.float32),
        "w3": conv_w_to_mat(p["w3_oihw"]).astype(jnp.bfloat16),
        "b3": p["b3"].reshape(1, -1).astype(jnp.float32),
        "wfc": p["wfc"][perm].astype(jnp.bfloat16),
        "bfc": p["bfc"].reshape(1, -1).astype(jnp.float32),
    }


def _pick_batch_tile(B):
    # conv1 rows per grid step = 64 * tile (512..2048 sweet spot).  The output
    # BlockSpec wants the batch tile to be a multiple of 8 or the whole batch.
    for tb in (32, 16, 8):
        if B % tb == 0:
            return tb
    return B


def nature_trunk_pallas(x_nhwc, prep, *, batch_tile=None):
    B, H, W, C = x_nhwc.shape
    H1, W1 = _conv_out(H, 8, 4), _conv_out(W, 8, 4)
    H2, W2 = _conv_out(H1, 4, 2), _conv_out(W1, 4, 2)
    H3, W3 = _conv_out(H2, 3, 1), _conv_out(W2, 3, 1)
    P1, K1 = H1 * W1, 8 * 8 * C
    K2, C2 = prep["w2"].shape
    K3, C3 = prep["w3"].shape
    F, NFC = prep["wfc"].shape
    assert prep["w1"].shape[0] == K1
    assert F == H3 * W3 * C3

    # conv1 im2col stays in XLA but on the raw (uint8) input dtype; the float
    # cast and the (folded) 1/255 scaling happen inside the kernel.
    cols1, _ = im2col_nhwc(x_nhwc, 8, 8, 4)                  # (B, P1, K1)

    TB = batch_tile if batch_tile is not None else _pick_batch_tile(B)
    assert B % TB == 0, (B, TB)

    kernel = functools.partial(
        _fused_trunk_kernel, conv1_hw=(H1, W1), k2=4, s2=2, k3=3, s3=1)

    return pl.pallas_call(
        kernel,
        out_shape=jax.ShapeDtypeStruct((B, NFC), jnp.float32),
        grid=(B // TB,),
        in_specs=[
            pl.BlockSpec((TB, P1, K1), lambda i: (i, 0, 0)),       # uint8 cols
            pl.BlockSpec((K1, prep["w1"].shape[1]), lambda i: (0, 0)),
            pl.BlockSpec((1, prep["b1"].shape[1]), lambda i: (0, 0)),
            pl.BlockSpec((K2, C2), lambda i: (0, 0)),
            pl.BlockSpec((1, C2), lambda i: (0, 0)),
            pl.BlockSpec((K3, C3), lambda i: (0, 0)),
            pl.BlockSpec((1, C3), lambda i: (0, 0)),
            pl.BlockSpec((F, NFC), lambda i: (0, 0)),
            pl.BlockSpec((1, NFC), lambda i: (0, 0)),
        ],
        out_specs=pl.BlockSpec((TB, NFC), lambda i: (i, 0)),
        compiler_params=pltpu.CompilerParams(
            dimension_semantics=("parallel",),     # 2 TCs on v7x; no-op on v5e/v6e
            vmem_limit_bytes=32 * 1024 * 1024),
    )(cols1, prep["w1"], prep["b1"], prep["w2"], prep["b2"],
      prep["w3"], prep["b3"], prep["wfc"], prep["bfc"])


def nature_trunk_reference(x_nhwc, p):
    """Pure-JAX (f32) mirror of the PyTorch forward, for the correctness check."""
    x = x_nhwc.astype(jnp.float32)
    x = jnp.transpose(x, (0, 3, 1, 2)) / 255.0

    def conv(x, w, b, stride):
        y = jax.lax.conv_general_dilated(
            x, w, (stride, stride), "VALID",
            dimension_numbers=("NCHW", "OIHW", "NCHW"))
        return jax.nn.relu(y + b[None, :, None, None])

    x = conv(x, p["w1_oihw"], p["b1"], 4)
    x = conv(x, p["w2_oihw"], p["b2"], 2)
    x = conv(x, p["w3_oihw"], p["b3"], 1)
    x = x.reshape(x.shape[0], -1)
    return jax.nn.relu(x @ p["wfc"] + p["bfc"])


if __name__ == "__main__":
    # input_shape = (H, W, C) = (36, 36, 4) -> conv output (64, 1, 1) -> fc 512
    B, H, W, C = 16, 36, 36, 4
    key = jax.random.PRNGKey(0)
    k_x, k_p = jax.random.split(key)
    x = jax.random.randint(k_x, (B, H, W, C), 0, 256, dtype=jnp.int32).astype(jnp.uint8)

    params = init_params(k_p, C)
    prep = prepare_params(params, (H, W))   # one-time weight prep (outside the fwd)

    fwd = jax.jit(functools.partial(nature_trunk_pallas, batch_tile=8))  # grid=(2,)
    out = jax.block_until_ready(fwd(x, prep))
    assert out.shape == (B, 512) and out.dtype == jnp.float32

    ref = jax.block_until_ready(nature_trunk_reference(x, params))
    np.testing.assert_allclose(np.asarray(out), np.asarray(ref), rtol=2e-2, atol=2e-2)

    print("KERNEL_OK")
</pallas_src>

<mosaic_0001>
module attributes {stable_mosaic.version = 11 : i64} {
  func.func @_fused_trunk_kernel(%arg0: i32, %arg1: memref<8x64x256xi8, #tpu.memory_space<vmem>>, %arg2: memref<256x32xbf16, #tpu.memory_space<vmem>>, %arg3: memref<1x32xf32, #tpu.memory_space<vmem>>, %arg4: memref<512x64xbf16, #tpu.memory_space<vmem>>, %arg5: memref<1x64xf32, #tpu.memory_space<vmem>>, %arg6: memref<576x64xbf16, #tpu.memory_space<vmem>>, %arg7: memref<1x64xf32, #tpu.memory_space<vmem>>, %arg8: memref<64x512xbf16, #tpu.memory_space<vmem>>, %arg9: memref<1x512xf32, #tpu.memory_space<vmem>>, %arg10: memref<8x512xf32, #tpu.memory_space<vmem>>) attributes {dimension_semantics = [#tpu.dimension_semantics<parallel>], iteration_bounds = array<i64: 2>, scalar_prefetch = 0 : i64, scratch_operands = 0 : i64, tpu.core_type = #tpu.core_type<tc>, window_params = [{transform_indices = @transform_0, window_bounds = array<i64: 8, 64, 256>}, {pipeline_mode = #tpu.pipeline_mode<synchronous>, transform_indices = @transform_1, window_bounds = array<i64: 256, 32>}, {pipeline_mode = #tpu.pipeline_mode<synchronous>, transform_indices = @transform_2, window_bounds = array<i64: 1, 32>}, {pipeline_mode = #tpu.pipeline_mode<synchronous>, transform_indices = @transform_3, window_bounds = array<i64: 512, 64>}, {pipeline_mode = #tpu.pipeline_mode<synchronous>, transform_indices = @transform_4, window_bounds = array<i64: 1, 64>}, {pipeline_mode = #tpu.pipeline_mode<synchronous>, transform_indices = @transform_5, window_bounds = array<i64: 576, 64>}, {pipeline_mode = #tpu.pipeline_mode<synchronous>, transform_indices = @transform_6, window_bounds = array<i64: 1, 64>}, {pipeline_mode = #tpu.pipeline_mode<synchronous>, transform_indices = @transform_7, window_bounds = array<i64: 64, 512>}, {pipeline_mode = #tpu.pipeline_mode<synchronous>, transform_indices = @transform_8, window_bounds = array<i64: 1, 512>}, {transform_indices = @transform_9, window_bounds = array<i64: 8, 512>}]} {
    %c0 = arith.constant 0 : index
    %c0_0 = arith.constant 0 : index
    %c0_1 = arith.constant 0 : index
    %0 = vector.load %arg1[%c0, %c0_0, %c0_1] : memref<8x64x256xi8, #tpu.memory_space<vmem>>, vector<8x64x256xi8>
    %1 = vector.shape_cast %0 : vector<8x64x256xi8> to vector<512x256xi8>
    %2 = arith.extui %1 : vector<512x256xi8> to vector<512x256xi32>
    %3 = arith.sitofp %2 : vector<512x256xi32> to vector<512x256xf32>
    %4 = arith.truncf %3 : vector<512x256xf32> to vector<512x256xbf16>
    %c0_2 = arith.constant 0 : index
    %c0_3 = arith.constant 0 : index
    %5 = vector.load %arg2[%c0_2, %c0_3] : memref<256x32xbf16, #tpu.memory_space<vmem>>, vector<256x32xbf16>
    %cst = arith.constant dense<0.000000e+00> : vector<512x32xf32>
    %6 = tpu.matmul %4, %5, %cst {dimension_numbers = #tpu.dot_dimension_numbers<[1], [0], [0], [1], [0, 0, 1, 1], [], []>} : vector<512x256xbf16>, vector<256x32xbf16>, vector<512x32xf32> -> vector<512x32xf32>
    %c0_4 = arith.constant 0 : index
    %c0_5 = arith.constant 0 : index
    %7 = vector.load %arg3[%c0_4, %c0_5] : memref<1x32xf32, #tpu.memory_space<vmem>>, vector<1x32xf32>
    %8 = vector.broadcast %7 : vector<1x32xf32> to vector<512x32xf32>
    %9 = arith.addf %6, %8 : vector<512x32xf32>
    %cst_6 = arith.constant 0.000000e+00 : f32
    %10 = vector.broadcast %cst_6 : f32 to vector<512x32xf32>
    %11 = arith.maximumf %9, %10 : vector<512x32xf32>
    %12 = arith.truncf %11 : vector<512x32xf32> to vector<512x32xbf16>
    %13 = vector.shape_cast %12 : vector<512x32xbf16> to vector<8x64x32xbf16>
    %14 = vector.extract_strided_slice %13 {offsets = [0, 0, 0], sizes = [8, 1, 32], strides = [1, 1, 1]} : vector<8x64x32xbf16> to vector<8x1x32xbf16>
    %15 = vector.shape_cast %14 : vector<8x1x32xbf16> to vector<8x32xbf16>
    %16 = vector.extract_strided_slice %13 {offsets = [0, 1, 0], sizes = [8, 1, 32], strides = [1, 1, 1]} : vector<8x64x32xbf16> to vector<8x1x32xbf16>
    %17 = vector.shape_cast %16 : vector<8x1x32xbf16> to vector<8x32xbf16>
    %18 = vector.extract_strided_slice %13 {offsets = [0, 2, 0], sizes = [8, 1, 32], strides = [1, 1, 1]} : vector<8x64x32xbf16> to vector<8x1x32xbf16>
    %19 = vector.shape_cast %18 : vector<8x1x32xbf16> to vector<8x32xbf16>
    %20 = vector.extract_strided_slice %13 {offsets = [0, 3, 0], sizes = [8, 1, 32], strides = [1, 1, 1]} : vector<8x64x32xbf16> to vector<8x1x32xbf16>
    %21 = vector.shape_cast %20 : vector<8x1x32xbf16> to vector<8x32xbf16>
    %22 = vector.extract_strided_slice %13 {offsets = [0, 4, 0], sizes = [8, 1, 32], strides = [1, 1, 1]} : vector<8x64x32xbf16> to vector<8x1x32xbf16>
    %23 = vector.shape_cast %22 : vector<8x1x32xbf16> to vector<8x32xbf16>
    %24 = vector.extract_strided_slice %13 {offsets = [0, 5, 0], sizes = [8, 1, 32], strides = [1, 1, 1]} : vector<8x64x32xbf16> to vector<8x1x32xbf16>
    %25 = vector.shape_cast %24 : vector<8x1x32xbf16> to vector<8x32xbf16>
    %26 = vector.extract_strided_slice %13 {offsets = [0, 6, 0], sizes = [8, 1, 32], strides = [1, 1, 1]} : vector<8x64x32xbf16> to vector<8x1x32xbf16>
    %27 = vector.shape_cast %26 : vector<8x1x32xbf16> to vector<8x32xbf16>
    %28 = vector.extract_strided_slice %13 {offsets = [0, 7, 0], sizes = [8, 1, 32], strides = [1, 1, 1]} : vector<8x64x32xbf16> to vector<8x1x32xbf16>
    %29 = vector.shape_cast %28 : vector<8x1x32xbf16> to vector<8x32xbf16>
    %30 = vector.extract_strided_slice %13 {offsets = [0, 8, 0], sizes = [8, 1, 32], strides = [1, 1, 1]} : vector<8x64x32xbf16> to vector<8x1x32xbf16>
    %31 = vector.shape_cast %30 : vector<8x1x32xbf16> to vector<8x32xbf16>
    %32 = vector.extract_strided_slice %13 {offsets = [0, 9, 0], sizes = [8, 1, 32], strides = [1, 1, 1]} : vector<8x64x32xbf16> to vector<8x1x32xbf16>
    %33 = vector.shape_cast %32 : vector<8x1x32xbf16> to vector<8x32xbf16>
    %34 = vector.extract_strided_slice %13 {offsets = [0, 10, 0], sizes = [8, 1, 32], strides = [1, 1, 1]} : vector<8x64x32xbf16> to vector<8x1x32xbf16>
    %35 = vector.shape_cast %34 : vector<8x1x32xbf16> to vector<8x32xbf16>
    %36 = vector.extract_strided_slice %13 {offsets = [0, 11, 0], sizes = [8, 1, 32], strides = [1, 1, 1]} : vector<8x64x32xbf16> to vector<8x1x32xbf16>
    %37 = vector.shape_cast %36 : vector<8x1x32xbf16> to vector<8x32xbf16>
    %38 = vector.extract_strided_slice %13 {offsets = [0, 12, 0], sizes = [8, 1, 32], strides = [1, 1, 1]} : vector<8x64x32xbf16> to vector<8x1x32xbf16>
    %39 = vector.shape_cast %38 : vector<8x1x32xbf16> to vector<8x32xbf16>
    %40 = vector.extract_strided_slice %13 {offsets = [0, 13, 0], sizes = [8, 1, 32], strides = [1, 1, 1]} : vector<8x64x32xbf16> to vector<8x1x32xbf16>
    %41 = vector.shape_cast %40 : vector<8x1x32xbf16> to vector<8x32xbf16>
    %42 = vector.extract_strided_slice %13 {offsets = [0, 14, 0], sizes = [8, 1, 32], strides = [1, 1, 1]} : vector<8x64x32xbf16> to vector<8x1x32xbf16>
    %43 = vector.shape_cast %42 : vector<8x1x32xbf16> to vector<8x32xbf16>
    %44 = vector.extract_strided_slice %13 {offsets = [0, 15, 0], sizes = [8, 1, 32], strides = [1, 1, 1]} : vector<8x64x32xbf16> to vector<8x1x32xbf16>
    %45 = vector.shape_cast %44 : vector<8x1x32xbf16> to vector<8x32xbf16>
    %46 = vector.extract_strided_slice %13 {offsets = [0, 16, 0], sizes = [8, 1, 32], strides = [1, 1, 1]} : vector<8x64x32xbf16> to vector<8x1x32xbf16>
    %47 = vector.shape_cast %46 : vector<8x1x32xbf16> to vector<8x32xbf16>
    %48 = vector.extract_strided_slice %13 {offsets = [0, 17, 0], sizes = [8, 1, 32], strides = [1, 1, 1]} : vector<8x64x32xbf16> to vector<8x1x32xbf16>
    %49 = vector.shape_cast %48 : vector<8x1x32xbf16> to vector<8x32xbf16>
    %50 = vector.extract_strided_slice %13 {offsets = [0, 18, 0], sizes = [8, 1, 32], strides = [1, 1, 1]} : vector<8x64x32xbf16> to vector<8x1x32xbf16>
    %51 = vector.shape_cast %50 : vector<8x1x32xbf16> to vector<8x32xbf16>
    %52 = vector.extract_strided_slice %13 {offsets = [0, 19, 0], sizes = [8, 1, 32], strides = [1, 1, 1]} : vector<8x64x32xbf16> to vector<8x1x32xbf16>
    %53 = vector.shape_cast %52 : vector<8x1x32xbf16> to vector<8x32xbf16>
    %54 = vector.extract_strided_slice %13 {offsets = [0, 20, 0], sizes = [8, 1, 32], strides = [1, 1, 1]} : vector<8x64x32xbf16> to vector<8x1x32xbf16>
    %55 = vector.shape_cast %54 : vector<8x1x32xbf16> to vector<8x32xbf16>
    %56 = vector.extract_strided_slice %13 {offsets = [0, 21, 0], sizes = [8, 1, 32], strides = [1, 1, 1]} : vector<8x64x32xbf16> to vector<8x1x32xbf16>
    %57 = vector.shape_cast %56 : vector<8x1x32xbf16> to vector<8x32xbf16>
    %58 = vector.extract_strided_slice %13 {offsets = [0, 22, 0], sizes = [8, 1, 32], strides = [1, 1, 1]} : vector<8x64x32xbf16> to vector<8x1x32xbf16>
    %59 = vector.shape_cast %58 : vector<8x1x32xbf16> to vector<8x32xbf16>
    %60 = vector.extract_strided_slice %13 {offsets = [0, 23, 0], sizes = [8, 1, 32], strides = [1, 1, 1]} : vector<8x64x32xbf16> to vector<8x1x32xbf16>
    %61 = vector.shape_cast %60 : vector<8x1x32xbf16> to vector<8x32xbf16>
    %62 = vector.extract_strided_slice %13 {offsets = [0, 24, 0], sizes = [8, 1, 32], strides = [1, 1, 1]} : vector<8x64x32xbf16> to vector<8x1x32xbf16>
    %63 = vector.shape_cast %62 : vector<8x1x32xbf16> to vector<8x32xbf16>
    %64 = vector.extract_strided_slice %13 {offsets = [0, 25, 0], sizes = [8, 1, 32], strides = [1, 1, 1]} : vector<8x64x32xbf16> to vector<8x1x32xbf16>
    %65 = vector.shape_cast %64 : vector<8x1x32xbf16> to vector<8x32xbf16>
    %66 = vector.extract_strided_slice %13 {offsets = [0, 26, 0], sizes = [8, 1, 32], strides = [1, 1, 1]} : vector<8x64x32xbf16> to vector<8x1x32xbf16>
    %67 = vector.shape_cast %66 : vector<8x1x32xbf16> to vector<8x32xbf16>
    %68 = vector.extract_strided_slice %13 {offsets = [0, 27, 0], sizes = [8, 1, 32], strides = [1, 1, 1]} : vector<8x64x32xbf16> to vector<8x1x32xbf16>
    %69 = vector.shape_cast %68 : vector<8x1x32xbf16> to vector<8x32xbf16>
    %70 = vector.extract_strided_slice %13 {offsets = [0, 28, 0], sizes = [8, 1, 32], strides = [1, 1, 1]} : vector<8x64x32xbf16> to vector<8x1x32xbf16>
    %71 = vector.shape_cast %70 : vector<8x1x32xbf16> to vector<8x32xbf16>
    %72 = vector.extract_strided_slice %13 {offsets = [0, 29, 0], sizes = [8, 1, 32], strides = [1, 1, 1]} : vector<8x64x32xbf16> to vector<8x1x32xbf16>
    %73 = vector.shape_cast %72 : vector<8x1x32xbf16> to vector<8x32xbf16>
    %74 = vector.extract_strided_slice %13 {offsets = [0, 30, 0], sizes = [8, 1, 32], strides = [1, 1, 1]} : vector<8x64x32xbf16> to vector<8x1x32xbf16>
    %75 = vector.shape_cast %74 : vector<8x1x32xbf16> to vector<8x32xbf16>
    %76 = vector.extract_strided_slice %13 {offsets = [0, 31, 0], sizes = [8, 1, 32], strides = [1, 1, 1]} : vector<8x64x32xbf16> to vector<8x1x32xbf16>
    %77 = vector.shape_cast %76 : vector<8x1x32xbf16> to vector<8x32xbf16>
    %78 = vector.extract_strided_slice %13 {offsets = [0, 32, 0], sizes = [8, 1, 32], strides = [1, 1, 1]} : vector<8x64x32xbf16> to vector<8x1x32xbf16>
    %79 = vector.shape_cast %78 : vector<8x1x32xbf16> to vector<8x32xbf16>
    %80 = vector.extract_strided_slice %13 {offsets = [0, 33, 0], sizes = [8, 1, 32], strides = [1, 1, 1]} : vector<8x64x32xbf16> to vector<8x1x32xbf16>
    %81 = vector.shape_cast %80 : vector<8x1x32xbf16> to vector<8x32xbf16>
    %82 = vector.extract_strided_slice %13 {offsets = [0, 34, 0], sizes = [8, 1, 32], strides = [1, 1, 1]} : vector<8x64x32xbf16> to vector<8x1x32xbf16>
    %83 = vector.shape_cast %82 : vector<8x1x32xbf16> to vector<8x32xbf16>
    %84 = vector.extract_strided_slice %13 {offsets = [0, 35, 0], sizes = [8, 1, 32], strides = [1, 1, 1]} : vector<8x64x32xbf16> to vector<8x1x32xbf16>
    %85 = vector.shape_cast %84 : vector<8x1x32xbf16> to vector<8x32xbf16>
    %86 = vector.extract_strided_slice %13 {offsets = [0, 36, 0], sizes = [8, 1, 32], strides = [1, 1, 1]} : vector<8x64x32xbf16> to vector<8x1x32xbf16>
    %87 = vector.shape_cast %86 : vector<8x1x32xbf16> to vector<8x32xbf16>
    %88 = vector.extract_strided_slice %13 {offsets = [0, 37, 0], sizes = [8, 1, 32], strides = [1, 1, 1]} : vector<8x64x32xbf16> to vector<8x1x32xbf16>
    %89 = vector.shape_cast %88 : vector<8x1x32xbf16> to vector<8x32xbf16>
    %90 = vector.extract_strided_slice %13 {offsets = [0, 38, 0], sizes = [8, 1, 32], strides = [1, 1, 1]} : vector<8x64x32xbf16> to vector<8x1x32xbf16>
    %91 = vector.shape_cast %90 : vector<8x1x32xbf16> to vector<8x32xbf16>
    %92 = vector.extract_strided_slice %13 {offsets = [0, 39, 0], sizes = [8, 1, 32], strides = [1, 1, 1]} : vector<8x64x32xbf16> to vector<8x1x32xbf16>
    %93 = vector.shape_cast %92 : vector<8x1x32xbf16> to vector<8x32xbf16>
    %94 = vector.extract_strided_slice %13 {offsets = [0, 40, 0], sizes = [8, 1, 32], strides = [1, 1, 1]} : vector<8x64x32xbf16> to vector<8x1x32xbf16>
    %95 = vector.shape_cast %94 : vector<8x1x32xbf16> to vector<8x32xbf16>
    %96 = vector.extract_strided_slice %13 {offsets = [0, 41, 0], sizes = [8, 1, 32], strides = [1, 1, 1]} : vector<8x64x32xbf16> to vector<8x1x32xbf16>
    %97 = vector.shape_cast %96 : vector<8x1x32xbf16> to vector<8x32xbf16>
    %98 = vector.extract_strided_slice %13 {offsets = [0, 42, 0], sizes = [8, 1, 32], strides = [1, 1, 1]} : vector<8x64x32xbf16> to vector<8x1x32xbf16>
    %99 = vector.shape_cast %98 : vector<8x1x32xbf16> to vector<8x32xbf16>
    %100 = vector.extract_strided_slice %13 {offsets = [0, 43, 0], sizes = [8, 1, 32], strides = [1, 1, 1]} : vector<8x64x32xbf16> to vector<8x1x32xbf16>
    %101 = vector.shape_cast %100 : vector<8x1x32xbf16> to vector<8x32xbf16>
    %102 = vector.extract_strided_slice %13 {offsets = [0, 44, 0], sizes = [8, 1, 32], strides = [1, 1, 1]} : vector<8x64x32xbf16> to vector<8x1x32xbf16>
    %103 = vector.shape_cast %102 : vector<8x1x32xbf16> to vector<8x32xbf16>
    %104 = vector.extract_strided_slice %13 {offsets = [0, 45, 0], sizes = [8, 1, 32], strides = [1, 1, 1]} : vector<8x64x32xbf16> to vector<8x1x32xbf16>
    %105 = vector.shape_cast %104 : vector<8x1x32xbf16> to vector<8x32xbf16>
    %106 = vector.extract_strided_slice %13 {offsets = [0, 46, 0], sizes = [8, 1, 32], strides = [1, 1, 1]} : vector<8x64x32xbf16> to vector<8x1x32xbf16>
    %107 = vector.shape_cast %106 : vector<8x1x32xbf16> to vector<8x32xbf16>
    %108 = vector.extract_strided_slice %13 {offsets = [0, 47, 0], sizes = [8, 1, 32], strides = [1, 1, 1]} : vector<8x64x32xbf16> to vector<8x1x32xbf16>
    %109 = vector.shape_cast %108 : vector<8x1x32xbf16> to vector<8x32xbf16>
    %110 = vector.extract_strided_slice %13 {offsets = [0, 48, 0], sizes = [8, 1, 32], strides = [1, 1, 1]} : vector<8x64x32xbf16> to vector<8x1x32xbf16>
    %111 = vector.shape_cast %110 : vector<8x1x32xbf16> to vector<8x32xbf16>
    %112 = vector.extract_strided_slice %13 {offsets = [0, 49, 0], sizes = [8, 1, 32], strides = [1, 1, 1]} : vector<8x64x32xbf16> to vector<8x1x32xbf16>
    %113 = vector.shape_cast %112 : vector<8x1x32xbf16> to vector<8x32xbf16>
    %114 = vector.extract_strided_slice %13 {offsets = [0, 50, 0], sizes = [8, 1, 32], strides = [1, 1, 1]} : vector<8x64x32xbf16> to vector<8x1x32xbf16>
    %115 = vector.shape_cast %114 : vector<8x1x32xbf16> to vector<8x32xbf16>
    %116 = vector.extract_strided_slice %13 {offsets = [0, 51, 0], sizes = [8, 1, 32], strides = [1, 1, 1]} : vector<8x64x32xbf16> to vector<8x1x32xbf16>
    %117 = vector.shape_cast %116 : vector<8x1x32xbf16> to vector<8x32xbf16>
    %118 = vector.extract_strided_slice %13 {offsets = [0, 52, 0], sizes = [8, 1, 32], strides = [1, 1, 1]} : vector<8x64x32xbf16> to vector<8x1x32xbf16>
    %119 = vector.shape_cast %118 : vector<8x1x32xbf16> to vector<8x32xbf16>
    %120 = vector.extract_strided_slice %13 {offsets = [0, 53, 0], sizes = [8, 1, 32], strides = [1, 1, 1]} : vector<8x64x32xbf16> to vector<8x1x32xbf16>
    %121 = vector.shape_cast %120 : vector<8x1x32xbf16> to vector<8x32xbf16>
    %122 = vector.extract_strided_slice %13 {offsets = [0, 54, 0], sizes = [8, 1, 32], strides = [1, 1, 1]} : vector<8x64x32xbf16> to vector<8x1x32xbf16>
    %123 = vector.shape_cast %122 : vector<8x1x32xbf16> to vector<8x32xbf16>
    %124 = vector.extract_strided_slice %13 {offsets = [0, 55, 0], sizes = [8, 1, 32], strides = [1, 1, 1]} : vector<8x64x32xbf16> to vector<8x1x32xbf16>
    %125 = vector.shape_cast %124 : vector<8x1x32xbf16> to vector<8x32xbf16>
    %126 = vector.extract_strided_slice %13 {offsets = [0, 56, 0], sizes = [8, 1, 32], strides = [1, 1, 1]} : vector<8x64x32xbf16> to vector<8x1x32xbf16>
    %127 = vector.shape_cast %126 : vector<8x1x32xbf16> to vector<8x32xbf16>
    %128 = vector.extract_strided_slice %13 {offsets = [0, 57, 0], sizes = [8, 1, 32], strides = [1, 1, 1]} : vector<8x64x32xbf16> to vector<8x1x32xbf16>
    %129 = vector.shape_cast %128 : vector<8x1x32xbf16> to vector<8x32xbf16>
    %130 = vector.extract_strided_slice %13 {offsets = [0, 58, 0], sizes = [8, 1, 32], strides = [1, 1, 1]} : vector<8x64x32xbf16> to vector<8x1x32xbf16>
    %131 = vector.shape_cast %130 : vector<8x1x32xbf16> to vector<8x32xbf16>
    %132 = vector.extract_strided_slice %13 {offsets = [0, 59, 0], sizes = [8, 1, 32], strides = [1, 1, 1]} : vector<8x64x32xbf16> to vector<8x1x32xbf16>
    %133 = vector.shape_cast %132 : vector<8x1x32xbf16> to vector<8x32xbf16>
    %134 = vector.extract_strided_slice %13 {offsets = [0, 60, 0], sizes = [8, 1, 32], strides = [1, 1, 1]} : vector<8x64x32xbf16> to vector<8x1x32xbf16>
    %135 = vector.shape_cast %134 : vector<8x1x32xbf16> to vector<8x32xbf16>
    %136 = vector.extract_strided_slice %13 {offsets = [0, 61, 0], sizes = [8, 1, 32], strides = [1, 1, 1]} : vector<8x64x32xbf16> to vector<8x1x32xbf16>
    %137 = vector.shape_cast %136 : vector<8x1x32xbf16> to vector<8x32xbf16>
    %138 = vector.extract_strided_slice %13 {offsets = [0, 62, 0], sizes = [8, 1, 32], strides = [1, 1, 1]} : vector<8x64x32xbf16> to vector<8x1x32xbf16>
    %139 = vector.shape_cast %138 : vector<8x1x32xbf16> to vector<8x32xbf16>
    %140 = vector.extract_strided_slice %13 {offsets = [0, 63, 0], sizes = [8, 1, 32], strides = [1, 1, 1]} : vector<8x64x32xbf16> to vector<8x1x32xbf16>
    %141 = vector.shape_cast %140 : vector<8x1x32xbf16> to vector<8x32xbf16>
    %c0_7 = arith.constant 0 : index
    %c0_8 = arith.constant 0 : index
    %142 = vector.load %arg4[%c0_7, %c0_8] : memref<512x64xbf16, #tpu.memory_space<vmem>>, vector<512x64xbf16>
    %c0_9 = arith.constant 0 : index
    %c0_10 = arith.constant 0 : index
    %143 = vector.load %arg5[%c0_9, %c0_10] : memref<1x64xf32, #tpu.memory_space<vmem>>, vector<1x64xf32>
    %144 = tpu.concatenate %15, %17, %19, %21, %31, %33, %35, %37, %47, %49, %51, %53, %63, %65, %67, %69 in 1 : vector<8x32xbf16>, vector<8x32xbf16>, vector<8x32xbf16>, vector<8x32xbf16>, vector<8x32xbf16>, vector<8x32xbf16>, vector<8x32xbf16>, vector<8x32xbf16>, vector<8x32xbf16>, vector<8x32xbf16>, vector<8x32xbf16>, vector<8x32xbf16>, vector<8x32xbf16>, vector<8x32xbf16>, vector<8x32xbf16>, vector<8x32xbf16> -> vector<8x512xbf16>
    %cst_11 = arith.constant dense<0.000000e+00> : vector<8x64xf32>
    %145 = tpu.matmul %144, %142, %cst_11 {dimension_numbers = #tpu.dot_dimension_numbers<[1], [0], [0], [1], [0, 0, 1, 1], [], []>} : vector<8x512xbf16>, vector<512x64xbf16>, vector<8x64xf32> -> vector<8x64xf32>
    %146 = vector.broadcast %143 : vector<1x64xf32> to vector<8x64xf32>
    %147 = arith.addf %145, %146 : vector<8x64xf32>
    %cst_12 = arith.constant 0.000000e+00 : f32
    %148 = vector.broadcast %cst_12 : f32 to vector<8x64xf32>
    %149 = arith.maximumf %147, %148 : vector<8x64xf32>
    %150 = arith.truncf %149 : vector<8x64xf32> to vector<8x64xbf16>
    %151 = tpu.concatenate %19, %21, %23, %25, %35, %37, %39, %41, %51, %53, %55, %57, %67, %69, %71, %73 in 1 : vector<8x32xbf16>, vector<8x32xbf16>, vector<8x32xbf16>, vector<8x32xbf16>, vector<8x32xbf16>, vector<8x32xbf16>, vector<8x32xbf16>, vector<8x32xbf16>, vector<8x32xbf16>, vector<8x32xbf16>, vector<8x32xbf16>, vector<8x32xbf16>, vector<8x32xbf16>, vector<8x32xbf16>, vector<8x32xbf16>, vector<8x32xbf16> -> vector<8x512xbf16>
    %cst_13 = arith.constant dense<0.000000e+00> : vector<8x64xf32>
    %152 = tpu.matmul %151, %142, %cst_13 {dimension_numbers = #tpu.dot_dimension_numbers<[1], [0], [0], [1], [0, 0, 1, 1], [], []>} : vector<8x512xbf16>, vector<512x64xbf16>, vector<8x64xf32> -> vector<8x64xf32>
    %153 = vector.broadcast %143 : vector<1x64xf32> to vector<8x64xf32>
    %154 = arith.addf %152, %153 : vector<8x64xf32>
    %cst_14 = arith.constant 0.000000e+00 : f32
    %155 = vector.broadcast %cst_14 : f32 to vector<8x64xf32>
    %156 = arith.maximumf %154, %155 : vector<8x64xf32>
    %157 = arith.truncf %156 : vector<8x64xf32> to vector<8x64xbf16>
    %158 = tpu.concatenate %23, %25, %27, %29, %39, %41, %43, %45, %55, %57, %59, %61, %71, %73, %75, %77 in 1 : vector<8x32xbf16>, vector<8x32xbf16>, vector<8x32xbf16>, vector<8x32xbf16>, vector<8x32xbf16>, vector<8x32xbf16>, vector<8x32xbf16>, vector<8x32xbf16>, vector<8x32xbf16>, vector<8x32xbf16>, vector<8x32xbf16>, vector<8x32xbf16>, vector<8x32xbf16>, vector<8x32xbf16>, vector<8x32xbf16>, vector<8x32xbf16> -> vector<8x512xbf16>
    %cst_15 = arith.constant dense<0.000000e+00> : vector<8x64xf32>
    %159 = tpu.matmul %158, %142, %cst_15 {dimension_numbers = #tpu.dot_dimension_numbers<[1], [0], [0], [1], [0, 0, 1, 1], [], []>} : vector<8x512xbf16>, vector<512x64xbf16>, vector<8x64xf32> -> vector<8x64xf32>
    %160 = vector.broadcast %143 : vector<1x64xf32> to vector<8x64xf32>
    %161 = arith.addf %159, %160 : vector<8x64xf32>
    %cst_16 = arith.constant 0.000000e+00 : f32
    %162 = vector.broadcast %cst_16 : f32 to vector<8x64xf32>
    %163 = arith.maximumf %161, %162 : vector<8x64xf32>
    %164 = arith.truncf %163 : vector<8x64xf32> to vector<8x64xbf16>
    %165 = tpu.concatenate %47, %49, %51, %53, %63, %65, %67, %69, %79, %81, %83, %85, %95, %97, %99, %101 in 1 : vector<8x32xbf16>, vector<8x32xbf16>, vector<8x32xbf16>, vector<8x32xbf16>, vector<8x32xbf16>, vector<8x32xbf16>, vector<8x32xbf16>, vector<8x32xbf16>, vector<8x32xbf16>, vector<8x32xbf16>, vector<8x32xbf16>, vector<8x32xbf16>, vector<8x32xbf16>, vector<8x32xbf16>, vector<8x32xbf16>, vector<8x32xbf16> -> vector<8x512xbf16>
    %cst_17 = arith.constant dense<0.000000e+00> : vector<8x64xf32>
    %166 = tpu.matmul %165, %142, %cst_17 {dimension_numbers = #tpu.dot_dimension_numbers<[1], [0], [0], [1], [0, 0, 1, 1], [], []>} : vector<8x512xbf16>, vector<512x64xbf16>, vector<8x64xf32> -> vector<8x64xf32>
    %167 = vector.broadcast %143 : vector<1x64xf32> to vector<8x64xf32>
    %168 = arith.addf %166, %167 : vector<8x64xf32>
    %cst_18 = arith.constant 0.000000e+00 : f32
    %169 = vector.broadcast %cst_18 : f32 to vector<8x64xf32>
    %170 = arith.maximumf %168, %169 : vector<8x64xf32>
    %171 = arith.truncf %170 : vector<8x64xf32> to vector<8x64xbf16>
    %172 = tpu.concatenate %51, %53, %55, %57, %67, %69, %71, %73, %83, %85, %87, %89, %99, %101, %103, %105 in 1 : vector<8x32xbf16>, vector<8x32xbf16>, vector<8x32xbf16>, vector<8x32xbf16>, vector<8x32xbf16>, vector<8x32xbf16>, vector<8x32xbf16>, vector<8x32xbf16>, vector<8x32xbf16>, vector<8x32xbf16>, vector<8x32xbf16>, vector<8x32xbf16>, vector<8x32xbf16>, vector<8x32xbf16>, vector<8x32xbf16>, vector<8x32xbf16> -> vector<8x512xbf16>
    %cst_19 = arith.constant dense<0.000000e+00> : vector<8x64xf32>
    %173 = tpu.matmul %172, %142, %cst_19 {dimension_numbers = #tpu.dot_dimension_numbers<[1], [0], [0], [1], [0, 0, 1, 1], [], []>} : vector<8x512xbf16>, vector<512x64xbf16>, vector<8x64xf32> -> vector<8x64xf32>
    %174 = vector.broadcast %143 : vector<1x64xf32> to vector<8x64xf32>
    %175 = arith.addf %173, %174 : vector<8x64xf32>
    %cst_20 = arith.constant 0.000000e+00 : f32
    %176 = vector.broadcast %cst_20 : f32 to vector<8x64xf32>
    %177 = arith.maximumf %175, %176 : vector<8x64xf32>
    %178 = arith.truncf %177 : vector<8x64xf32> to vector<8x64xbf16>
    %179 = tpu.concatenate %55, %57, %59, %61, %71, %73, %75, %77, %87, %89, %91, %93, %103, %105, %107, %109 in 1 : vector<8x32xbf16>, vector<8x32xbf16>, vector<8x32xbf16>, vector<8x32xbf16>, vector<8x32xbf16>, vector<8x32xbf16>, vector<8x32xbf16>, vector<8x32xbf16>, vector<8x32xbf16>, vector<8x32xbf16>, vector<8x32xbf16>, vector<8x32xbf16>, vector<8x32xbf16>, vector<8x32xbf16>, vector<8x32xbf16>, vector<8x32xbf16> -> vector<8x512xbf16>
    %cst_21 = arith.constant dense<0.000000e+00> : vector<8x64xf32>
    %180 = tpu.matmul %179, %142, %cst_21 {dimension_numbers = #tpu.dot_dimension_numbers<[1], [0], [0], [1], [0, 0, 1, 1], [], []>} : vector<8x512xbf16>, vector<512x64xbf16>, vector<8x64xf32> -> vector<8x64xf32>
    %181 = vector.broadcast %143 : vector<1x64xf32> to vector<8x64xf32>
    %182 = arith.addf %180, %181 : vector<8x64xf32>
    %cst_22 = arith.constant 0.000000e+00 : f32
    %183 = vector.broadcast %cst_22 : f32 to vector<8x64xf32>
    %184 = arith.maximumf %182, %183 : vector<8x64xf32>
    %185 = arith.truncf %184 : vector<8x64xf32> to vector<8x64xbf16>
    %186 = tpu.concatenate %79, %81, %83, %85, %95, %97, %99, %101, %111, %113, %115, %117, %127, %129, %131, %133 in 1 : vector<8x32xbf16>, vector<8x32xbf16>, vector<8x32xbf16>, vector<8x32xbf16>, vector<8x32xbf16>, vector<8x32xbf16>, vector<8x32xbf16>, vector<8x32xbf16>, vector<8x32xbf16>, vector<8x32xbf16>, vector<8x32xbf16>, vector<8x32xbf16>, vector<8x32xbf16>, vector<8x32xbf16>, vector<8x32xbf16>, vector<8x32xbf16> -> vector<8x512xbf16>
    %cst_23 = arith.constant dense<0.000000e+00> : vector<8x64xf32>
    %187 = tpu.matmul %186, %142, %cst_23 {dimension_numbers = #tpu.dot_dimension_numbers<[1], [0], [0], [1], [0, 0, 1, 1], [], []>} : vector<8x512xbf16>, vector<512x64xbf16>, vector<8x64xf32> -> vector<8x64xf32>
    %188 = vector.broadcast %143 : vector<1x64xf32> to vector<8x64xf32>
    %189 = arith.addf %187, %188 : vector<8x64xf32>
    %cst_24 = arith.constant 0.000000e+00 : f32
    %190 = vector.broadcast %cst_24 : f32 to vector<8x64xf32>
    %191 = arith.maximumf %189, %190 : vector<8x64xf32>
    %192 = arith.truncf %191 : vector<8x64xf32> to vector<8x64xbf16>
    %193 = tpu.concatenate %83, %85, %87, %89, %99, %101, %103, %105, %115, %117, %119, %121, %131, %133, %135, %137 in 1 : vector<8x32xbf16>, vector<8x32xbf16>, vector<8x32xbf16>, vector<8x32xbf16>, vector<8x32xbf16>, vector<8x32xbf16>, vector<8x32xbf16>, vector<8x32xbf16>, vector<8x32xbf16>, vector<8x32xbf16>, vector<8x32xbf16>, vector<8x32xbf16>, vector<8x32xbf16>, vector<8x32xbf16>, vector<8x32xbf16>, vector<8x32xbf16> -> vector<8x512xbf16>
    %cst_25 = arith.constant dense<0.000000e+00> : vector<8x64xf32>
    %194 = tpu.matmul %193, %142, %cst_25 {dimension_numbers = #tpu.dot_dimension_numbers<[1], [0], [0], [1], [0, 0, 1, 1], [], []>} : vector<8x512xbf16>, vector<512x64xbf16>, vector<8x64xf32> -> vector<8x64xf32>
    %195 = vector.broadcast %143 : vector<1x64xf32> to vector<8x64xf32>
    %196 = arith.addf %194, %195 : vector<8x64xf32>
    %cst_26 = arith.constant 0.000000e+00 : f32
    %197 = vector.broadcast %cst_26 : f32 to vector<8x64xf32>
    %198 = arith.maximumf %196, %197 : vector<8x64xf32>
    %199 = arith.truncf %198 : vector<8x64xf32> to vector<8x64xbf16>
    %200 = tpu.concatenate %87, %89, %91, %93, %103, %105, %107, %109, %119, %121, %123, %125, %135, %137, %139, %141 in 1 : vector<8x32xbf16>, vector<8x32xbf16>, vector<8x32xbf16>, vector<8x32xbf16>, vector<8x32xbf16>, vector<8x32xbf16>, vector<8x32xbf16>, vector<8x32xbf16>, vector<8x32xbf16>, vector<8x32xbf16>, vector<8x32xbf16>, vector<8x32xbf16>, vector<8x32xbf16>, vector<8x32xbf16>, vector<8x32xbf16>, vector<8x32xbf16> -> vector<8x512xbf16>
    %cst_27 = arith.constant dense<0.000000e+00> : vector<8x64xf32>
    %201 = tpu.matmul %200, %142, %cst_27 {dimension_numbers = #tpu.dot_dimension_numbers<[1], [0], [0], [1], [0, 0, 1, 1], [], []>} : vector<8x512xbf16>, vector<512x64xbf16>, vector<8x64xf32> -> vector<8x64xf32>
    %202 = vector.broadcast %143 : vector<1x64xf32> to vector<8x64xf32>
    %203 = arith.addf %201, %202 : vector<8x64xf32>
    %cst_28 = arith.constant 0.000000e+00 : f32
    %204 = vector.broadcast %cst_28 : f32 to vector<8x64xf32>
    %205 = arith.maximumf %203, %204 : vector<8x64xf32>
    %206 = arith.truncf %205 : vector<8x64xf32> to vector<8x64xbf16>
    %c0_29 = arith.constant 0 : index
    %c0_30 = arith.constant 0 : index
    %207 = vector.load %arg6[%c0_29, %c0_30] : memref<576x64xbf16, #tpu.memory_space<vmem>>, vector<576x64xbf16>
    %c0_31 = arith.constant 0 : index
    %c0_32 = arith.constant 0 : index
    %208 = vector.load %arg7[%c0_31, %c0_32] : memref<1x64xf32, #tpu.memory_space<vmem>>, vector<1x64xf32>
    %209 = tpu.concatenate %150, %157, %164, %171, %178, %185, %192, %199, %206 in 1 : vector<8x64xbf16>, vector<8x64xbf16>, vector<8x64xbf16>, vector<8x64xbf16>, vector<8x64xbf16>, vector<8x64xbf16>, vector<8x64xbf16>, vector<8x64xbf16>, vector<8x64xbf16> -> vector<8x576xbf16>
    %cst_33 = arith.constant dense<0.000000e+00> : vector<8x64xf32>
    %210 = tpu.matmul %209, %207, %cst_33 {dimension_numbers = #tpu.dot_dimension_numbers<[1], [0], [0], [1], [0, 0, 1, 1], [], []>} : vector<8x576xbf16>, vector<576x64xbf16>, vector<8x64xf32> -> vector<8x64xf32>
    %211 = vector.broadcast %208 : vector<1x64xf32> to vector<8x64xf32>
    %212 = arith.addf %210, %211 : vector<8x64xf32>
    %cst_34 = arith.constant 0.000000e+00 : f32
    %213 = vector.broadcast %cst_34 : f32 to vector<8x64xf32>
    %214 = arith.maximumf %212, %213 : vector<8x64xf32>
    %215 = arith.truncf %214 : vector<8x64xf32> to vector<8x64xbf16>
    %c0_35 = arith.constant 0 : index
    %c0_36 = arith.constant 0 : index
    %216 = vector.load %arg8[%c0_35, %c0_36] : memref<64x512xbf16, #tpu.memory_space<vmem>>, vector<64x512xbf16>
    %cst_37 = arith.constant dense<0.000000e+00> : vector<8x512xf32>
    %217 = tpu.matmul %215, %216, %cst_37 {dimension_numbers = #tpu.dot_dimension_numbers<[1], [0], [0], [1], [0, 0, 1, 1], [], []>} : vector<8x64xbf16>, vector<64x512xbf16>, vector<8x512xf32> -> vector<8x512xf32>
    %c0_38 = arith.constant 0 : index
    %c0_39 = arith.constant 0 : index
    %218 = vector.load %arg9[%c0_38, %c0_39] : memref<1x512xf32, #tpu.memory_space<vmem>>, vector<1x512xf32>
    %219 = vector.broadcast %218 : vector<1x512xf32> to vector<8x512xf32>
    %220 = arith.addf %217, %219 : vector<8x512xf32>
    %cst_40 = arith.constant 0.000000e+00 : f32
    %221 = vector.broadcast %cst_40 : f32 to vector<8x512xf32>
    %222 = arith.maximumf %220, %221 : vector<8x512xf32>
    %c0_41 = arith.constant 0 : index
    %c0_42 = arith.constant 0 : index
    %223 = vector.load %arg10[%c0_41, %c0_42] : memref<8x512xf32, #tpu.memory_space<vmem>>, vector<8x512xf32>
    tpu.vector_store %arg10[%c0_41, %c0_42], %222 {strides = array<i32>} : memref<8x512xf32, #tpu.memory_space<vmem>>, vector<8x512xf32>,
    return
  }
  func.func @transform_0(%arg0: i32) -> (i32, i32, i32) {
    %c0_i32 = arith.constant 0 : i32
    %c0_i32_0 = arith.constant 0 : i32
    %c0_i32_1 = arith.constant 0 : i32
    return %arg0, %c0_i32, %c0_i32_0 : i32, i32, i32
  }
  func.func @transform_1(%arg0: i32) -> (i32, i32) {
    %c0_i32 = arith.constant 0 : i32
    %c0_i32_0 = arith.constant 0 : i32
    %c0_i32_1 = arith.constant 0 : i32
    return %c0_i32, %c0_i32_0 : i32, i32
  }
  func.func @transform_2(%arg0: i32) -> (i32, i32) {
    %c0_i32 = arith.constant 0 : i32
    %c0_i32_0 = arith.constant 0 : i32
    %c0_i32_1 = arith.constant 0 : i32
    return %c0_i32, %c0_i32_0 : i32, i32
  }
  func.func @transform_3(%arg0: i32) -> (i32, i32) {
    %c0_i32 = arith.constant 0 : i32
    %c0_i32_0 = arith.constant 0 : i32
    %c0_i32_1 = arith.constant 0 : i32
    return %c0_i32, %c0_i32_0 : i32, i32
  }
  func.func @transform_4(%arg0: i32) -> (i32, i32) {
    %c0_i32 = arith.constant 0 : i32
    %c0_i32_0 = arith.constant 0 : i32
    %c0_i32_1 = arith.constant 0 : i32
    return %c0_i32, %c0_i32_0 : i32, i32
  }
  func.func @transform_5(%arg0: i32) -> (i32, i32) {
    %c0_i32 = arith.constant 0 : i32
    %c0_i32_0 = arith.constant 0 : i32
    %c0_i32_1 = arith.constant 0 : i32
    return %c0_i32, %c0_i32_0 : i32, i32
  }
  func.func @transform_6(%arg0: i32) -> (i32, i32) {
    %c0_i32 = arith.constant 0 : i32
    %c0_i32_0 = arith.constant 0 : i32
    %c0_i32_1 = arith.constant 0 : i32
    return %c0_i32, %c0_i32_0 : i32, i32
  }
  func.func @transform_7(%arg0: i32) -> (i32, i32) {
    %c0_i32 = arith.constant 0 : i32
    %c0_i32_0 = arith.constant 0 : i32
    %c0_i32_1 = arith.constant 0 : i32
    return %c0_i32, %c0_i32_0 : i32, i32
  }
  func.func @transform_8(%arg0: i32) -> (i32, i32) {
    %c0_i32 = arith.constant 0 : i32
    %c0_i32_0 = arith.constant 0 : i32
    %c0_i32_1 = arith.constant 0 : i32
    return %c0_i32, %c0_i32_0 : i32, i32
  }
  func.func @transform_9(%arg0: i32) -> (i32, i32) {
    %c0_i32 = arith.constant 0 : i32
    %c0_i32_0 = arith.constant 0 : i32
    return %arg0, %c0_i32 : i32, i32
  }
}

</mosaic_0001>

<bundles_post_ra>
// kernel: nature_trunk_pallas.1
= control target key start
LH: loop header
LB: loop body
LE: loop exit
PB: predicated region body
PF: predicated region fallthrough
CT: control target
= control target key end

     0   :  { %14 = vsyncpa [#allocation3], 0  ;;  %s10130_s0 = inlined_call_operand.vmem [shape: u8[16,64,256], index: 0, kind: input, shape index: {}]   ;;  %s10131_s1 = inlined_call_operand.vmem [shape: bf16[256,32], index: 1, kind: input, shape index: {}]   ;;  %s10132_s2 = inlined_call_operand.vmem [shape: f32[1,32], index: 2, kind: input, shape index: {}]   ;;  %s10133_s3 = inlined_call_operand.vmem [shape: bf16[512,64], index: 3, kind: input, shape index: {}]   ;;  %s10134_s4 = inlined_call_operand.vmem [shape: f32[1,64], index: 4, kind: input, shape index: {}]   ;;  %s10135_s5 = inlined_call_operand.vmem [shape: bf16[576,64], index: 5, kind: input, shape index: {}]   ;;  %s10136_s6 = inlined_call_operand.vmem [shape: f32[1,64], index: 6, kind: input, shape index: {}]   ;;  %s10137_s7 = inlined_call_operand.vmem [shape: bf16[64,512], index: 7, kind: input, shape index: {}]   ;;  %s10138_s8 = inlined_call_operand.vmem [shape: f32[1,512], index: 8, kind: input, shape index: {}]   ;;  %s10139_s9 = inlined_call_operand.hbm [shape: f32[16,512], index: 9, kind: output, shape index: {}]  }
   0x1   :  { %16 = vsyncpa [#allocation3 + $0x1], 0  ;;  %s5391_s30 = smov 0   ;;  %s5393_s10 = smov 0  }
   0x2   :  { %s5395_s11 = smov 0   ;;  %s5397_s12 = smov 0  }
   0x3 LB: > { %s5412_s13 = sadd.s32 4294967295, %s5332_s12   ;;  %s4441_s14 = sadd.s32 4294967294, %s5332_s12   ;;  %s5332_s12 = sphi %s5397_s12, %s11214_s12   ;;  %s5328_s11 = sphi %s5395_s11, %s11213_s11   ;;  %s5324_s10 = sphi %s5393_s10, %s11212_s10   ;;  %s5320_s30 = sphi %s5391_s30, %s11211_s30  }
   0x4   : > { %s5416_s15 = sadd.s32 1, %s5332_s12   ;;  %s223_s16 = sadd.s32 1, %s5328_s11 }
   0x5   : > { %s220_s17 = ssub.s32 %s5332_s12, %s5416_s15  ;;  %p233_p0 = scmp.ne.s32.totalorder %s5328_s11, %s5324_s10 }
   0x6   : > { %p221_p1 = scmp.eq.s32.totalorder %s220_s17, 0  ;;  %p234_p2 = scmp.eq.s32.totalorder %s5412_s13, 1 }
   0x7   : > { %p239_p3 = scmp.ne.s32.totalorder %s5324_s10, %s5320_s30  ;;  %p240_p4 = scmp.eq.s32.totalorder %s4441_s14, 1 }
   0x8   : > { %s5427_s18 = scalar_select %p221_p1, %s5328_s11, %s223_s16  }
   0x9   : > { %p5429_p5 = por %p234_p2, %p233_p0  ;;  %p5433_p6 = por %p240_p4, %p239_p3 }
   0xa   : > { %p4444_p7 = scmp.ge.s32.totalorder %s5332_s12, 1  ;;  %p292_p8 = scmp.lt.s32.totalorder %s5332_s12, 3 }
   0xc   : > { %p293_p9 = pnand %p4444_p7, %p292_p8 }
   0xe   : > { %296 = sbr.rel (%p293_p9) target bundleno = 1828 (0x724), region = 56 }
  0x15   : > { %v5128_v0 = vld [vmem:[%s10131_s1] sm:$0xff]   ;;  %v10140_v1 = vmov 0   ;;  %s4446_s23 = sshll.u32 %s5412_s13, 3  ;;  %v5129_v2 = vld [vmem:[%s10131_s1 + $0x8] sm:$0xff]   ;;  %v5130_v3 = vld [vmem:[%s10131_s1 + $0x10] sm:$0xff]   ;;  %vm1387_vm0 = vcmask 1041409  }
  0x16   : > { %920 = vmatprep.subr.bf16.mxu0 %v10140_v1  ;;  %p330_p10 = scmp.lt.s32.totalorder %s4446_s23, 15  ;;  %v5131_v4 = vld [vmem:[%s10131_s1 + $0x18] sm:$0xff]   ;;  %v5132_v5 = vld [vmem:[%s10131_s1 + $0x20] sm:$0xff]   ;;  %v5133_v10 = vld [vmem:[%s10131_s1 + $0x28] sm:$0xff]   ;;  %vm1393_vm1 = vcmask 1043459   ;;  %vm1399_vm2 = vcmask 1045509  }
  0x17   : > { %921 = vmatpush1.bf16.msra.mxu0 %v5128_v0  ;;  %v5134_v12 = vld [vmem:[%s10131_s1 + $0x30] sm:$0xff]   ;;  %v5135_v13 = vld [vmem:[%s10131_s1 + $0x38] sm:$0xff]   ;;  %v5136_v14 = vld [vmem:[%s10131_s1 + $0x40] sm:$0xff]   ;;  %vm1390_vm3 = vcmask 1042434   ;;  %vm1396_vm4 = vcmask 1044484   ;;  %vm1402_vm5 = vcmask 1046534  }
  0x18   : > { %922 = vmatprep.subr.bf16.mxu0 %v10140_v1  ;;  %s11216_s23 = smov (!%p330_p10, %s4446_s23), 15  ;;  %v5137_v15 = vld [vmem:[%s10131_s1 + $0x48] sm:$0xff]   ;;  %v5138_v16 = vld [vmem:[%s10131_s1 + $0x50] sm:$0xff]   ;;  %v5139_v17 = vld [vmem:[%s10131_s1 + $0x58] sm:$0xff]   ;;  %vm1405_vm6 = vcmask 1047559   ;;  %s5335_s27 = smov 64  }
  0x19   : > { %s4624_s14 = sshll.u32 %s11216_s23, 5  ;;  %v5140_v18 = vld [vmem:[%s10131_s1 + $0x60] sm:$0xff]   ;;  %v5141_v19 = vld [vmem:[%s10131_s1 + $0x68] sm:$0xff]   ;;  %v5142_v20 = vld [vmem:[%s10131_s1 + $0x70] sm:$0xff]   ;;  %s5336_s28 = smov 32   ;;  %vm1689_vm7 = vcmask 261120  }
  0x1a   : > { %s5459_s21 = scalar_lea.vmem %s10130_s0, %s4624_s14  ;;  %v5143_v23 = vld [vmem:[%s10131_s1 + $0x78] sm:$0xff]   ;;  %vm1693_vm8 = vcmask 523264   ;;  %vm1696_vm9 = vcmask 785408   ;;  %vm5339_vm10 = vmmov 0   ;;  %s326_s24 = sand.u32 1, %s5324_s10  }
  0x1b   : > { %923 = vmatpush1.bf16.msra.mxu0 %v5129_v2  ;;  %v337_v6 = vld [vmem:[%s5459_s21] sm:$0xf]  ;;  %v338_v7 = vld [vmem:[%s5459_s21 + $0x4] sm:$0xf]  ;;  %v339_v21 = vld [vmem:[%s5459_s21 + $0x8] sm:$0xf] }
  0x1c   : > { %924 = vmatprep.subr.bf16.mxu0 %v10140_v1  ;;  %v401_v8 = vunpack.c.l.u8.bf16 %v337_v6  ;;  %v402_v9 = vunpack.c.l.u8.bf16 %v338_v7  ;;  %v340_v22 = vld [vmem:[%s5459_s21 + $0xc] sm:$0xf]  ;;  %v403_v24 = vunpack.c.l.u8.bf16 %v339_v21  ;;  %v341_v27 = vld [vmem:[%s5459_s21 + $0x10] sm:$0xf]  ;;  %v342_v28 = vld [vmem:[%s5459_s21 + $0x14] sm:$0xf] }
  0x1d   : > { %v404_v25 = vunpack.c.l.u8.bf16 %v340_v22  ;;  %v405_v30 = vunpack.c.l.u8.bf16 %v341_v27  ;;  %v406_v31 = vunpack.c.l.u8.bf16 %v342_v28  ;;  %v343_v33 = vld [vmem:[%s5459_s21 + $0x18] sm:$0xf]  ;;  %v344_v34 = vld [vmem:[%s5459_s21 + $0x1c] sm:$0xf]  ;;  %v345_v40 = vld [vmem:[%s5459_s21 + $0x20] sm:$0xf] }
  0x1e   : > { %v4451_v11 = vcombine.high %v401_v8, %v402_v9  ;;  %v4450_v26 = vcombine.low %v401_v8, %v402_v9  ;;  %v407_v36 = vunpack.c.l.u8.bf16 %v343_v33  ;;  %v408_v37 = vunpack.c.l.u8.bf16 %v344_v34  ;;  %v346_v41 = vld [vmem:[%s5459_s21 + $0x24] sm:$0xf]  ;;  %v347_v46 = vld [vmem:[%s5459_s21 + $0x28] sm:$0xf]  ;;  %v348_v47 = vld [vmem:[%s5459_s21 + $0x2c] sm:$0xf] }
  0x1f   : > { %925 = vmatpush1.bf16.msra.mxu0 %v5130_v3  ;;  %v4453_v29 = vcombine.high %v403_v24, %v404_v25  ;;  %v4452_v32 = vcombine.low %v403_v24, %v404_v25  ;;  %v4455_v35 = vcombine.high %v405_v30, %v406_v31  ;;  %v4454_v38 = vcombine.low %v405_v30, %v406_v31  ;;  %v349_v52 = vld [vmem:[%s5459_s21 + $0x30] sm:$0xf]  ;;  %v350_v53 = vld [vmem:[%s5459_s21 + $0x34] sm:$0xf]  ;;  %v351_v58 = vld [vmem:[%s5459_s21 + $0x38] sm:$0xf] }
  0x20   : > { %926 = vmatprep.subr.bf16.mxu0 %v10140_v1  ;;  %952 = vmatprep.mubr.bf16.mxu0 %v4451_v11  ;;  %v4457_v39 = vcombine.high %v407_v36, %v408_v37  ;;  %v409_v42 = vunpack.c.l.u8.bf16 %v345_v40  ;;  %v410_v43 = vunpack.c.l.u8.bf16 %v346_v41  ;;  %v4456_v44 = vcombine.low %v407_v36, %v408_v37  ;;  %v352_v59 = vld [vmem:[%s5459_s21 + $0x3c] sm:$0xf]  ;;  %v353_v0 = vld [vmem:[%s5459_s21 + $0x40] sm:$0xf]  ;;  %v354_v2 = vld [vmem:[%s5459_s21 + $0x44] sm:$0xf] }
  0x21   : > { %v411_v48 = vunpack.c.l.u8.bf16 %v347_v46  ;;  %v412_v49 = vunpack.c.l.u8.bf16 %v348_v47  ;;  %v413_v54 = vunpack.c.l.u8.bf16 %v349_v52  ;;  %v414_v55 = vunpack.c.l.u8.bf16 %v350_v53  ;;  %v355_v7 = vld [vmem:[%s5459_s21 + $0x48] sm:$0xf]  ;;  %v356_v8 = vld [vmem:[%s5459_s21 + $0x4c] sm:$0xf]  ;;  %v361_v25 = vld [vmem:[%s5459_s21 + $0x60] sm:$0xf] }
  0x22   : > { %v4459_v45 = vcombine.high %v409_v42, %v410_v43  ;;  %v4458_v50 = vcombine.low %v409_v42, %v410_v43  ;;  %v415_v60 = vunpack.c.l.u8.bf16 %v351_v58  ;;  %v416_v61 = vunpack.c.l.u8.bf16 %v352_v59  ;;  %v363_v31 = vld [vmem:[%s5459_s21 + $0x68] sm:$0xf]  ;;  %v365_v37 = vld [vmem:[%s5459_s21 + $0x70] sm:$0xf]  ;;  %v367_v43 = vld [vmem:[%s5459_s21 + $0x78] sm:$0xf] }
  0x23   : > { %927 = vmatpush1.bf16.msra.mxu0 %v5131_v4  ;;  %v4461_v51 = vcombine.high %v411_v48, %v412_v49  ;;  %v4460_v56 = vcombine.low %v411_v48, %v412_v49  ;;  %v4463_v57 = vcombine.high %v413_v54, %v414_v55  ;;  %v4462_v62 = vcombine.low %v413_v54, %v414_v55  ;;  %v369_v49 = vld [vmem:[%s5459_s21 + $0x80] sm:$0xf]  ;;  %v371_v55 = vld [vmem:[%s5459_s21 + $0x88] sm:$0xf]  ;;  %s4445_s25 = sshll.u32 %s326_s24, 5  ;;  %s4625_s26 = sshll.u32 %s5412_s13, 9 }
  0x24   : > { %928 = vmatprep.subr.bf16.mxu0 %v10140_v1  ;;  %v4465_v63 = vcombine.high %v415_v60, %v416_v61  ;;  %v417_v3 = vunpack.c.l.u8.bf16 %v353_v0  ;;  %v418_v4 = vunpack.c.l.u8.bf16 %v354_v2  ;;  %v419_v9 = vunpack.c.l.u8.bf16 %v355_v7  ;;  %s328_s29 = scalar_lea.vmem [#allocation2], %s4445_s25  ;;  %s4368_s13 = scalar_lea.sflag [#allocation3], %s326_s24 }
  0x25   : > { %v425_v27 = vunpack.c.l.u8.bf16 %v361_v25  ;;  %v427_v33 = vunpack.c.l.u8.bf16 %v363_v31  ;;  %s4382_s14 = sshll.u32 %s328_s29, 4  ;;  %s5340_s22 = smov [#allocation2]   ;;  %s10088_s14 = int_to_ptr.vmem [resolvable:$true] %s4382_s14 }
  0x26   : > { %v4467_v6 = vcombine.high %v417_v3, %v418_v4  ;;  %v4466_v11 = vcombine.low %v417_v3, %v418_v4  ;;  %v375_v4 = vld [vmem:[%s5459_s21 + $0x98] sm:$0xf]  ;;  %s5270_s17 = scalar_lea.vmem %s10088_s14, 512  ;;  %s5274_s23 = sshll.u32 %s5340_s22, 4  ;;  %s5275_s23 = int_to_ptr.vmem [resolvable:$false] %s5274_s23 }
  0x27   : > { %929 = vmatpush1.bf16.msra.mxu0 %v5132_v5  ;;  %v4464_v5 = vcombine.low %v415_v60, %v416_v61  ;;  %v373_v61 = vld [vmem:[%s5459_s21 + $0x90] sm:$0xf]  ;;  %p5271_p11 = scmp.ne.s32.totalorder %s10088_s14, %s5270_s17  ;;  %p5277_p0 = scmp.lt.s32.totalorder %s10088_s14, %s5275_s23 }
  0x28   : > { %930 = vmatprep.subr.bf16.mxu0 %v10140_v1 }
  0x29   : > { %p5272_p12 = pnand %p5271_p11, %p5429_p5 }
  0x2b   : > { %931 = vmatpush1.bf16.msra.mxu0 %v5133_v10  ;;  %v420_v10 = vunpack.c.l.u8.bf16 %v356_v8  ;;  %p5273_p13 = pneg %p5272_p12 }
  0x2c   : > { %932 = vmatprep.subr.bf16.mxu0 %v10140_v1 }
  0x2f   : > { %933 = vmatpush1.bf16.msra.mxu0 %v5134_v12  ;;  %v4469_v12 = vcombine.high %v419_v9, %v420_v10 }
  0x30   : > { %934 = vmatprep.subr.bf16.mxu0 %v10140_v1 }
  0x33   : > { %935 = vmatpush1.bf16.msra.mxu0 %v5135_v13  ;;  %v357_v13 = vld [vmem:[%s5459_s21 + $0x50] sm:$0xf] }
  0x34   : > { %936 = vmatprep.subr.bf16.mxu0 %v10140_v1 }
  0x37   : > { %937 = vmatpush1.bf16.msra.mxu0 %v5136_v14  ;;  %v358_v14 = vld [vmem:[%s5459_s21 + $0x54] sm:$0xf] }
  0x38   : > { %938 = vmatprep.subr.bf16.mxu0 %v10140_v1 }
  0x3b   : > { %939 = vmatpush1.bf16.msra.mxu0 %v5137_v15  ;;  %v421_v15 = vunpack.c.l.u8.bf16 %v357_v13 }
  0x3c   : > { %940 = vmatprep.subr.bf16.mxu0 %v10140_v1 }
  0x3f   : > { %941 = vmatpush1.bf16.msra.mxu0 %v5138_v16  ;;  %v422_v16 = vunpack.c.l.u8.bf16 %v358_v14 }
  0x40   : > { %942 = vmatprep.subr.bf16.mxu0 %v10140_v1 }
  0x43   : > { %943 = vmatpush1.bf16.msra.mxu0 %v5139_v17  ;;  %v4468_v17 = vcombine.low %v419_v9, %v420_v10  ;;  %v377_v10 = vld [vmem:[%s5459_s21 + $0xa0] sm:$0xf] }
  0x44   : > { %944 = vmatprep.subr.bf16.mxu0 %v10140_v1 }
  0x47   : > { %945 = vmatpush1.bf16.msra.mxu0 %v5140_v18  ;;  %v4471_v18 = vcombine.high %v421_v15, %v422_v16 }
  0x48   : > { %946 = vmatprep.subr.bf16.mxu0 %v10140_v1 }
  0x4b   : > { %947 = vmatpush1.bf16.msra.mxu0 %v5141_v19  ;;  %v359_v19 = vld [vmem:[%s5459_s21 + $0x58] sm:$0xf] }
  0x4c   : > { %948 = vmatprep.subr.bf16.mxu0 %v10140_v1  ;;  %v423_v21 = vunpack.c.l.u8.bf16 %v359_v19 }
  0x4f   : > { %949 = vmatpush1.bf16.msra.mxu0 %v5142_v20  ;;  %v360_v20 = vld [vmem:[%s5459_s21 + $0x5c] sm:$0xf] }
  0x50   : > { %950 = vmatprep.subr.bf16.mxu0 %v10140_v1  ;;  %v424_v22 = vunpack.c.l.u8.bf16 %v360_v20 }
  0x52   : > { %v4473_v24 = vcombine.high %v423_v21, %v424_v22 }
  0x53   : > { %951 = vmatpush1.bf16.msra.mxu0 %v5143_v23  ;;  %v4470_v23 = vcombine.low %v421_v15, %v422_v16  ;;  %v379_v16 = vld [vmem:[%s5459_s21 + $0xa8] sm:$0xf] }
  0x56   : > { %953 = vmatmul.mubr.bf16.vlgmr.msra.gmra.mrb[0].mxu0 %v4450_v26  ;;  %v362_v26 = vld [vmem:[%s5459_s21 + $0x64] sm:$0xf] }
  0x57   : > { %960 = vmatprep.mubr.bf16.mxu0 %v4453_v29  ;;  %v426_v28 = vunpack.c.l.u8.bf16 %v362_v26  ;;  %v4472_v29 = vcombine.low %v423_v21, %v424_v22  ;;  %v381_v22 = vld [vmem:[%s5459_s21 + $0xb0] sm:$0xf] }
  0x59   : > { %v4475_v30 = vcombine.high %v425_v27, %v426_v28 }
  0x5e   : > { %961 = vmatmul.mubr.bf16.gmra.mrb[4].mxu0 %v4452_v32  ;;  %v364_v32 = vld [vmem:[%s5459_s21 + $0x6c] sm:$0xf] }
  0x5f   : > { %968 = vmatprep.mubr.bf16.mxu0 %v4455_v35  ;;  %v428_v34 = vunpack.c.l.u8.bf16 %v364_v32  ;;  %v4474_v35 = vcombine.low %v425_v27, %v426_v28  ;;  %v383_v28 = vld [vmem:[%s5459_s21 + $0xb8] sm:$0xf] }
  0x61   : > { %v4477_v36 = vcombine.high %v427_v33, %v428_v34  ;;  %v4476_v41 = vcombine.low %v427_v33, %v428_v34  ;;  %v385_v34 = vld [vmem:[%s5459_s21 + $0xc0] sm:$0xf] }
  0x66   : > { %969 = vmatmul.mubr.bf16.gmra.mrb[8].mxu0 %v4454_v38  ;;  %v366_v38 = vld [vmem:[%s5459_s21 + $0x74] sm:$0xf] }
  0x67   : > { %976 = vmatprep.mubr.bf16.mxu0 %v4457_v39  ;;  %v429_v39 = vunpack.c.l.u8.bf16 %v365_v37  ;;  %v430_v40 = vunpack.c.l.u8.bf16 %v366_v38 }
  0x69   : > { %v4479_v42 = vcombine.high %v429_v39, %v430_v40  ;;  %v4478_v47 = vcombine.low %v429_v39, %v430_v40  ;;  %v387_v40 = vld [vmem:[%s5459_s21 + $0xc8] sm:$0xf] }
  0x6e   : > { %977 = vmatmul.mubr.bf16.gmra.mrb[12].mxu0 %v4456_v44  ;;  %v368_v44 = vld [vmem:[%s5459_s21 + $0x7c] sm:$0xf] }
  0x6f   : > { %984 = vmatprep.mubr.bf16.mxu0 %v4459_v45  ;;  %v431_v45 = vunpack.c.l.u8.bf16 %v367_v43  ;;  %v432_v46 = vunpack.c.l.u8.bf16 %v368_v44 }
  0x71   : > { %v4481_v48 = vcombine.high %v431_v45, %v432_v46  ;;  %v4480_v53 = vcombine.low %v431_v45, %v432_v46  ;;  %v389_v46 = vld [vmem:[%s5459_s21 + $0xd0] sm:$0xf] }
  0x76   : > { %985 = vmatmul.mubr.bf16.gmra.mrb[16].mxu0 %v4458_v50  ;;  %v370_v50 = vld [vmem:[%s5459_s21 + $0x84] sm:$0xf] }
  0x77   : > { %992 = vmatprep.mubr.bf16.mxu0 %v4461_v51  ;;  %v433_v51 = vunpack.c.l.u8.bf16 %v369_v49  ;;  %v434_v52 = vunpack.c.l.u8.bf16 %v370_v50 }
  0x79   : > { %v4483_v54 = vcombine.high %v433_v51, %v434_v52  ;;  %v4482_v59 = vcombine.low %v433_v51, %v434_v52  ;;  %v391_v52 = vld [vmem:[%s5459_s21 + $0xd8] sm:$0xf] }
  0x7e   : > { %993 = vmatmul.mubr.bf16.gmra.mrb[20].mxu0 %v4460_v56  ;;  %v372_v56 = vld [vmem:[%s5459_s21 + $0x8c] sm:$0xf] }
  0x7f   : > { %1000 = vmatprep.mubr.bf16.mxu0 %v4463_v57  ;;  %v435_v57 = vunpack.c.l.u8.bf16 %v371_v55  ;;  %v436_v58 = vunpack.c.l.u8.bf16 %v372_v56 }
  0x81   : > { %v4485_v60 = vcombine.high %v435_v57, %v436_v58  ;;  %v4484_v2 = vcombine.low %v435_v57, %v436_v58  ;;  %v393_v58 = vld [vmem:[%s5459_s21 + $0xe0] sm:$0xf] }
  0x86   : > { %1001 = vmatmul.mubr.bf16.gmra.mrb[24].mxu0 %v4462_v62  ;;  %v374_v62 = vld [vmem:[%s5459_s21 + $0x94] sm:$0xf] }
  0x87   : > { %1008 = vmatprep.mubr.bf16.mxu0 %v4465_v63  ;;  %v437_v63 = vunpack.c.l.u8.bf16 %v373_v61  ;;  %v438_v0 = vunpack.c.l.u8.bf16 %v374_v62  ;;  %v457_v61 = vunpack.c.l.u8.bf16 %v393_v58 }
  0x89   : > { %v4487_v3 = vcombine.high %v437_v63, %v438_v0  ;;  %v4486_v8 = vcombine.low %v437_v63, %v438_v0 }
  0x8e   : > { %1009 = vmatmul.mubr.bf16.gmra.mrb[28].mxu0 %v4464_v5  ;;  %v376_v5 = vld [vmem:[%s5459_s21 + $0x9c] sm:$0xf] }
  0x8f   : > { %1016 = vmatprep.mubr.bf16.mxu0 %v4467_v6  ;;  %v439_v6 = vunpack.c.l.u8.bf16 %v375_v4  ;;  %v440_v7 = vunpack.c.l.u8.bf16 %v376_v5 }
  0x91   : > { %v4489_v9 = vcombine.high %v439_v6, %v440_v7  ;;  %v4488_v14 = vcombine.low %v439_v6, %v440_v7 }
  0x96   : > { %1017 = vmatmul.mubr.bf16.gmra.mrb[32].mxu0 %v4466_v11  ;;  %v378_v11 = vld [vmem:[%s5459_s21 + $0xa4] sm:$0xf] }
  0x97   : > { %1024 = vmatprep.mubr.bf16.mxu0 %v4469_v12  ;;  %v441_v12 = vunpack.c.l.u8.bf16 %v377_v10  ;;  %v442_v13 = vunpack.c.l.u8.bf16 %v378_v11 }
  0x99   : > { %v4491_v15 = vcombine.high %v441_v12, %v442_v13  ;;  %v4490_v20 = vcombine.low %v441_v12, %v442_v13 }
  0x9e   : > { %1025 = vmatmul.mubr.bf16.gmra.mrb[36].mxu0 %v4468_v17  ;;  %v380_v17 = vld [vmem:[%s5459_s21 + $0xac] sm:$0xf] }
  0x9f   : > { %1032 = vmatprep.mubr.bf16.mxu0 %v4471_v18  ;;  %v443_v18 = vunpack.c.l.u8.bf16 %v379_v16  ;;  %v444_v19 = vunpack.c.l.u8.bf16 %v380_v17 }
  0xa1   : > { %v4493_v21 = vcombine.high %v443_v18, %v444_v19  ;;  %v4492_v26 = vcombine.low %v443_v18, %v444_v19 }
  0xa6   : > { %1033 = vmatmul.mubr.bf16.gmra.mrb[40].mxu0 %v4470_v23  ;;  %v382_v23 = vld [vmem:[%s5459_s21 + $0xb4] sm:$0xf] }
  0xa7   : > { %1040 = vmatprep.mubr.bf16.mxu0 %v4473_v24  ;;  %v445_v24 = vunpack.c.l.u8.bf16 %v381_v22  ;;  %v446_v25 = vunpack.c.l.u8.bf16 %v382_v23  ;;  %v397_v23 = vld [vmem:[%s5459_s21 + $0xf0] sm:$0xf] }
  0xa9   : > { %v4495_v27 = vcombine.high %v445_v24, %v446_v25  ;;  %v4494_v32 = vcombine.low %v445_v24, %v446_v25  ;;  %v398_v24 = vld [vmem:[%s5459_s21 + $0xf4] sm:$0xf] }
  0xae   : > { %1041 = vmatmul.mubr.bf16.gmra.mrb[44].mxu0 %v4472_v29  ;;  %v384_v29 = vld [vmem:[%s5459_s21 + $0xbc] sm:$0xf] }
  0xaf   : > { %1048 = vmatprep.mubr.bf16.mxu0 %v4475_v30  ;;  %v447_v30 = vunpack.c.l.u8.bf16 %v383_v28  ;;  %v448_v31 = vunpack.c.l.u8.bf16 %v384_v29  ;;  %v462_v28 = vunpack.c.l.u8.bf16 %v398_v24 }
  0xb1   : > { %v4497_v33 = vcombine.high %v447_v30, %v448_v31  ;;  %v4496_v38 = vcombine.low %v447_v30, %v448_v31 }
  0xb6   : > { %1049 = vmatmul.mubr.bf16.gmra.mrb[48].mxu0 %v4474_v35  ;;  %v386_v35 = vld [vmem:[%s5459_s21 + $0xc4] sm:$0xf] }
  0xb7   : > { %1056 = vmatprep.mubr.bf16.mxu0 %v4477_v36  ;;  %v449_v36 = vunpack.c.l.u8.bf16 %v385_v34  ;;  %v450_v37 = vunpack.c.l.u8.bf16 %v386_v35 }
  0xb9   : > { %v4499_v39 = vcombine.high %v449_v36, %v450_v37  ;;  %v4498_v44 = vcombine.low %v449_v36, %v450_v37 }
  0xbe   : > { %1057 = vmatmul.mubr.bf16.gmra.mrb[52].mxu0 %v4476_v41  ;;  %v388_v41 = vld [vmem:[%s5459_s21 + $0xcc] sm:$0xf] }
  0xbf   : > { %1064 = vmatprep.mubr.bf16.mxu0 %v4479_v42  ;;  %v451_v42 = vunpack.c.l.u8.bf16 %v387_v40  ;;  %v452_v43 = vunpack.c.l.u8.bf16 %v388_v41 }
  0xc1   : > { %v4501_v45 = vcombine.high %v451_v42, %v452_v43  ;;  %v4500_v50 = vcombine.low %v451_v42, %v452_v43 }
  0xc6   : > { %1065 = vmatmul.mubr.bf16.gmra.mrb[56].mxu0 %v4478_v47  ;;  %v390_v47 = vld [vmem:[%s5459_s21 + $0xd4] sm:$0xf] }
  0xc7   : > { %1072 = vmatprep.mubr.bf16.mxu0 %v4481_v48  ;;  %v453_v48 = vunpack.c.l.u8.bf16 %v389_v46  ;;  %v454_v49 = vunpack.c.l.u8.bf16 %v390_v47 }
  0xc9   : > { %v4503_v51 = vcombine.high %v453_v48, %v454_v49  ;;  %v4502_v56 = vcombine.low %v453_v48, %v454_v49 }
  0xce   : > { %1073 = vmatmul.mubr.bf16.gmra.mrb[60].mxu0 %v4480_v53  ;;  %v392_v53 = vld [vmem:[%s5459_s21 + $0xdc] sm:$0xf] }
  0xcf   : > { %1080 = vmatprep.mubr.bf16.mxu0 %v4483_v54  ;;  %v455_v54 = vunpack.c.l.u8.bf16 %v391_v52  ;;  %v456_v55 = vunpack.c.l.u8.bf16 %v392_v53 }
  0xd1   : > { %v4505_v57 = vcombine.high %v455_v54, %v456_v55 }
  0xd6   : > { %1081 = vmatmul.mubr.bf16.gmra.mrb[64].mxu0 %v4482_v59  ;;  %v394_v59 = vld [vmem:[%s5459_s21 + $0xe4] sm:$0xf] }
  0xd7   : > { %1088 = vmatprep.mubr.bf16.mxu0 %v4485_v60  ;;  %v5570_v60 = vld [vmem:[%s10132_s2] ss:$0 sm:$0xff]  ;;  %v458_v62 = vunpack.c.l.u8.bf16 %v394_v59 }
  0xd9   : > { %v4507_v5 = vcombine.high %v457_v61, %v458_v62  ;;  %v4506_v18 = vcombine.low %v457_v61, %v458_v62 }
  0xde   : > { %1089 = vmatmul.mubr.bf16.gmra.mrb[68].mxu0 %v4484_v2 }
  0xdf   : > { %1096 = vmatprep.mubr.bf16.mxu0 %v4487_v3  ;;  %v4504_v3 = vcombine.low %v455_v54, %v456_v55 }
  0xe6   : > { %1097 = vmatmul.mubr.bf16.gmra.mrb[72].mxu0 %v4486_v8  ;;  %v395_v8 = vld [vmem:[%s5459_s21 + $0xe8] sm:$0xf] }
  0xe7   : > { %1104 = vmatprep.mubr.bf16.mxu0 %v4489_v9  ;;  %v396_v9 = vld [vmem:[%s5459_s21 + $0xec] sm:$0xf]  ;;  %v459_v12 = vunpack.c.l.u8.bf16 %v395_v8 }
  0xe8   : > { %v460_v13 = vunpack.c.l.u8.bf16 %v396_v9 }
  0xee   : > { %1105 = vmatmul.mubr.bf16.gmra.mrb[76].mxu0 %v4488_v14 }
  0xef   : > { %1112 = vmatprep.mubr.bf16.mxu0 %v4491_v15 }
  0xf6   : > { %1113 = vmatmul.mubr.bf16.gmra.mrb[80].mxu0 %v4490_v20  ;;  %v4509_v20 = vcombine.high %v459_v12, %v460_v13 }
  0xf7   : > { %1120 = vmatprep.mubr.bf16.mxu0 %v4493_v21 }
  0xfe   : > { %1121 = vmatmul.mubr.bf16.gmra.mrb[84].mxu0 %v4492_v26 }
  0xff   : > { %1128 = vmatprep.mubr.bf16.mxu0 %v4495_v27  ;;  %v461_v27 = vunpack.c.l.u8.bf16 %v397_v23 }
 0x101   : > { %v4511_v35 = vcombine.high %v461_v27, %v462_v28  ;;  %v4510_v48 = vcombine.low %v461_v27, %v462_v28 }
 0x106   : > { %1129 = vmatmul.mubr.bf16.gmra.mrb[88].mxu0 %v4494_v32 }
 0x107   : > { %1136 = vmatprep.mubr.bf16.mxu0 %v4497_v33  ;;  %v4508_v33 = vcombine.low %v459_v12, %v460_v13 }
 0x10e   : > { %1137 = vmatmul.mubr.bf16.gmra.mrb[92].mxu0 %v4496_v38  ;;  %v399_v38 = vld [vmem:[%s5459_s21 + $0xf8] sm:$0xf] }
 0x10f   : > { %1144 = vmatprep.mubr.bf16.mxu0 %v4499_v39  ;;  %v400_v39 = vld [vmem:[%s5459_s21 + $0xfc] sm:$0xf]  ;;  %v463_v42 = vunpack.c.l.u8.bf16 %v399_v38  ;;  %s5337_s21 = smov 96  }
 0x110   : > { %v464_v43 = vunpack.c.l.u8.bf16 %v400_v39 }
 0x112   : > { %v4512_v59 = vcombine.low %v463_v42, %v464_v43 }
 0x116   : > { %1145 = vmatmul.mubr.bf16.gmra.mrb[96].mxu0 %v4498_v44 }
 0x117   : > { %1152 = vmatprep.mubr.bf16.mxu0 %v4501_v45 }
 0x11e   : > { %1153 = vmatmul.mubr.bf16.gmra.mrb[100].mxu0 %v4500_v50  ;;  %v4513_v50 = vcombine.high %v463_v42, %v464_v43 }
 0x11f   : > { %1160 = vmatprep.mubr.bf16.mxu0 %v4503_v51 }
 0x126   : > { %1161 = vmatmul.mubr.bf16.gmra.mrb[104].mxu0 %v4502_v56 }
 0x127   : > { %1168 = vmatprep.mubr.bf16.mxu0 %v4505_v57 }
 0x129   : > { %v954_v63 = vpop.f32.mrb[0].mxu0 }
 0x12a   : > { %v955_v0 = vadd.f32 %v5570_v60, %v954_v63  ;;  %v956_v2 = vpop.f32.mrb[1].mxu0 }
 0x12b   : > { %v957_v4 = vpop.f32.mrb[2].mxu0 }
 0x12c   : > { %v958_v6 = vadd.f32 %v5570_v60, %v957_v4  ;;  %v959_v7 = vpop.f32.mrb[3].mxu0  ;;  %v1209_v10 = vmax.f32 %v955_v0, 0.0 }
 0x12e   : > { %v1210_v11 = vmax.f32 %v958_v6, 0.0  ;;  %1169 = vmatmul.mubr.bf16.gmra.mrb[108].mxu0 %v4504_v3 }
 0x12f   : > { %1176 = vmatprep.mubr.bf16.mxu0 %v4507_v5 }
 0x130   : > { %v5576_v14 = vpack.c.bf16 %v1210_v11, %v1209_v10 }
 0x131   : > { %v962_v15 = vpop.f32.mrb[4].mxu0 }
 0x132   : > { %v963_v16 = vadd.f32 %v5570_v60, %v962_v15  ;;  %v964_v17 = vpop.f32.mrb[5].mxu0  ;;  %v5593_v12 = vunpack.c.h.b16 %v5576_v14  ;;  %v5596_v15 = vunpack.c.l.b16 %v5576_v14 }
 0x133   : > { %v965_v19 = vpop.f32.mrb[6].mxu0 }
 0x134   : > { %v966_v21 = vadd.f32 %v5570_v60, %v965_v19  ;;  %v967_v22 = vpop.f32.mrb[7].mxu0  ;;  %v1211_v25 = vmax.f32 %v963_v16, 0.0  ;;  %10396 = vst [vmem:[#allocation5_spill] sm:$0xff] %v5593_v12  ;;  %10397 = vst [vmem:[#allocation6_spill] sm:$0xff] %v5596_v15  ;;  %v5605_v24 = vrot.slane %v5593_v12, 2  ;;  %v5616_v27 = vrot.slane %v5596_v15, 1 }
 0x135   : > { %v5619_v28 = vrot.slane %v5596_v15, 3 }
 0x136   : > { %v1212_v26 = vmax.f32 %v966_v21, 0.0  ;;  %1177 = vmatmul.mubr.bf16.gmra.mrb[112].mxu0 %v4506_v18 }
 0x137   : > { %1184 = vmatprep.mubr.bf16.mxu0 %v4509_v20 }
 0x138   : > { %v1274_v29 = vpack.c.bf16 %v1212_v26, %v1211_v25  ;;  %v5608_v25 = vrot.slane %v5593_v12, 1  ;;  %v5613_v26 = vrot.slane %v5596_v15, 2 }
 0x139   : > { %v970_v30 = vpop.f32.mrb[8].mxu0 }
 0x13a   : > { %v971_v31 = vadd.f32 %v5570_v60, %v970_v30  ;;  %v972_v32 = vpop.f32.mrb[9].mxu0  ;;  %v5599_v19 = vunpack.c.l.b16 %v1274_v29  ;;  %v5601_v20 = vunpack.c.h.b16 %v1274_v29 }
 0x13b   : > { %v973_v34 = vpop.f32.mrb[10].mxu0  ;;  %v5624_v32 = vrot.slane %v5593_v12, 3 }
 0x13c   : > { %v974_v36 = vadd.f32 %v5570_v60, %v973_v34  ;;  %v975_v37 = vpop.f32.mrb[11].mxu0  ;;  %v1213_v40 = vmax.f32 %v971_v31, 0.0  ;;  %10398 = vst [vmem:[#allocation7_spill] sm:$0xff] %v5599_v19  ;;  %10399 = vst [vmem:[#allocation8_spill] sm:$0xff] %v5601_v20  ;;  %v5639_v39 = vrot.slane %v5599_v19, 2  ;;  %v5645_v43 = vrot.slane %v5599_v19, 3 }
 0x13e   : > { %v1214_v41 = vmax.f32 %v974_v36, 0.0  ;;  %1185 = vmatmul.mubr.bf16.gmra.mrb[116].mxu0 %v4508_v33  ;;  %v5634_v36 = vrot.slane %v5601_v20, 1 }
 0x13f   : > { %1192 = vmatprep.mubr.bf16.mxu0 %v4511_v35  ;;  %v5631_v35 = vrot.slane %v5599_v19, 1 }
 0x140   : > { %v1275_v44 = vpack.c.bf16 %v1214_v41, %v1213_v40  ;;  %v5642_v40 = vrot.slane %v5601_v20, 2 }
 0x141   : > { %v978_v45 = vpop.f32.mrb[12].mxu0 }
 0x142   : > { %v979_v46 = vadd.f32 %v5570_v60, %v978_v45  ;;  %v980_v47 = vpop.f32.mrb[13].mxu0  ;;  %v5610_v14 = vunpack.c.l.b16 %v1275_v44  ;;  %v5621_v29 = vunpack.c.h.b16 %v1275_v44  ;;  %v5648_v44 = vrot.slane %v5601_v20, 3 }
 0x143   : > { %v981_v49 = vpop.f32.mrb[14].mxu0 }
 0x144   : > { %v982_v51 = vadd.f32 %v5570_v60, %v981_v49  ;;  %v983_v52 = vpop.f32.mrb[15].mxu0  ;;  %v1215_v53 = vmax.f32 %v979_v46, 0.0  ;;  %10400 = vst [vmem:[#allocation9_spill] sm:$0xff] %v5610_v14  ;;  %10401 = vst [vmem:[#allocation10_spill] sm:$0xff] %v5621_v29  ;;  %v5651_v45 = vrot.slane %v5610_v14, 1  ;;  %v5658_v49 = vrot.slane %v5610_v14, 2 }
 0x145   : > { %v5664_v52 = vrot.slane %v5610_v14, 3 }
 0x146   : > { %v1216_v54 = vmax.f32 %v982_v51, 0.0  ;;  %1193 = vmatmul.mubr.bf16.gmra.mrb[120].mxu0 %v4510_v48  ;;  %v5655_v48 = vrot.slane %v5621_v29, 1 }
 0x147   : > { %1200 = vmatprep.mubr.bf16.mxu0 %v4513_v50  ;;  %v5661_v50 = vrot.slane %v5621_v29, 2  ;;  %10405 = vst [vmem:[#allocation14_spill] sm:$0xff] %v5664_v52 }
 0x148   : > { %v1276_v55 = vpack.c.bf16 %v1216_v54, %v1215_v53  ;;  %v5667_v53 = vrot.slane %v5621_v29, 3 }
 0x149   : > { %v986_v56 = vpop.f32.mrb[16].mxu0  ;;  %10404 = vst [vmem:[#allocation13_spill] sm:$0xff] %v5661_v50 }
 0x14a   : > { %v987_v57 = vadd.f32 %v5570_v60, %v986_v56  ;;  %v988_v58 = vpop.f32.mrb[17].mxu0  ;;  %v5626_v33 = vunpack.c.l.b16 %v1276_v55  ;;  %v5628_v34 = vunpack.c.h.b16 %v1276_v55  ;;  %10406 = vst [vmem:[#allocation15_spill] sm:$0xff] %v5667_v53 }
 0x14b   : > { %v989_v61 = vpop.f32.mrb[18].mxu0 }
 0x14c   : > { %v990_v62 = vadd.f32 %v5570_v60, %v989_v61  ;;  %v991_v63 = vpop.f32.mrb[19].mxu0  ;;  %v1217_v0 = vmax.f32 %v987_v57, 0.0  ;;  %10402 = vst [vmem:[#allocation11_spill] sm:$0xff] %v5626_v33  ;;  %10403 = vst [vmem:[#allocation12_spill] sm:$0xff] %v5628_v34  ;;  %v5670_v54 = vrot.slane %v5626_v33, 1  ;;  %v5673_v55 = vrot.slane %v5628_v34, 1 }
 0x14d   : > { %v5680_v61 = vrot.slane %v5628_v34, 2 }
 0x14e   : > { %v1218_v2 = vmax.f32 %v990_v62, 0.0  ;;  %1201 = vmatmul.mubr.bf16.gmra.mrb[124].mxu0 %v4512_v59  ;;  %10407 = vst [vmem:[#allocation16_spill] sm:$0xff] %v5670_v54  ;;  %10408 = vst [vmem:[#allocation17_spill] sm:$0xff] %v5673_v55  ;;  %v5677_v59 = vrot.slane %v5626_v33, 2 }
 0x14f   : > { %10410 = vst [vmem:[#allocation19_spill] sm:$0xff] %v5680_v61 }
 0x150   : > { %v1277_v3 = vpack.c.bf16 %v1218_v2, %v1217_v0  ;;  %10409 = vst [vmem:[#allocation18_spill] sm:$0xff] %v5677_v59  ;;  %v5683_v0 = vrot.slane %v5626_v33, 3  ;;  %v5686_v2 = vrot.slane %v5628_v34, 3 }
 0x151   : > { %v994_v4 = vpop.f32.mrb[20].mxu0 }
 0x152   : > { %v995_v5 = vadd.f32 %v5570_v60, %v994_v4  ;;  %v996_v6 = vpop.f32.mrb[21].mxu0  ;;  %v1460_v37 = vunpack.c.h.b16 %v1277_v3  ;;  %v1379_v41 = vunpack.c.l.b16 %v1277_v3  ;;  %10411 = vst [vmem:[#allocation20_spill] sm:$0xff] %v5683_v0  ;;  %10412 = vst [vmem:[#allocation21_spill] sm:$0xff] %v5686_v2 }
 0x153   : > { %v997_v7 = vpop.f32.mrb[22].mxu0 }
 0x154   : > { %v998_v8 = vadd.f32 %v5570_v60, %v997_v7  ;;  %v999_v9 = vpop.f32.mrb[23].mxu0  ;;  %v1219_v10 = vmax.f32 %v995_v5, 0.0  ;;  %v1500_v58 = vrot.slane %v1460_v37, 1  ;;  %v1426_v62 = vrot.slane %v1379_v41, 1 }
 0x155   : > { %v1443_v63 = vrot.slane %v1379_v41, 2  ;;  %v5688_v3 = vrot.slane %v1379_v41, 7  ;;  %v1517_v6 = vrot.slane %v1460_v37, 2  ;;  %v5690_v7 = vrot.slane %v1460_v37, 7 }
 0x156   : > { %v1220_v11 = vmax.f32 %v998_v8, 0.0  ;;  %v2303_v34 = vsel %vm1399_vm2, %v1460_v37, %v5608_v25  ;;  %v2278_v33 = vsel %vm1399_vm2, %v1426_v62, %v5613_v26  ;;  %v2312_v14 = vsel %vm1399_vm2, %v1500_v58, %v5605_v24 }
 0x157   : > { %10413 = vst [vmem:[#allocation22_spill] sm:$0xff] %v5688_v3  ;;  %10414 = vst [vmem:[#allocation23_spill] sm:$0xff] %v5690_v7 }
 0x158   : > { %v1278_v13 = vpack.c.bf16 %v1220_v11, %v1219_v10  ;;  %v5698_v10 = vsel %vm1387_vm0, %v1460_v37, %v5608_v25 }
 0x159   : > { %v1002_v16 = vpop.f32.mrb[24].mxu0 }
 0x15a   : > { %v1003_v17 = vadd.f32 %v5570_v60, %v1002_v16  ;;  %v1004_v18 = vpop.f32.mrb[25].mxu0  ;;  %v5692_v8 = vunpack.c.l.b16 %v1278_v13  ;;  %v5694_v9 = vunpack.c.h.b16 %v1278_v13  ;;  %v1501_v16 = vsel %vm1387_vm0, %v1500_v58, %v5605_v24 }
 0x15b   : > { %v1005_v21 = vpop.f32.mrb[26].mxu0  ;;  %v5710_v18 = vsel %vm1393_vm1, %v1379_v41, %v5616_v27  ;;  %v1427_v13 = vsel %vm1387_vm0, %v1426_v62, %v5613_v26 }
 0x15c   : > { %v1006_v22 = vadd.f32 %v5570_v60, %v1005_v21  ;;  %v1007_v23 = vpop.f32.mrb[27].mxu0  ;;  %v1221_v30 = vmax.f32 %v1003_v17, 0.0  ;;  %10415 = vst [vmem:[#allocation24_spill] sm:$0xff] %v5694_v9  ;;  %v5706_v17 = vsel %vm1387_vm0, %v1379_v41, %v5616_v27  ;;  %v5743_v20 = vrot.slane %v5692_v8, 2 }
 0x15d   : > { %v2045_v23 = vsel %vm1393_vm1, %v1460_v37, %v5608_v25  ;;  %v5750_v29 = vrot.slane %v5694_v9, 2  ;;  %v5761_v25 = vsel %vm1387_vm0, %v5692_v8, %v5631_v35  ;;  %v5785_v37 = vsel %vm1393_vm1, %v5692_v8, %v5631_v35 }
 0x15e   : > { %v1222_v31 = vmax.f32 %v1006_v22, 0.0  ;;  %v5716_v22 = vsel %vm1387_vm0, %v1443_v63, %v5619_v28  ;;  %v5829_v61 = vsel %vm1399_vm2, %v5692_v8, %v5631_v35 }
 0x160   : > { %v5636_v38 = vpack.c.bf16 %v1222_v31, %v1221_v30  ;;  %v2020_v30 = vsel %vm1393_vm1, %v1426_v62, %v5613_v26  ;;  %v5766_v26 = vsel %vm1387_vm0, %v5690_v7, %v5593_v12  ;;  %v5790_v62 = vsel %vm1387_vm0, %v5743_v20, %v5645_v43 }
 0x161   : > { %v1010_v42 = vpop.f32.mrb[28].mxu0  ;;  %10416 = vst [vmem:[#allocation25_spill] sm:$0xff] %v5766_v26  ;;  %v5819_v26 = vsel %vm1393_vm1, %v5750_v29, %v5648_v44 }
 0x162   : > { %v1011_v46 = vadd.f32 %v5570_v60, %v1010_v42  ;;  %v1012_v47 = vpop.f32.mrb[29].mxu0  ;;  %v5832_v59 = vunpack.c.l.b16 %v5636_v38  ;;  %v5835_v55 = vunpack.c.h.b16 %v5636_v38 }
 0x163   : > { %v1013_v51 = vpop.f32.mrb[30].mxu0  ;;  %v5727_v47 = vsel %vm1393_vm1, %v1500_v58, %v5605_v24  ;;  %v5771_v24 = vsel %vm1387_vm0, %v5694_v9, %v5634_v36 }
 0x164   : > { %v1014_v56 = vadd.f32 %v5570_v60, %v1013_v51  ;;  %v1015_v57 = vpop.f32.mrb[31].mxu0  ;;  %v1223_v4 = vmax.f32 %v1011_v46, 0.0  ;;  %v1518_v46 = vsel %vm1387_vm0, %v1517_v6, %v5624_v32  ;;  %v5731_v51 = vsel %vm1393_vm1, %v1443_v63, %v5619_v28  ;;  %10417 = vst [vmem:[#allocation26_spill] sm:$0xff] %v5832_v59  ;;  %10418 = vst [vmem:[#allocation27_spill] sm:$0xff] %v5835_v55 }
 0x165   : > { %v1582_v57 = vrot.slane %v5692_v8, 1 }
 0x166   : > { %v1224_v5 = vmax.f32 %v1014_v56, 0.0 }
 0x168   : > { %v5700_v11 = vpack.c.bf16 %v1224_v5, %v1223_v4  ;;  %v5735_v4 = vrot.slane %v5694_v9, 1  ;;  %v2063_v5 = vsel %vm1393_vm1, %v1517_v6, %v5624_v32 }
 0x169   : > { %v1018_v21 = vpop.f32.mrb[32].mxu0 }
 0x16a   : > { %v1019_v31 = vadd.f32 %v5570_v60, %v1018_v21  ;;  %v1020_v42 = vpop.f32.mrb[33].mxu0  ;;  %v2269_v21 = vsel %vm1399_vm2, %v1379_v41, %v5616_v27  ;;  %v2287_v27 = vsel %vm1399_vm2, %v1443_v63, %v5619_v28  ;;  %v5775_v28 = vsel %vm1387_vm0, %v1582_v57, %v5639_v39 }
 0x16b   : > { %v1021_v56 = vpop.f32.mrb[34].mxu0  ;;  %v5795_v63 = vsel %vm1393_vm1, %v5694_v9, %v5634_v36 }
 0x16c   : > { %v1022_v42 = vadd.f32 %v5570_v60, %v1021_v56  ;;  %v1023_v1 = vpop.f32.mrb[35].mxu0  ;;  %v1225_v41 = vmax.f32 %v1019_v31, 0.0 }
 0x16d   : > { %v2321_v1 = vsel %vm1399_vm2, %v1517_v6, %v5624_v32  ;;  %v5780_v32 = vsel %vm1387_vm0, %v5735_v4, %v5642_v40  ;;  %v5799_v6 = vsel %vm1393_vm1, %v1582_v57, %v5639_v39 }
 0x16e   : > { %v1226_v56 = vmax.f32 %v1022_v42, 0.0  ;;  %v5804_v42 = vsel %vm1387_vm0, %v5750_v29, %v5648_v44 }
 0x170   : > { %v1281_v58 = vpack.c.bf16 %v1226_v56, %v1225_v41  ;;  %v5809_v41 = vsel %vm1393_vm1, %v5735_v4, %v5642_v40  ;;  %v5814_v56 = vsel %vm1393_vm1, %v5743_v20, %v5645_v43 }
 0x171   : > { %v1026_v31 = vpop.f32.mrb[36].mxu0 }
 0x172   : > { %v5821_v7 = vunpack.c.l.b16 %v1281_v58  ;;  %v5823_v12 = vunpack.c.h.b16 %v1281_v58  ;;  %v1027_v2 = vadd.f32 %v5570_v60, %v1026_v31  ;;  %v1028_v0 = vpop.f32.mrb[37].mxu0  ;;  %v2371_v58 = vsel %vm1399_vm2, %v5694_v9, %v5634_v36 }
 0x173   : > { %v1029_v19 = vpop.f32.mrb[38].mxu0  ;;  %v2346_v31 = vsel %vm1399_vm2, %v1582_v57, %v5639_v39 }
 0x174   : > { %v1227_v0 = vmax.f32 %v1027_v2, 0.0  ;;  %v1030_v54 = vadd.f32 %v5570_v60, %v1029_v19  ;;  %v1031_v53 = vpop.f32.mrb[39].mxu0  ;;  %v5845_v35 = vsel %vm1390_vm3, %v5823_v12, %v1501_v16  ;;  %v1484_v52 = vrot.slane %v5823_v12, 7 }
 0x175   : > { %v5850_v38 = vsel %vm1390_vm3, %v5821_v7, %v1427_v13  ;;  %v1410_v50 = vrot.slane %v5821_v7, 7  ;;  %v1445_v36 = vrot.slane %v5821_v7, 1  ;;  %v1519_v39 = vrot.slane %v5823_v12, 1 }
 0x176   : > { %v1228_v2 = vmax.f32 %v1030_v54, 0.0  ;;  %v5857_v19 = vsel %vm1390_vm3, %v1484_v52, %v5698_v10  ;;  %v5860_v53 = vsel %vm1396_vm4, %v1484_v52, %v2045_v23  ;;  %v5864_v16 = vsel %vm1396_vm4, %v5821_v7, %v2020_v30 }
 0x177   : > { %v5868_v13 = vsel %vm1390_vm3, %v1410_v50, %v5706_v17  ;;  %v5872_v57 = vsel %vm1390_vm3, %v1445_v36, %v5716_v22  ;;  %v5875_v54 = vsel %vm1390_vm3, %v1519_v39, %v1518_v46  ;;  %v5879_v10 = vsel %vm1396_vm4, %v1410_v50, %v5710_v18 }
 0x178   : > { %v1282_v23 = vpack.c.bf16 %v1228_v2, %v1227_v0  ;;  %v5884_v30 = vsel %vm1396_vm4, %v5823_v12, %v5727_v47  ;;  %v5888_v17 = vsel %vm1396_vm4, %v1445_v36, %v5731_v51  ;;  %v5891_v22 = vsel %vm1396_vm4, %v1519_v39, %v2063_v5 }
 0x179   : > { %10419 = vst [vmem:[#allocation28_spill] sm:$0xff] %v5891_v22  ;;  %v1034_v9 = vpop.f32.mrb[40].mxu0  ;;  %v5894_v46 = vsel %vm1402_vm5, %v1410_v50, %v2269_v21  ;;  %v5897_v18 = vsel %vm1402_vm5, %v1484_v52, %v2303_v34  ;;  %v5901_v0 = vsel %vm1402_vm5, %v5821_v7, %v2278_v33  ;;  %v5905_v47 = vsel %vm1402_vm5, %v5823_v12, %v2312_v14 }
 0x17a   : > { %v5907_v51 = vunpack.c.l.b16 %v1282_v23  ;;  %v5909_v2 = vunpack.c.h.b16 %v1282_v23  ;;  %v1035_v5 = vadd.f32 %v5570_v60, %v1034_v9  ;;  %v1036_v22 = vpop.f32.mrb[41].mxu0  ;;  %v5913_v50 = vsel %vm1402_vm5, %v1445_v36, %v2287_v27 }
 0x17b   : > { %v1037_v34 = vpop.f32.mrb[42].mxu0  ;;  %v5916_v52 = vsel %vm1402_vm5, %v1519_v39, %v2321_v1  ;;  %v2380_v33 = vsel %vm1399_vm2, %v5735_v4, %v5642_v40  ;;  %v2355_v14 = vsel %vm1399_vm2, %v5743_v20, %v5645_v43  ;;  %v5925_v21 = vrot.slane %v5832_v59, 1 }
 0x17c   : > { %10420 = vst [vmem:[#allocation29_spill] sm:$0xff] %v5907_v51  ;;  %10421 = vst [vmem:[#allocation30_spill] sm:$0xff] %v5909_v2  ;;  %v1229_v9 = vmax.f32 %v1035_v5, 0.0  ;;  %v1038_v23 = vadd.f32 %v5570_v60, %v1037_v34  ;;  %v1039_v27 = vpop.f32.mrb[43].mxu0  ;;  %v1566_v36 = vrot.slane %v5907_v51, 7  ;;  %v1640_v1 = vrot.slane %v5909_v2, 7 }
 0x17d   : > { %v5933_v39 = vsel %vm1390_vm3, %v5907_v51, %v5775_v28  ;;  %v5938_v20 = vsel %vm1390_vm3, %v5909_v2, %v5780_v32  ;;  %v1601_v40 = vrot.slane %v5907_v51, 1  ;;  %v1675_v43 = vrot.slane %v5909_v2, 1 }
 0x17e   : > { %v1230_v4 = vmax.f32 %v1038_v23, 0.0  ;;  %v5944_v22 = vsel %vm1390_vm3, %v1566_v36, %v5761_v25  ;;  %v5948_v5 = vsel %vm1390_vm3, %v1640_v1, %v5771_v24  ;;  %v5952_v28 = vsel %vm1396_vm4, %v1566_v36, %v5785_v37 }
 0x17f   : > { %v5956_v32 = vsel %vm1390_vm3, %v1601_v40, %v5790_v62  ;;  %v5960_v34 = vsel %vm1390_vm3, %v1675_v43, %v5804_v42  ;;  %v5964_v25 = vsel %vm1396_vm4, %v1640_v1, %v5795_v63  ;;  %v5969_v24 = vsel %vm1396_vm4, %v5907_v51, %v5799_v6 }
 0x180   : > { %v5971_v23 = vpack.c.bf16 %v1230_v4, %v1229_v9  ;;  %v5976_v37 = vsel %vm1396_vm4, %v5909_v2, %v5809_v41  ;;  %v5980_v62 = vsel %vm1396_vm4, %v1601_v40, %v5814_v56  ;;  %v5984_v63 = vsel %vm1396_vm4, %v1675_v43, %v5819_v26 }
 0x181   : > { %v1042_v42 = vpop.f32.mrb[44].mxu0  ;;  %v5988_v6 = vsel %vm1402_vm5, %v1566_v36, %v5829_v61  ;;  %v5991_v9 = vsel %vm1402_vm5, %v1640_v1, %v2371_v58  ;;  %v5995_v41 = vsel %vm1402_vm5, %v5907_v51, %v2346_v31  ;;  %v5999_v56 = vsel %vm1402_vm5, %v5909_v2, %v2380_v33 }
 0x182   : > { %v1043_v27 = vadd.f32 %v5570_v60, %v1042_v42  ;;  %v1044_v26 = vpop.f32.mrb[45].mxu0  ;;  %v6003_v4 = vsel %vm1402_vm5, %v1601_v40, %v2355_v14  ;;  %v2389_v61 = vsel %vm1399_vm2, %v5750_v29, %v5648_v44  ;;  %v2643_v58 = vrot.slane %v5835_v55, 1 }
 0x183   : > { %10422 = vst [vmem:[#allocation31_spill] sm:$0xff] %v6003_v4  ;;  %v6010_v36 = vrot.slane %v5692_v8, 7  ;;  %v1045_v31 = vpop.f32.mrb[46].mxu0  ;;  %v6013_v1 = vsel %vm1402_vm5, %v1675_v43, %v2389_v61  ;;  %v2586_v33 = vrot.slane %v5832_v59, 2  ;;  %v2660_v42 = vrot.slane %v5835_v55, 2 }
 0x184   : > { %10424 = vst [vmem:[#allocation33_spill] sm:$0xff] %v6013_v1  ;;  %v6018_v14 = vunpack.c.l.b16 %v5700_v11  ;;  %v1046_v40 = vadd.f32 %v5570_v60, %v1045_v31  ;;  %v1047_v26 = vpop.f32.mrb[47].mxu0  ;;  %v6024_v29 = vsel %vm1387_vm0, %v5832_v59, %v5651_v45  ;;  %v6029_v44 = vsel %vm1387_vm0, %v5688_v3, %v5596_v15  ;;  %v10434_v1 = vld [vmem:[#allocation14_spill] sm:$0xff] }
 0x185   : > { %10423 = vst [vmem:[#allocation32_spill] sm:$0xff] %v6010_v36  ;;  %10426 = vst [vmem:[#allocation35_spill] sm:$0xff] %v6024_v29  ;;  %v6032_v8 = vunpack.c.h.b16 %v5700_v11  ;;  %v6037_v43 = vsel %vm1387_vm0, %v5835_v55, %v5655_v48  ;;  %v6042_v61 = vsel %vm1387_vm0, %v5925_v21, %v5658_v49  ;;  %v6047_v31 = vsel %vm1393_vm1, %v5832_v59, %v5651_v45  ;;  %v10431_v29 = vld [vmem:[#allocation13_spill] sm:$0xff] }
 0x186   : > { %10425 = vst [vmem:[#allocation34_spill] sm:$0xff] %v6018_v14  ;;  %10428 = vst [vmem:[#allocation37_spill] sm:$0xff] %v6037_v43  ;;  %v1231_v26 = vmax.f32 %v1043_v27, 0.0  ;;  %v1232_v2 = vmax.f32 %v1046_v40, 0.0  ;;  %v6051_v11 = vsel %vm1387_vm0, %v2643_v58, %v10431_v29  ;;  %v6056_v43 = vsel %vm1393_vm1, %v5835_v55, %v5655_v48 }
 0x187   : > { %10427 = vst [vmem:[#allocation36_spill] sm:$0xff] %v6032_v8  ;;  %10429 = vst [vmem:[#allocation38_spill] sm:$0xff] %v6042_v61  ;;  %v6060_v51 = vsel %vm1387_vm0, %v2586_v33, %v10434_v1  ;;  %v10436_v61 = vld [vmem:[#allocation15_spill] sm:$0xff]  ;;  %v6069_v27 = vsel %vm1393_vm1, %v5925_v21, %v5658_v49  ;;  %v6073_v40 = vsel %vm1393_vm1, %v2643_v58, %v10431_v29 }
 0x188   : > { %10430 = vst [vmem:[#allocation39_spill] sm:$0xff] %v6047_v31  ;;  %10432 = vst [vmem:[#allocation13_spill] sm:$0xff] %v6051_v11  ;;  %v6064_v4 = vsel %vm1387_vm0, %v2660_v42, %v10436_v61  ;;  %v6075_v31 = vpack.c.bf16 %v1232_v2, %v1231_v26  ;;  %v6094_v2 = vsel %vm1399_vm2, %v5835_v55, %v5655_v48  ;;  %v3237_v26 = vrot.slane %v6032_v8, 1 }
 0x189   : > { %10433 = vst [vmem:[#allocation40_spill] sm:$0xff] %v6056_v43  ;;  %10435 = vst [vmem:[#allocation14_spill] sm:$0xff] %v6060_v51  ;;  %v6079_v43 = vsel %vm1393_vm1, %v2586_v33, %v10434_v1  ;;  %v6083_v51 = vsel %vm1393_vm1, %v2660_v42, %v10436_v61  ;;  %v1050_v11 = vpop.f32.mrb[48].mxu0  ;;  %v6113_v55 = vsel %vm1399_vm2, %v2586_v33, %v10434_v1  ;;  %v10453_v33 = vld [vmem:[#allocation18_spill] sm:$0xff] }
 0x18a   : > { %10437 = vst [vmem:[#allocation15_spill] sm:$0xff] %v6064_v4  ;;  %10438 = vst [vmem:[#allocation41_spill] sm:$0xff] %v6069_v27  ;;  %v3163_v4 = vrot.slane %v6018_v14, 1  ;;  %v6089_v27 = vsel %vm1399_vm2, %v5832_v59, %v5651_v45  ;;  %v6106_v45 = vsel %vm1399_vm2, %v2643_v58, %v10431_v29  ;;  %v6109_v59 = vrot.slane %v6032_v8, 2 }
 0x18b   : > { %10439 = vst [vmem:[#allocation42_spill] sm:$0xff] %v6073_v40  ;;  %10440 = vst [vmem:[#allocation43_spill] sm:$0xff] %v6075_v31  ;;  %v1051_v40 = vadd.f32 %v5570_v60, %v1050_v11  ;;  %v6102_v31 = vsel %vm1399_vm2, %v5925_v21, %v5658_v49  ;;  %v10447_v11 = vld [vmem:[#allocation16_spill] sm:$0xff]  ;;  %v10449_v21 = vld [vmem:[#allocation7_spill] sm:$0xff] }
 0x18c   : > { %10441 = vst [vmem:[#allocation44_spill] sm:$0xff] %v6079_v43  ;;  %10442 = vst [vmem:[#allocation45_spill] sm:$0xff] %v6083_v51  ;;  %v3180_v43 = vrot.slane %v6018_v14, 2  ;;  %v1052_v51 = vpop.f32.mrb[49].mxu0  ;;  %v6122_v49 = vsel %vm1387_vm0, %v6018_v14, %v10447_v11  ;;  %v6127_v58 = vsel %vm1387_vm0, %v6010_v36, %v10449_v21 }
 0x18d   : > { %10443 = vst [vmem:[#allocation46_spill] sm:$0xff] %v6102_v31  ;;  %10444 = vst [vmem:[#allocation47_spill] sm:$0xff] %v6106_v45  ;;  %v1053_v48 = vpop.f32.mrb[50].mxu0  ;;  %v6117_v51 = vsel %vm1399_vm2, %v2660_v42, %v10436_v61  ;;  %v10451_v31 = vld [vmem:[#allocation17_spill] sm:$0xff]  ;;  %v6137_v42 = vsel %vm1387_vm0, %v3163_v4, %v10453_v33  ;;  %v6142_v61 = vsel %vm1393_vm1, %v6018_v14, %v10447_v11 }
 0x18e   : > { %10445 = vst [vmem:[#allocation48_spill] sm:$0xff] %v6109_v59  ;;  %10446 = vst [vmem:[#allocation49_spill] sm:$0xff] %v6117_v51  ;;  %v1054_v29 = vadd.f32 %v5570_v60, %v1053_v48  ;;  %v1055_v45 = vpop.f32.mrb[51].mxu0  ;;  %v6133_v1 = vsel %vm1387_vm0, %v6032_v8, %v10451_v31  ;;  %v10458_v48 = vld [vmem:[#allocation20_spill] sm:$0xff]  ;;  %v6155_v21 = vsel %vm1393_vm1, %v6032_v8, %v10451_v31 }
 0x18f   : > { %10448 = vst [vmem:[#allocation16_spill] sm:$0xff] %v6122_v49  ;;  %10450 = vst [vmem:[#allocation50_spill] sm:$0xff] %v6127_v58  ;;  %v10456_v49 = vld [vmem:[#allocation19_spill] sm:$0xff]  ;;  %v6150_v45 = vsel %vm1387_vm0, %v3180_v43, %v10458_v48  ;;  %v1233_v58 = vmax.f32 %v1051_v40, 0.0  ;;  %v6181_v40 = vsel %vm1393_vm1, %v3180_v43, %v10458_v48 }
 0x190   : > { %10452 = vst [vmem:[#allocation17_spill] sm:$0xff] %v6133_v1  ;;  %10454 = vst [vmem:[#allocation18_spill] sm:$0xff] %v6137_v42  ;;  %v6146_v36 = vsel %vm1387_vm0, %v3237_v26, %v10456_v49  ;;  %v6159_v1 = vsel %vm1393_vm1, %v3163_v4, %v10453_v33  ;;  %v1234_v42 = vmax.f32 %v1054_v29, 0.0 }
 0x191   : > { %10455 = vst [vmem:[#allocation51_spill] sm:$0xff] %v6142_v61  ;;  %10457 = vst [vmem:[#allocation19_spill] sm:$0xff] %v6146_v36  ;;  %v10462_v61 = vld [vmem:[#allocation21_spill] sm:$0xff]  ;;  %v6168_v36 = vsel %vm1393_vm1, %v3237_v26, %v10456_v49 }
 0x192   : > { %10459 = vst [vmem:[#allocation20_spill] sm:$0xff] %v6150_v45  ;;  %10460 = vst [vmem:[#allocation52_spill] sm:$0xff] %v6155_v21  ;;  %v6164_v51 = vsel %vm1387_vm0, %v6109_v59, %v10462_v61  ;;  %v6171_v45 = vunpack.c.l.b16 %v5971_v23  ;;  %v6174_v21 = vrot.slane %v5823_v12, 6  ;;  %v1285_v29 = vpack.c.bf16 %v1234_v42, %v1233_v58 }
 0x193   : > { %10461 = vst [vmem:[#allocation53_spill] sm:$0xff] %v6159_v1  ;;  %10463 = vst [vmem:[#allocation54_spill] sm:$0xff] %v6164_v51  ;;  %v6177_v1 = vrot.slane %v5821_v7, 6  ;;  %v6186_v51 = vsel %vm1393_vm1, %v6109_v59, %v10462_v61  ;;  %v6196_v12 = vsel %vm1399_vm2, %v6032_v8, %v10451_v31  ;;  %v1058_v7 = vpop.f32.mrb[52].mxu0  ;;  %v6204_v58 = vsel %vm1399_vm2, %v3237_v26, %v10456_v49 }
 0x194   : > { %10464 = vst [vmem:[#allocation55_spill] sm:$0xff] %v6168_v36  ;;  %10465 = vst [vmem:[#allocation56_spill] sm:$0xff] %v6171_v45  ;;  %v6191_v36 = vsel %vm1399_vm2, %v6018_v14, %v10447_v11  ;;  %v6209_v42 = vsel %vm1393_vm1, %v5688_v3, %v5596_v15  ;;  %v10469_v11 = vld [vmem:[#allocation5_spill] sm:$0xff]  ;;  %v10470_v14 = vld [vmem:[#allocation23_spill] sm:$0xff]  ;;  %v6216_v31 = vunpack.c.l.b16 %v1285_v29  ;;  %v6218_v8 = vunpack.c.h.b16 %v1285_v29 }
 0x195   : > { %10466 = vst [vmem:[#allocation57_spill] sm:$0xff] %v6174_v21  ;;  %10467 = vst [vmem:[#allocation58_spill] sm:$0xff] %v6177_v1  ;;  %v6214_v59 = vsel %vm1393_vm1, %v10470_v14, %v10469_v11  ;;  %v6223_v26 = vsel %vm1399_vm2, %v3180_v43, %v10458_v48  ;;  %v6226_v49 = vunpack.c.h.b16 %v5971_v23  ;;  %v6229_v15 = vrot.slane %v6171_v45, 7  ;;  %v10473_v14 = vld [vmem:[#allocation25_spill] sm:$0xff] }
 0x196   : > { %10468 = vst [vmem:[#allocation59_spill] sm:$0xff] %v6181_v40  ;;  %v6200_v40 = vsel %vm1399_vm2, %v3163_v4, %v10453_v33  ;;  %v1059_v4 = vadd.f32 %v5570_v60, %v1058_v7  ;;  %v1060_v33 = vpop.f32.mrb[53].mxu0  ;;  %10471 = vst [vmem:[#allocation60_spill] sm:$0xff] %v6223_v26  ;;  %v6234_v11 = vsel %vm1390_vm3, %v6174_v21, %v10473_v14  ;;  %v1503_v23 = vrot.slane %v6218_v8, 7 }
 0x197   : > { %10472 = vst [vmem:[#allocation61_spill] sm:$0xff] %v6226_v49  ;;  %v1061_v3 = vpop.f32.mrb[54].mxu0  ;;  %10474 = vst [vmem:[#allocation25_spill] sm:$0xff] %v6234_v11  ;;  %v6239_v29 = vsel %vm1390_vm3, %v6177_v1, %v6029_v44  ;;  %v1486_v33 = vrot.slane %v6218_v8, 6  ;;  %v1429_v61 = vrot.slane %v6216_v31, 7  ;;  %v1412_v26 = vrot.slane %v6216_v31, 6 }
 0x198   : > { %10475 = vst [vmem:[#allocation62_spill] sm:$0xff] %v6239_v29  ;;  %v1235_v7 = vmax.f32 %v1059_v4, 0.0  ;;  %v1062_v43 = vadd.f32 %v5570_v60, %v1061_v3  ;;  %v1063_v48 = vpop.f32.mrb[55].mxu0  ;;  %v6249_v14 = vsel %vm1393_vm1, %v6216_v31, %v5872_v57  ;;  %v6254_v44 = vsel %vm1393_vm1, %v6218_v8, %v5875_v54 }
 0x199   : > { %v6258_v4 = vsel %vm1393_vm1, %v1503_v23, %v5845_v35  ;;  %v6262_v48 = vsel %vm1393_vm1, %v1486_v33, %v5857_v19  ;;  %v6266_v29 = vsel %vm1399_vm2, %v1486_v33, %v5860_v53  ;;  %v6270_v57 = vsel %vm1393_vm1, %v1429_v61, %v5850_v38 }
 0x19a   : > { %v1236_v3 = vmax.f32 %v1062_v43, 0.0  ;;  %v6274_v54 = vsel %vm1393_vm1, %v1412_v26, %v5868_v13  ;;  %v6278_v35 = vsel %vm1399_vm2, %v1412_v26, %v5879_v10  ;;  %v6282_v19 = vsel %vm1399_vm2, %v1429_v61, %v5864_v16  ;;  %v10476_v13 = vld [vmem:[#allocation28_spill] sm:$0xff]  ;;  %v1066_v10 = vpop.f32.mrb[56].mxu0 }
 0x19b   : > { %v6286_v53 = vsel %vm1399_vm2, %v1503_v23, %v5884_v30  ;;  %v6291_v38 = vsel %vm1399_vm2, %v6216_v31, %v5888_v17  ;;  %v6296_v11 = vsel %vm1399_vm2, %v6218_v8, %v10476_v13  ;;  %v6300_v16 = vsel %vm1405_vm6, %v1412_v26, %v5894_v46  ;;  %v1068_v46 = vpop.f32.mrb[57].mxu0 }
 0x19c   : > { %v1286_v43 = vpack.c.bf16 %v1236_v3, %v1235_v7  ;;  %10477 = vst [vmem:[#allocation28_spill] sm:$0xff] %v6296_v11  ;;  %10478 = vst [vmem:[#allocation63_spill] sm:$0xff] %v6300_v16  ;;  %v6304_v7 = vsel %vm1405_vm6, %v1486_v33, %v5897_v18  ;;  %v6308_v30 = vsel %vm1405_vm6, %v1429_v61, %v5901_v0  ;;  %v1069_v26 = vpop.f32.mrb[58].mxu0  ;;  %v2588_v61 = vrot.slane %v6171_v45, 1 }
 0x19d   : > { %10479 = vst [vmem:[#allocation64_spill] sm:$0xff] %v6304_v7  ;;  %10480 = vst [vmem:[#allocation65_spill] sm:$0xff] %v6308_v30  ;;  %v6312_v17 = vsel %vm1405_vm6, %v1503_v23, %v5905_v47  ;;  %v1067_v11 = vadd.f32 %v5570_v60, %v1066_v10  ;;  %v6322_v18 = vsel %vm1405_vm6, %v6216_v31, %v5913_v50  ;;  %v2627_v47 = vrot.slane %v6226_v49, 7  ;;  %v1071_v10 = vpop.f32.mrb[59].mxu0  ;;  %v10497_v7 = vld [vmem:[#allocation31_spill] sm:$0xff] }
 0x19e   : > { %10481 = vst [vmem:[#allocation66_spill] sm:$0xff] %v6312_v17  ;;  %v6314_v3 = vunpack.c.l.b16 %v1286_v43  ;;  %v6316_v13 = vunpack.c.h.b16 %v1286_v43  ;;  %10484 = vst [vmem:[#allocation69_spill] sm:$0xff] %v6322_v18  ;;  %v6327_v0 = vsel %vm1405_vm6, %v6218_v8, %v5916_v52  ;;  %v2662_v23 = vrot.slane %v6226_v49, 1 }
 0x19f   : > { %10485 = vst [vmem:[#allocation70_spill] sm:$0xff] %v6327_v0  ;;  %v1237_v33 = vmax.f32 %v1067_v11, 0.0  ;;  %v1070_v43 = vadd.f32 %v5570_v60, %v1069_v26 }
 0x1a0   : > { %10482 = vst [vmem:[#allocation67_spill] sm:$0xff] %v6314_v3  ;;  %10483 = vst [vmem:[#allocation68_spill] sm:$0xff] %v6316_v13  ;;  %v1568_v46 = vrot.slane %v6314_v3, 6  ;;  %v1642_v50 = vrot.slane %v6316_v13, 6  ;;  %v1585_v18 = vrot.slane %v6314_v3, 7  ;;  %v1659_v17 = vrot.slane %v6316_v13, 7 }
 0x1a1   : > { %v6340_v52 = vsel %vm1393_vm1, %v6314_v3, %v5956_v32  ;;  %v6345_v11 = vsel %vm1393_vm1, %v6316_v13, %v5960_v34  ;;  %v1238_v26 = vmax.f32 %v1070_v43, 0.0 }
 0x1a2   : > { %10486 = vst [vmem:[#allocation71_spill] sm:$0xff] %v6345_v11  ;;  %v6349_v10 = vsel %vm1393_vm1, %v1568_v46, %v5944_v22  ;;  %v6353_v0 = vsel %vm1393_vm1, %v1642_v50, %v5948_v5  ;;  %v6357_v30 = vsel %vm1399_vm2, %v1568_v46, %v5952_v28  ;;  %v6361_v32 = vsel %vm1393_vm1, %v1585_v18, %v5933_v39 }
 0x1a3   : > { %10487 = vst [vmem:[#allocation72_spill] sm:$0xff] %v6357_v30  ;;  %v6365_v34 = vsel %vm1393_vm1, %v1659_v17, %v5938_v20  ;;  %v6369_v22 = vsel %vm1399_vm2, %v1642_v50, %v5964_v25  ;;  %v6373_v5 = vsel %vm1399_vm2, %v1585_v18, %v5969_v24  ;;  %v1287_v43 = vpack.c.bf16 %v1238_v26, %v1237_v33  ;;  %v1074_v25 = vpop.f32.mrb[60].mxu0 }
 0x1a4   : > { %10488 = vst [vmem:[#allocation73_spill] sm:$0xff] %v6369_v22  ;;  %10489 = vst [vmem:[#allocation74_spill] sm:$0xff] %v6373_v5  ;;  %v6377_v28 = vsel %vm1399_vm2, %v1659_v17, %v5976_v37  ;;  %v6382_v39 = vsel %vm1399_vm2, %v6314_v3, %v5980_v62  ;;  %v6387_v20 = vsel %vm1399_vm2, %v6316_v13, %v5984_v63  ;;  %v1076_v26 = vpop.f32.mrb[61].mxu0  ;;  %v10517_v5 = vld [vmem:[#allocation45_spill] sm:$0xff]  ;;  %v10520_v22 = vld [vmem:[#allocation46_spill] sm:$0xff] }
 0x1a5   : > { %10490 = vst [vmem:[#allocation75_spill] sm:$0xff] %v6377_v28  ;;  %10491 = vst [vmem:[#allocation76_spill] sm:$0xff] %v6382_v39  ;;  %v6391_v24 = vsel %vm1405_vm6, %v1568_v46, %v5988_v6  ;;  %v6395_v33 = vsel %vm1405_vm6, %v1642_v50, %v5991_v9  ;;  %v6399_v37 = vsel %vm1405_vm6, %v1585_v18, %v5995_v41  ;;  %v10499_v46 = vld [vmem:[#allocation38_spill] sm:$0xff]  ;;  %v10500_v50 = vld [vmem:[#allocation29_spill] sm:$0xff] }
 0x1a6   : > { %10492 = vst [vmem:[#allocation77_spill] sm:$0xff] %v6387_v20  ;;  %10493 = vst [vmem:[#allocation78_spill] sm:$0xff] %v6391_v24  ;;  %v6403_v62 = vsel %vm1405_vm6, %v1659_v17, %v5999_v56  ;;  %v1075_v63 = vadd.f32 %v5570_v60, %v1074_v25  ;;  %v6409_v6 = vsel %vm1405_vm6, %v6314_v3, %v10497_v7  ;;  %v6417_v41 = vrot.slane %v10500_v50, 6  ;;  %v10502_v18 = vld [vmem:[#allocation43_spill] sm:$0xff]  ;;  %v1077_v56 = vpop.f32.mrb[62].mxu0  ;;  %v10504_v17 = vld [vmem:[#allocation33_spill] sm:$0xff] }
 0x1a7   : > { %10494 = vst [vmem:[#allocation79_spill] sm:$0xff] %v6395_v33  ;;  %10495 = vst [vmem:[#allocation80_spill] sm:$0xff] %v6399_v37  ;;  %v6414_v9 = vsel %vm1390_vm3, %v6171_v45, %v10499_v46  ;;  %v6420_v37 = vunpack.c.l.b16 %v10502_v18  ;;  %v6425_v25 = vsel %vm1405_vm6, %v6316_v13, %v10504_v17  ;;  %v10506_v26 = vld [vmem:[#allocation35_spill] sm:$0xff]  ;;  %v6438_v50 = vunpack.c.h.b16 %v10502_v18  ;;  %v1079_v33 = vpop.f32.mrb[63].mxu0  ;;  %v10509_v24 = vld [vmem:[#allocation37_spill] sm:$0xff] }
 0x1a8   : > { %10496 = vst [vmem:[#allocation81_spill] sm:$0xff] %v6403_v62  ;;  %10498 = vst [vmem:[#allocation31_spill] sm:$0xff] %v6409_v6  ;;  %v6430_v7 = vsel %vm1390_vm3, %v6229_v15, %v10506_v26  ;;  %v10507_v6 = vld [vmem:[#allocation13_spill] sm:$0xff]  ;;  %v1078_v62 = vadd.f32 %v5570_v60, %v1077_v56  ;;  %v6443_v17 = vsel %vm1390_vm3, %v2627_v47, %v10509_v24  ;;  %v10510_v13 = vld [vmem:[#allocation39_spill] sm:$0xff]  ;;  %v1239_v20 = vmax.f32 %v1075_v63, 0.0 }
 0x1a9   : > { %10501 = vst [vmem:[#allocation38_spill] sm:$0xff] %v6417_v41  ;;  %10503 = vst [vmem:[#allocation29_spill] sm:$0xff] %v6420_v37  ;;  %v6435_v46 = vsel %vm1390_vm3, %v6226_v49, %v10507_v6  ;;  %v6448_v26 = vsel %vm1396_vm4, %v6229_v15, %v10510_v13  ;;  %v10512_v6 = vld [vmem:[#allocation15_spill] sm:$0xff]  ;;  %v10513_v18 = vld [vmem:[#allocation40_spill] sm:$0xff]  ;;  %v3147_v63 = vrot.slane %v6420_v37, 7  ;;  %v6495_v30 = vrot.slane %v6420_v37, 1 }
 0x1aa   : > { %10505 = vst [vmem:[#allocation43_spill] sm:$0xff] %v6425_v25  ;;  %10508 = vst [vmem:[#allocation33_spill] sm:$0xff] %v6438_v50  ;;  %v10511_v25 = vld [vmem:[#allocation14_spill] sm:$0xff]  ;;  %v6454_v3 = vsel %vm1390_vm3, %v2662_v23, %v10512_v6  ;;  %v6458_v56 = vsel %vm1396_vm4, %v2627_v47, %v10513_v18  ;;  %v10514_v33 = vld [vmem:[#allocation41_spill] sm:$0xff]  ;;  %v1240_v39 = vmax.f32 %v1078_v62, 0.0  ;;  %v6476_v18 = vsel %vm1396_vm4, %v2662_v23, %v10517_v5  ;;  %v1082_v11 = vpop.f32.mrb[64].mxu0 }
 0x1ab   : > { %v2589_v16 = vsel %vm1390_vm3, %v2588_v61, %v10511_v25  ;;  %v6463_v24 = vsel %vm1396_vm4, %v6171_v45, %v10514_v33  ;;  %v10515_v13 = vld [vmem:[#allocation42_spill] sm:$0xff]  ;;  %v10516_v25 = vld [vmem:[#allocation44_spill] sm:$0xff]  ;;  %v6481_v33 = vsel %vm1402_vm5, %v6229_v15, %v6089_v27  ;;  %v6485_v62 = vsel %vm1402_vm5, %v2627_v47, %v6094_v2  ;;  %v10522_v15 = vld [vmem:[#allocation47_spill] sm:$0xff] }
 0x1ac   : > { %v6468_v28 = vsel %vm1396_vm4, %v6226_v49, %v10515_v13  ;;  %v6472_v6 = vsel %vm1396_vm4, %v2588_v61, %v10516_v25  ;;  %10518 = vst [vmem:[#allocation35_spill] sm:$0xff] %v6481_v33  ;;  %10519 = vst [vmem:[#allocation13_spill] sm:$0xff] %v6485_v62  ;;  %v1288_v13 = vpack.c.bf16 %v1240_v39, %v1239_v20  ;;  %v3221_v5 = vrot.slane %v6438_v50, 7  ;;  %v10525_v47 = vld [vmem:[#allocation49_spill] sm:$0xff] }
 0x1ad   : > { %v6491_v25 = vsel %vm1402_vm5, %v6171_v45, %v10520_v22  ;;  %v6500_v27 = vsel %vm1402_vm5, %v6226_v49, %v10522_v15  ;;  %v6504_v2 = vsel %vm1402_vm5, %v2588_v61, %v6113_v55  ;;  %v6508_v39 = vsel %vm1402_vm5, %v2662_v23, %v10525_v47  ;;  %v1084_v45 = vpop.f32.mrb[65].mxu0  ;;  %v10529_v15 = vld [vmem:[#allocation50_spill] sm:$0xff] }
 0x1ae   : > { %10521 = vst [vmem:[#allocation37_spill] sm:$0xff] %v6491_v25  ;;  %10523 = vst [vmem:[#allocation39_spill] sm:$0xff] %v6500_v27  ;;  %v6511_v22 = vrot.slane %v6438_v50, 1  ;;  %v1083_v20 = vadd.f32 %v5570_v60, %v1082_v11  ;;  %v10527_v25 = vld [vmem:[#allocation18_spill] sm:$0xff]  ;;  %v6522_v55 = vsel %vm1390_vm3, %v6417_v41, %v10529_v15  ;;  %v6527_v61 = vsel %vm1396_vm4, %v6177_v1, %v6209_v42  ;;  %v1085_v45 = vpop.f32.mrb[66].mxu0  ;;  %v10534_v11 = vld [vmem:[#allocation16_spill] sm:$0xff] }
 0x1af   : > { %10524 = vst [vmem:[#allocation14_spill] sm:$0xff] %v6504_v2  ;;  %10526 = vst [vmem:[#allocation15_spill] sm:$0xff] %v6508_v39  ;;  %v6517_v62 = vsel %vm1390_vm3, %v6420_v37, %v10527_v25  ;;  %v6529_v23 = vunpack.c.l.b16 %v1287_v43  ;;  %v6531_v47 = vunpack.c.h.b16 %v1287_v43  ;;  %v6535_v49 = vsel %vm1390_vm3, %v3147_v63, %v10534_v11  ;;  %v10535_v25 = vld [vmem:[#allocation19_spill] sm:$0xff]  ;;  %v1087_v41 = vpop.f32.mrb[67].mxu0  ;;  %v10538_v1 = vld [vmem:[#allocation20_spill] sm:$0xff] }
 0x1b0   : > { %10528 = vst [vmem:[#allocation40_spill] sm:$0xff] %v6517_v62  ;;  %10530 = vst [vmem:[#allocation41_spill] sm:$0xff] %v6522_v55  ;;  %v6540_v39 = vsel %vm1390_vm3, %v6438_v50, %v10535_v25  ;;  %v1086_v15 = vadd.f32 %v5570_v60, %v1085_v45  ;;  %v10537_v55 = vld [vmem:[#allocation17_spill] sm:$0xff]  ;;  %v6550_v43 = vsel %vm1390_vm3, %v6495_v30, %v10538_v1  ;;  %v10540_v2 = vld [vmem:[#allocation54_spill] sm:$0xff] }
 0x1b1   : > { %10531 = vst [vmem:[#allocation42_spill] sm:$0xff] %v6527_v61  ;;  %10532 = vst [vmem:[#allocation44_spill] sm:$0xff] %v6529_v23  ;;  %v6545_v42 = vsel %vm1390_vm3, %v3221_v5, %v10537_v55  ;;  %v10539_v61 = vld [vmem:[#allocation51_spill] sm:$0xff]  ;;  %v6559_v25 = vsel %vm1390_vm3, %v6511_v22, %v10540_v2  ;;  %v10541_v45 = vld [vmem:[#allocation52_spill] sm:$0xff] }
 0x1b2   : > { %10533 = vst [vmem:[#allocation45_spill] sm:$0xff] %v6531_v47  ;;  %10536 = vst [vmem:[#allocation46_spill] sm:$0xff] %v6540_v39  ;;  %v6554_v11 = vsel %vm1396_vm4, %v3147_v63, %v10539_v61  ;;  %v6563_v41 = vsel %vm1396_vm4, %v3221_v5, %v10541_v45  ;;  %v10542_v55 = vld [vmem:[#allocation53_spill] sm:$0xff]  ;;  %v10544_v1 = vld [vmem:[#allocation55_spill] sm:$0xff]  ;;  %v1241_v61 = vmax.f32 %v1083_v20, 0.0  ;;  %v1242_v39 = vmax.f32 %v1086_v15, 0.0 }
 0x1b3   : > { %v6568_v27 = vsel %vm1396_vm4, %v6420_v37, %v10542_v55  ;;  %v6573_v33 = vsel %vm1396_vm4, %v6438_v50, %v10544_v1  ;;  %v10545_v62 = vld [vmem:[#allocation59_spill] sm:$0xff]  ;;  %v6583_v45 = vsel %vm1396_vm4, %v6511_v22, %v6186_v51  ;;  %v6586_v55 = vrot.slane %v6529_v23, 6 }
 0x1b4   : > { %10543 = vst [vmem:[#allocation47_spill] sm:$0xff] %v6568_v27  ;;  %v6578_v2 = vsel %vm1396_vm4, %v6495_v30, %v10545_v62  ;;  %v6589_v27 = vrot.slane %v6531_v47, 6  ;;  %v6593_v20 = vsel %vm1402_vm5, %v3147_v63, %v6191_v36  ;;  %v6597_v15 = vsel %vm1402_vm5, %v3221_v5, %v6196_v12  ;;  %v1090_v63 = vpop.f32.mrb[68].mxu0 }
 0x1b5   : > { %10546 = vst [vmem:[#allocation49_spill] sm:$0xff] %v6586_v55  ;;  %10548 = vst [vmem:[#allocation50_spill] sm:$0xff] %v6593_v20  ;;  %v1289_v62 = vpack.c.bf16 %v1242_v39, %v1241_v61  ;;  %v6602_v51 = vsel %vm1402_vm5, %v6420_v37, %v6200_v40  ;;  %v6607_v1 = vsel %vm1402_vm5, %v6438_v50, %v6204_v58  ;;  %v6615_v12 = vrot.slane %v6529_v23, 7  ;;  %v1092_v50 = vpop.f32.mrb[69].mxu0 }
 0x1b6   : > { %10547 = vst [vmem:[#allocation18_spill] sm:$0xff] %v6589_v27  ;;  %10549 = vst [vmem:[#allocation16_spill] sm:$0xff] %v6597_v15  ;;  %v6612_v36 = vsel %vm1396_vm4, %v6174_v21, %v6214_v59  ;;  %v6618_v5 = vrot.slane %v6531_v47, 7  ;;  %v6621_v40 = vrot.slane %v6218_v8, 5  ;;  %v6624_v39 = vrot.slane %v6216_v31, 5  ;;  %v1093_v21 = vpop.f32.mrb[70].mxu0 }
 0x1b7   : > { %10550 = vst [vmem:[#allocation19_spill] sm:$0xff] %v6602_v51  ;;  %10551 = vst [vmem:[#allocation17_spill] sm:$0xff] %v6607_v1  ;;  %v6626_v58 = vunpack.c.l.b16 %v1289_v62  ;;  %v6628_v61 = vunpack.c.h.b16 %v1289_v62  ;;  %v1091_v59 = vadd.f32 %v5570_v60, %v1090_v63  ;;  %v6633_v37 = vsel %vm1393_vm1, %v6529_v23, %v2589_v16 }
 0x1b8   : > { %10552 = vst [vmem:[#allocation20_spill] sm:$0xff] %v6612_v36  ;;  %10553 = vst [vmem:[#allocation51_spill] sm:$0xff] %v6615_v12  ;;  %v6638_v8 = vsel %vm1393_vm1, %v6586_v55, %v6430_v7  ;;  %v6643_v31 = vsel %vm1393_vm1, %v6589_v27, %v6443_v17  ;;  %v6648_v62 = vsel %vm1393_vm1, %v6531_v47, %v6454_v3  ;;  %v6655_v50 = vunpack.c.l.b16 %v1288_v13  ;;  %v1095_v36 = vpop.f32.mrb[71].mxu0 }
 0x1b9   : > { %10554 = vst [vmem:[#allocation54_spill] sm:$0xff] %v6618_v5  ;;  %10555 = vst [vmem:[#allocation52_spill] sm:$0xff] %v6621_v40  ;;  %v6653_v16 = vsel %vm1399_vm2, %v6586_v55, %v6448_v26  ;;  %v6658_v7 = vrot.slane %v6626_v58, 5  ;;  %v6661_v63 = vrot.slane %v6626_v58, 6  ;;  %v6664_v17 = vrot.slane %v6626_v58, 7 }
 0x1ba   : > { %10556 = vst [vmem:[#allocation53_spill] sm:$0xff] %v6624_v39  ;;  %10557 = vst [vmem:[#allocation55_spill] sm:$0xff] %v6626_v58  ;;  %v6666_v1 = vunpack.c.h.b16 %v1288_v13  ;;  %v6669_v3 = vrot.slane %v6628_v61, 7  ;;  %v1243_v51 = vmax.f32 %v1091_v59, 0.0  ;;  %v1094_v26 = vadd.f32 %v5570_v60, %v1093_v21 }
 0x1bb   : > { %10558 = vst [vmem:[#allocation59_spill] sm:$0xff] %v6628_v61  ;;  %10559 = vst [vmem:[#allocation82_spill] sm:$0xff] %v6655_v50  ;;  %v6673_v15 = vrot.slane %v6628_v61, 6  ;;  %v6676_v20 = vrot.slane %v6628_v61, 5  ;;  %v6681_v55 = vsel %vm1396_vm4, %v6661_v63, %v6270_v57  ;;  %v6686_v13 = vsel %vm1396_vm4, %v6658_v7, %v6274_v54  ;;  %v10564_v61 = vld [vmem:[#allocation28_spill] sm:$0xff] }
 0x1bc   : > { %10560 = vst [vmem:[#allocation83_spill] sm:$0xff] %v6664_v17  ;;  %10561 = vst [vmem:[#allocation84_spill] sm:$0xff] %v6666_v1  ;;  %v1244_v36 = vmax.f32 %v1094_v26, 0.0  ;;  %v6691_v60 = vsel %vm1396_vm4, %v6664_v17, %v6249_v14  ;;  %v6696_v21 = vsel %vm1396_vm4, %v6669_v3, %v6254_v44  ;;  %v6701_v57 = vsel %vm1402_vm5, %v6658_v7, %v6278_v35  ;;  %v1098_v26 = vpop.f32.mrb[72].mxu0 }
 0x1bd   : > { %10562 = vst [vmem:[#allocation85_spill] sm:$0xff] %v6669_v3  ;;  %10563 = vst [vmem:[#allocation86_spill] sm:$0xff] %v6673_v15  ;;  %v6706_v54 = vsel %vm1396_vm4, %v6673_v15, %v6258_v4  ;;  %v6711_v14 = vsel %vm1396_vm4, %v6676_v20, %v6262_v48  ;;  %v6716_v44 = vsel %vm1402_vm5, %v6676_v20, %v6266_v29 }
 0x1be   : > { %v6721_v35 = vsel %vm1402_vm5, %v6661_v63, %v6282_v19  ;;  %v1290_v59 = vpack.c.bf16 %v1244_v36, %v1243_v51  ;;  %v6726_v4 = vsel %vm1402_vm5, %v6673_v15, %v6286_v53  ;;  %v6731_v48 = vsel %vm1402_vm5, %v6664_v17, %v6291_v38  ;;  %v6741_v19 = vld [vmem:[%s10132_s2] ss:$0 sm:$0xff]  ;;  %v1100_v36 = vpop.f32.mrb[73].mxu0 }
 0x1bf   : > { %v6736_v29 = vsel %vm1402_vm5, %v6669_v3, %v10564_v61  ;;  %v1099_v51 = vadd.f32 %v6741_v19, %v1098_v26  ;;  %v2573_v53 = vsel %vm1393_vm1, %v6615_v12, %v6414_v9  ;;  %v2647_v38 = vsel %vm1393_vm1, %v6618_v5, %v6435_v46  ;;  %v1101_v15 = vpop.f32.mrb[74].mxu0 }
 0x1c0   : > { %v6753_v61 = vsel %vm1399_vm2, %v6589_v27, %v6458_v56  ;;  %v6755_v3 = vunpack.c.l.b16 %v1290_v59  ;;  %v6757_v17 = vunpack.c.h.b16 %v1290_v59  ;;  %v6762_v26 = vsel %vm1399_vm2, %v6615_v12, %v6463_v24  ;;  %v1103_v36 = vpop.f32.mrb[75].mxu0 }
 0x1c1   : > { %v6767_v9 = vsel %vm1399_vm2, %v6618_v5, %v6468_v28  ;;  %v1102_v46 = vadd.f32 %v6741_v19, %v1101_v15  ;;  %v6773_v56 = vsel %vm1399_vm2, %v6529_v23, %v6472_v6  ;;  %v6778_v59 = vsel %vm1399_vm2, %v6531_v47, %v6476_v18 }
 0x1c2   : > { %10565 = vst [vmem:[#allocation28_spill] sm:$0xff] %v6755_v3  ;;  %10566 = vst [vmem:[#allocation87_spill] sm:$0xff] %v6757_v17  ;;  %v6781_v24 = vrot.slane %v6655_v50, 6  ;;  %v6784_v12 = vrot.slane %v6755_v3, 5  ;;  %v6787_v28 = vrot.slane %v6755_v3, 6  ;;  %v6790_v15 = vrot.slane %v6755_v3, 7 }
 0x1c3   : > { %v6793_v6 = vrot.slane %v6666_v1, 6  ;;  %v6796_v36 = vrot.slane %v6757_v17, 5  ;;  %v6799_v18 = vrot.slane %v6757_v17, 6  ;;  %v6802_v47 = vrot.slane %v6757_v17, 7  ;;  %v10581_v17 = vld [vmem:[#allocation72_spill] sm:$0xff] }
 0x1c4   : > { %10567 = vst [vmem:[#allocation88_spill] sm:$0xff] %v6781_v24  ;;  %10568 = vst [vmem:[#allocation89_spill] sm:$0xff] %v6784_v12  ;;  %v1245_v23 = vmax.f32 %v1099_v51, 0.0  ;;  %v1246_v5 = vmax.f32 %v1102_v46, 0.0  ;;  %v6807_v27 = vsel %vm1396_vm4, %v6784_v12, %v6349_v10  ;;  %v6812_v3 = vsel %vm1396_vm4, %v6787_v28, %v6361_v32  ;;  %v10580_v46 = vld [vmem:[#allocation71_spill] sm:$0xff] }
 0x1c5   : > { %10569 = vst [vmem:[#allocation90_spill] sm:$0xff] %v6787_v28  ;;  %10570 = vst [vmem:[#allocation91_spill] sm:$0xff] %v6790_v15  ;;  %v6817_v58 = vsel %vm1396_vm4, %v6790_v15, %v6340_v52  ;;  %v6822_v51 = vsel %vm1396_vm4, %v6796_v36, %v6353_v0  ;;  %v6827_v10 = vsel %vm1396_vm4, %v6799_v18, %v6365_v34 }
 0x1c6   : > { %10571 = vst [vmem:[#allocation92_spill] sm:$0xff] %v6793_v6  ;;  %10572 = vst [vmem:[#allocation93_spill] sm:$0xff] %v6796_v36  ;;  %v6832_v32 = vsel %vm1396_vm4, %v6802_v47, %v10580_v46  ;;  %v6837_v52 = vsel %vm1402_vm5, %v6784_v12, %v10581_v17 }
 0x1c7   : > { %10573 = vst [vmem:[#allocation94_spill] sm:$0xff] %v6799_v18  ;;  %10574 = vst [vmem:[#allocation95_spill] sm:$0xff] %v6802_v47 }
 0x1c8   : > { %10575 = vst [vmem:[#allocation96_spill] sm:$0xff] %v6807_v27  ;;  %10576 = vst [vmem:[#allocation97_spill] sm:$0xff] %v6812_v3  ;;  %v1106_v3 = vpop.f32.mrb[76].mxu0  ;;  %v10582_v27 = vld [vmem:[#allocation73_spill] sm:$0xff] }
 0x1c9   : > { %10577 = vst [vmem:[#allocation98_spill] sm:$0xff] %v6817_v58  ;;  %10578 = vst [vmem:[#allocation99_spill] sm:$0xff] %v6822_v51  ;;  %v1291_v58 = vpack.c.bf16 %v1246_v5, %v1245_v23  ;;  %v6842_v0 = vsel %vm1402_vm5, %v6796_v36, %v10582_v27  ;;  %v10583_v51 = vld [vmem:[#allocation74_spill] sm:$0xff]  ;;  %v1107_v17 = vadd.f32 %v6741_v19, %v1106_v3  ;;  %v1108_v12 = vpop.f32.mrb[77].mxu0  ;;  %v10587_v23 = vld [vmem:[#allocation76_spill] sm:$0xff] }
 0x1ca   : > { %10579 = vst [vmem:[#allocation100_spill] sm:$0xff] %v6827_v10  ;;  %v6847_v34 = vsel %vm1402_vm5, %v6787_v28, %v10583_v51  ;;  %v10585_v10 = vld [vmem:[#allocation75_spill] sm:$0xff]  ;;  %v6858_v5 = vsel %vm1402_vm5, %v6790_v15, %v10587_v23  ;;  %v10589_v27 = vld [vmem:[#allocation77_spill] sm:$0xff]  ;;  %v6866_v51 = vrot.slane %v6655_v50, 7  ;;  %v6873_v12 = vrot.slane %v6666_v1, 7 }
 0x1cb   : > { %10584 = vst [vmem:[#allocation71_spill] sm:$0xff] %v6847_v34  ;;  %v6852_v46 = vsel %vm1402_vm5, %v6799_v18, %v10585_v10  ;;  %10588 = vst [vmem:[#allocation73_spill] sm:$0xff] %v6858_v5  ;;  %v6863_v36 = vsel %vm1402_vm5, %v6802_v47, %v10589_v27  ;;  %v6868_v28 = vunpack.c.l.b16 %v1291_v58  ;;  %v6870_v10 = vunpack.c.h.b16 %v1291_v58  ;;  %v1109_v18 = vpop.f32.mrb[78].mxu0 }
 0x1cc   : > { %10586 = vst [vmem:[#allocation72_spill] sm:$0xff] %v6852_v46  ;;  %10590 = vst [vmem:[#allocation74_spill] sm:$0xff] %v6863_v36  ;;  %v3184_v3 = vsel %vm1393_vm1, %v6655_v50, %v6550_v43  ;;  %v1110_v23 = vadd.f32 %v6741_v19, %v1109_v18  ;;  %v1111_v15 = vpop.f32.mrb[79].mxu0  ;;  %v3150_v27 = vsel %vm1393_vm1, %v6781_v24, %v6535_v49  ;;  %v1247_v5 = vmax.f32 %v1107_v17, 0.0 }
 0x1cd   : > { %10591 = vst [vmem:[#allocation75_spill] sm:$0xff] %v6866_v51  ;;  %10592 = vst [vmem:[#allocation76_spill] sm:$0xff] %v6868_v28  ;;  %v3224_v58 = vsel %vm1393_vm1, %v6793_v6, %v6545_v42  ;;  %v3258_v47 = vsel %vm1393_vm1, %v6666_v1, %v6559_v25  ;;  %v6889_v36 = vrot.slane %v6868_v28, 5  ;;  %v6892_v43 = vrot.slane %v6868_v28, 6 }
 0x1ce   : > { %10593 = vst [vmem:[#allocation77_spill] sm:$0xff] %v6870_v10  ;;  %10594 = vst [vmem:[#allocation101_spill] sm:$0xff] %v6873_v12  ;;  %v6895_v15 = vrot.slane %v6868_v28, 7  ;;  %v3377_v49 = vsel %vm1399_vm2, %v6781_v24, %v6554_v11  ;;  %v6901_v18 = vrot.slane %v6870_v10, 5  ;;  %v6904_v42 = vrot.slane %v6870_v10, 6 }
 0x1cf   : > { %10595 = vst [vmem:[#allocation102_spill] sm:$0xff] %v6892_v43  ;;  %v6907_v25 = vrot.slane %v6870_v10, 7  ;;  %v1248_v46 = vmax.f32 %v1110_v23, 0.0  ;;  %v6912_v28 = vsel %vm1396_vm4, %v6889_v36, %v6638_v8  ;;  %v6916_v34 = vsel %vm1396_vm4, %v6892_v43, %v2573_v53  ;;  %v1114_v23 = vpop.f32.mrb[80].mxu0 }
 0x1d0   : > { %10596 = vst [vmem:[#allocation103_spill] sm:$0xff] %v6895_v15  ;;  %10597 = vst [vmem:[#allocation104_spill] sm:$0xff] %v6901_v18  ;;  %v6921_v11 = vsel %vm1396_vm4, %v6895_v15, %v6633_v37  ;;  %v6926_v10 = vsel %vm1396_vm4, %v6901_v18, %v6643_v31  ;;  %v6930_v17 = vsel %vm1396_vm4, %v6904_v42, %v2647_v38  ;;  %v1116_v24 = vpop.f32.mrb[81].mxu0 }
 0x1d1   : > { %10598 = vst [vmem:[#allocation105_spill] sm:$0xff] %v6904_v42  ;;  %10599 = vst [vmem:[#allocation106_spill] sm:$0xff] %v6907_v25  ;;  %v6935_v8 = vsel %vm1396_vm4, %v6907_v25, %v6648_v62  ;;  %v6940_v53 = vsel %vm1402_vm5, %v6889_v36, %v6653_v16  ;;  %v1292_v37 = vpack.c.bf16 %v1248_v46, %v1247_v5  ;;  %v10603_v24 = vld [vmem:[#allocation46_spill] sm:$0xff] }
 0x1d2   : > { %v6945_v31 = vsel %vm1402_vm5, %v6901_v18, %v6753_v61  ;;  %v6950_v38 = vsel %vm1402_vm5, %v6892_v43, %v6762_v26  ;;  %v6955_v62 = vsel %vm1402_vm5, %v6904_v42, %v6767_v9  ;;  %v1115_v16 = vadd.f32 %v6741_v19, %v1114_v23  ;;  %v10600_v26 = vld [vmem:[#allocation40_spill] sm:$0xff]  ;;  %v1117_v23 = vpop.f32.mrb[82].mxu0 }
 0x1d3   : > { %v6961_v46 = vsel %vm1402_vm5, %v6895_v15, %v6773_v56  ;;  %v6966_v61 = vsel %vm1402_vm5, %v6907_v25, %v6778_v59  ;;  %v3167_v5 = vsel %vm1393_vm1, %v6866_v51, %v10600_v26  ;;  %v6971_v43 = vunpack.c.l.b16 %v1292_v37  ;;  %v1119_v25 = vpop.f32.mrb[83].mxu0  ;;  %v10604_v15 = vld [vmem:[#allocation47_spill] sm:$0xff] }
 0x1d4   : > { %v6973_v9 = vunpack.c.h.b16 %v1292_v37  ;;  %v3241_v42 = vsel %vm1393_vm1, %v6873_v12, %v10603_v24  ;;  %v3411_v56 = vsel %vm1399_vm2, %v6793_v6, %v6563_v41  ;;  %v1118_v59 = vadd.f32 %v6741_v19, %v1117_v23 }
 0x1d5   : > { %10601 = vst [vmem:[#allocation40_spill] sm:$0xff] %v6971_v43  ;;  %v3386_v26 = vsel %vm1399_vm2, %v6866_v51, %v10604_v15  ;;  %v3420_v37 = vsel %vm1399_vm2, %v6873_v12, %v6573_v33  ;;  %v3395_v18 = vsel %vm1399_vm2, %v6655_v50, %v6578_v2  ;;  %v6992_v24 = vrot.slane %v6971_v43, 5 }
 0x1d6   : > { %10602 = vst [vmem:[#allocation107_spill] sm:$0xff] %v6973_v9  ;;  %v6995_v41 = vrot.slane %v6971_v43, 6  ;;  %v6998_v25 = vrot.slane %v6971_v43, 7  ;;  %v3429_v15 = vsel %vm1399_vm2, %v6666_v1, %v6583_v45  ;;  %v7004_v23 = vrot.slane %v6973_v9, 5 }
 0x1d7   : > { %10605 = vst [vmem:[#allocation46_spill] sm:$0xff] %v6992_v24  ;;  %v7007_v33 = vrot.slane %v6973_v9, 6  ;;  %v7010_v2 = vrot.slane %v6973_v9, 7  ;;  %v1249_v50 = vmax.f32 %v1115_v16, 0.0  ;;  %v1250_v12 = vmax.f32 %v1118_v59, 0.0  ;;  %v1122_v9 = vpop.f32.mrb[84].mxu0 }
 0x1d8   : > { %10606 = vst [vmem:[#allocation47_spill] sm:$0xff] %v6995_v41  ;;  %10607 = vst [vmem:[#allocation108_spill] sm:$0xff] %v6998_v25  ;;  %v7014_v51 = vsel %vm1396_vm4, %v6992_v24, %v3150_v27  ;;  %v7018_v43 = vsel %vm1396_vm4, %v6995_v41, %v3167_v5  ;;  %v7022_v45 = vsel %vm1396_vm4, %v6998_v25, %v3184_v3  ;;  %v1124_v6 = vpop.f32.mrb[85].mxu0 }
 0x1d9   : > { %10608 = vst [vmem:[#allocation109_spill] sm:$0xff] %v7004_v23  ;;  %10609 = vst [vmem:[#allocation110_spill] sm:$0xff] %v7007_v33  ;;  %v7026_v1 = vsel %vm1396_vm4, %v7004_v23, %v3224_v58  ;;  %v7030_v16 = vsel %vm1396_vm4, %v7007_v33, %v3241_v42  ;;  %v7034_v27 = vsel %vm1396_vm4, %v7010_v2, %v3258_v47 }
 0x1da   : > { %10610 = vst [vmem:[#allocation111_spill] sm:$0xff] %v7010_v2  ;;  %v7038_v5 = vsel %vm1402_vm5, %v6992_v24, %v3377_v49  ;;  %v1293_v59 = vpack.c.bf16 %v1250_v12, %v1249_v50  ;;  %v7042_v3 = vsel %vm1402_vm5, %v7004_v23, %v3411_v56  ;;  %v7046_v58 = vsel %vm1402_vm5, %v6995_v41, %v3386_v26  ;;  %v10611_v12 = vld [vmem:[#allocation60_spill] sm:$0xff]  ;;  %v10616_v23 = vld [vmem:[#allocation7_spill] sm:$0xff]  ;;  %v10619_v24 = vld [vmem:[#allocation25_spill] sm:$0xff] }
 0x1db   : > { %v7050_v42 = vsel %vm1402_vm5, %v7007_v33, %v3420_v37  ;;  %v1123_v47 = vadd.f32 %v6741_v19, %v1122_v9  ;;  %v7055_v49 = vsel %vm1402_vm5, %v6998_v25, %v3395_v18  ;;  %v7059_v50 = vsel %vm1402_vm5, %v7010_v2, %v3429_v15  ;;  %v1125_v37 = vpop.f32.mrb[86].mxu0  ;;  %v10614_v33 = vld [vmem:[#allocation21_spill] sm:$0xff]  ;;  %v10615_v9 = vld [vmem:[#allocation48_spill] sm:$0xff] }
 0x1dc   : > { %v7064_v56 = vsel %vm1402_vm5, %v6495_v30, %v10611_v12  ;;  %v1383_v26 = vunpack.c.l.b16 %v1293_v59  ;;  %v7066_v41 = vunpack.c.h.b16 %v1293_v59  ;;  %v3597_v6 = vsel %vm1399_vm2, %v10615_v9, %v10614_v33  ;;  %v10617_v18 = vld [vmem:[#allocation32_spill] sm:$0xff]  ;;  %v1127_v2 = vpop.f32.mrb[87].mxu0  ;;  %v10621_v59 = vld [vmem:[#allocation62_spill] sm:$0xff] }
 0x1dd   : > { %10612 = vst [vmem:[#allocation60_spill] sm:$0xff] %v7064_v56  ;;  %v7074_v25 = vsel %vm1393_vm1, %v10617_v18, %v10616_v23  ;;  %v1126_v15 = vadd.f32 %v6741_v19, %v1125_v37  ;;  %v7080_v30 = vsel %vm1393_vm1, %v6621_v40, %v10619_v24  ;;  %v7085_v12 = vsel %vm1393_vm1, %v6624_v39, %v10621_v59 }
 0x1de   : > { %10613 = vst [vmem:[#allocation112_spill] sm:$0xff] %v7066_v41  ;;  %10618 = vst [vmem:[#allocation21_spill] sm:$0xff] %v7074_v25  ;;  %v7089_v33 = vsel %vm1402_vm5, %v6511_v22, %v3597_v6  ;;  %v1416_v9 = vrot.slane %v1383_v26, 4  ;;  %v1433_v18 = vrot.slane %v1383_v26, 5  ;;  %v1450_v23 = vrot.slane %v1383_v26, 6  ;;  %v10623_v25 = vld [vmem:[#allocation67_spill] sm:$0xff] }
 0x1df   : > { %10620 = vst [vmem:[#allocation48_spill] sm:$0xff] %v7080_v30  ;;  %10622 = vst [vmem:[#allocation25_spill] sm:$0xff] %v7089_v33  ;;  %v7092_v37 = vrot.slane %v10623_v25, 5  ;;  %v1524_v2 = vrot.slane %v7066_v41, 6  ;;  %v1251_v56 = vmax.f32 %v1123_v47, 0.0  ;;  %v1252_v24 = vmax.f32 %v1126_v15, 0.0 }
 0x1e0   : > { %v1507_v30 = vrot.slane %v7066_v41, 5  ;;  %v1490_v40 = vrot.slane %v7066_v41, 4  ;;  %v7099_v59 = vsel %vm1399_vm2, %v1433_v18, %v6681_v55  ;;  %v7103_v22 = vsel %vm1399_vm2, %v1416_v9, %v6686_v13  ;;  %v1130_v41 = vpop.f32.mrb[88].mxu0 }
 0x1e1   : > { %10624 = vst [vmem:[#allocation62_spill] sm:$0xff] %v7092_v37  ;;  %v7107_v25 = vsel %vm1399_vm2, %v1450_v23, %v6691_v60  ;;  %v1294_v6 = vpack.c.bf16 %v1252_v24, %v1251_v56  ;;  %v7115_v15 = vsel %vm1399_vm2, %v1524_v2, %v6696_v21  ;;  %v7119_v55 = vsel %vm1405_vm6, %v1416_v9, %v6701_v57 }
 0x1e2   : > { %v7111_v47 = vsel %vm1399_vm2, %v1507_v30, %v6706_v54  ;;  %10625 = vst [vmem:[#allocation67_spill] sm:$0xff] %v7119_v55  ;;  %v7123_v13 = vsel %vm1399_vm2, %v1490_v40, %v6711_v14  ;;  %v7127_v60 = vsel %vm1405_vm6, %v1490_v40, %v6716_v44  ;;  %v7131_v54 = vsel %vm1405_vm6, %v1433_v18, %v6721_v35  ;;  %v1132_v14 = vpop.f32.mrb[89].mxu0 }
 0x1e3   : > { %10626 = vst [vmem:[#allocation113_spill] sm:$0xff] %v7127_v60  ;;  %10627 = vst [vmem:[#allocation114_spill] sm:$0xff] %v7131_v54  ;;  %v7135_v21 = vsel %vm1405_vm6, %v1507_v30, %v6726_v4  ;;  %v7137_v56 = vunpack.c.l.b16 %v1294_v6  ;;  %v7139_v57 = vunpack.c.h.b16 %v1294_v6  ;;  %v1131_v24 = vadd.f32 %v6741_v19, %v1130_v41  ;;  %v1133_v44 = vpop.f32.mrb[90].mxu0  ;;  %v10634_v14 = vld [vmem:[#allocation55_spill] sm:$0xff]  ;;  %v10639_v60 = vld [vmem:[#allocation97_spill] sm:$0xff] }
 0x1e4   : > { %10628 = vst [vmem:[#allocation115_spill] sm:$0xff] %v7135_v21  ;;  %v7144_v55 = vsel %vm1405_vm6, %v1450_v23, %v6731_v48  ;;  %v7148_v35 = vsel %vm1405_vm6, %v1524_v2, %v6736_v29  ;;  %v7152_v4 = vsel %vm1387_vm0, %v1416_v9, %v6658_v7  ;;  %v7156_v6 = vsel %vm1387_vm0, %v1490_v40, %v6676_v20  ;;  %v1135_v21 = vpop.f32.mrb[91].mxu0 }
 0x1e5   : > { %10629 = vst [vmem:[#allocation116_spill] sm:$0xff] %v7137_v56  ;;  %10630 = vst [vmem:[#allocation117_spill] sm:$0xff] %v7139_v57  ;;  %v7160_v41 = vsel %vm1387_vm0, %v1433_v18, %v6661_v63  ;;  %v7163_v48 = vrot.slane %v10634_v14, 4  ;;  %v1589_v29 = vrot.slane %v7137_v56, 5  ;;  %v7168_v7 = vrot.slane %v1383_v26, 3  ;;  %v10637_v14 = vld [vmem:[#allocation96_spill] sm:$0xff] }
 0x1e6   : > { %10631 = vst [vmem:[#allocation118_spill] sm:$0xff] %v7144_v55  ;;  %10632 = vst [vmem:[#allocation119_spill] sm:$0xff] %v7148_v35  ;;  %v1572_v55 = vrot.slane %v7137_v56, 4  ;;  %v1606_v35 = vrot.slane %v7137_v56, 6  ;;  %v1646_v9 = vrot.slane %v7139_v57, 4  ;;  %v1663_v20 = vrot.slane %v7139_v57, 5 }
 0x1e7   : > { %10633 = vst [vmem:[#allocation120_spill] sm:$0xff] %v7160_v41  ;;  %10635 = vst [vmem:[#allocation55_spill] sm:$0xff] %v7163_v48  ;;  %v1680_v40 = vrot.slane %v7139_v57, 6  ;;  %v1253_v63 = vmax.f32 %v1131_v24, 0.0  ;;  %v1134_v18 = vadd.f32 %v6741_v19, %v1133_v44  ;;  %v7180_v33 = vsel %vm1399_vm2, %v1589_v29, %v10639_v60  ;;  %v10641_v21 = vld [vmem:[#allocation99_spill] sm:$0xff]  ;;  %v10643_v56 = vld [vmem:[#allocation100_spill] sm:$0xff] }
 0x1e8   : > { %10636 = vst [vmem:[#allocation121_spill] sm:$0xff] %v7168_v7  ;;  %v7176_v54 = vsel %vm1399_vm2, %v1572_v55, %v10637_v14  ;;  %10640 = vst [vmem:[#allocation97_spill] sm:$0xff] %v7180_v33  ;;  %v7184_v26 = vsel %vm1399_vm2, %v1646_v9, %v10641_v21  ;;  %v7188_v41 = vsel %vm1399_vm2, %v1663_v20, %v10643_v56  ;;  %v10645_v57 = vld [vmem:[#allocation98_spill] sm:$0xff]  ;;  %v10650_v33 = vld [vmem:[#allocation71_spill] sm:$0xff] }
 0x1e9   : > { %10638 = vst [vmem:[#allocation96_spill] sm:$0xff] %v7176_v54  ;;  %10642 = vst [vmem:[#allocation99_spill] sm:$0xff] %v7184_v26  ;;  %v7192_v24 = vsel %vm1399_vm2, %v1606_v35, %v10645_v57  ;;  %v7196_v44 = vsel %vm1399_vm2, %v1680_v40, %v6832_v32  ;;  %v1254_v14 = vmax.f32 %v1134_v18, 0.0  ;;  %v7200_v60 = vsel %vm1405_vm6, %v1572_v55, %v6837_v52  ;;  %v10652_v57 = vld [vmem:[#allocation72_spill] sm:$0xff]  ;;  %v10654_v32 = vld [vmem:[#allocation73_spill] sm:$0xff] }
 0x1ea   : > { %10644 = vst [vmem:[#allocation100_spill] sm:$0xff] %v7188_v41  ;;  %10646 = vst [vmem:[#allocation98_spill] sm:$0xff] %v7192_v24  ;;  %v7204_v21 = vsel %vm1405_vm6, %v1646_v9, %v6842_v0  ;;  %v7208_v56 = vsel %vm1405_vm6, %v1589_v29, %v10650_v33  ;;  %v1138_v41 = vpop.f32.mrb[92].mxu0  ;;  %v7212_v24 = vsel %vm1405_vm6, %v1663_v20, %v10652_v57  ;;  %v10659_v26 = vld [vmem:[#allocation83_spill] sm:$0xff]  ;;  %v10661_v54 = vld [vmem:[#allocation89_spill] sm:$0xff] }
 0x1eb   : > { %10647 = vst [vmem:[#allocation122_spill] sm:$0xff] %v7196_v44  ;;  %10648 = vst [vmem:[#allocation123_spill] sm:$0xff] %v7200_v60  ;;  %v7216_v18 = vsel %vm1405_vm6, %v1606_v35, %v10654_v32  ;;  %v10656_v44 = vld [vmem:[#allocation74_spill] sm:$0xff]  ;;  %v1139_v33 = vadd.f32 %v6741_v19, %v1138_v41  ;;  %v7229_v57 = vsel %vm1387_vm0, %v1450_v23, %v10659_v26 }
 0x1ec   : > { %10649 = vst [vmem:[#allocation124_spill] sm:$0xff] %v7204_v21  ;;  %10651 = vst [vmem:[#allocation71_spill] sm:$0xff] %v7208_v56  ;;  %v7220_v52 = vsel %vm1405_vm6, %v1680_v40, %v10656_v44  ;;  %v10658_v60 = vld [vmem:[#allocation86_spill] sm:$0xff]  ;;  %v1295_v21 = vpack.c.bf16 %v1254_v14, %v1253_v63  ;;  %v1140_v56 = vpop.f32.mrb[93].mxu0  ;;  %v7237_v44 = vsel %vm1387_vm0, %v1572_v55, %v10661_v54 }
 0x1ed   : > { %10653 = vst [vmem:[#allocation72_spill] sm:$0xff] %v7212_v24  ;;  %10655 = vst [vmem:[#allocation73_spill] sm:$0xff] %v7216_v18  ;;  %v7224_v0 = vsel %vm1387_vm0, %v1507_v30, %v10658_v60  ;;  %v10660_v24 = vld [vmem:[#allocation85_spill] sm:$0xff]  ;;  %v1141_v18 = vpop.f32.mrb[94].mxu0  ;;  %v10663_v63 = vld [vmem:[#allocation90_spill] sm:$0xff]  ;;  %v1397_v54 = vsel %vm1396_vm4, %v7163_v48, %v7085_v12 }
 0x1ee   : > { %10657 = vst [vmem:[#allocation74_spill] sm:$0xff] %v7220_v52  ;;  %v7233_v32 = vsel %vm1387_vm0, %v1524_v2, %v10660_v24  ;;  %v10662_v52 = vld [vmem:[#allocation93_spill] sm:$0xff]  ;;  %v7245_v41 = vsel %vm1387_vm0, %v1589_v29, %v10663_v63  ;;  %v10664_v14 = vld [vmem:[#allocation94_spill] sm:$0xff]  ;;  %v7251_v26 = vunpack.c.l.b16 %v1295_v21  ;;  %v7253_v2 = vunpack.c.h.b16 %v1295_v21  ;;  %v1143_v55 = vpop.f32.mrb[95].mxu0  ;;  %v10668_v29 = vld [vmem:[#allocation95_spill] sm:$0xff] }
 0x1ef   : > { %v7241_v30 = vsel %vm1387_vm0, %v1646_v9, %v10662_v52  ;;  %v7249_v23 = vsel %vm1387_vm0, %v1663_v20, %v10664_v14  ;;  %v1142_v24 = vadd.f32 %v6741_v19, %v1141_v18  ;;  %v10667_v9 = vld [vmem:[#allocation91_spill] sm:$0xff]  ;;  %v7265_v56 = vsel %vm1387_vm0, %v1680_v40, %v10668_v29  ;;  %v10670_v52 = vld [vmem:[#allocation49_spill] sm:$0xff]  ;;  %v10674_v55 = vld [vmem:[#allocation18_spill] sm:$0xff] }
 0x1f0   : > { %10665 = vst [vmem:[#allocation86_spill] sm:$0xff] %v7251_v26  ;;  %10666 = vst [vmem:[#allocation83_spill] sm:$0xff] %v7253_v2  ;;  %v7261_v60 = vsel %vm1387_vm0, %v1606_v35, %v10667_v9  ;;  %v10669_v20 = vld [vmem:[#allocation35_spill] sm:$0xff]  ;;  %v7274_v18 = vsel %vm1399_vm2, %v7168_v7, %v1397_v54  ;;  %v2559_v63 = vrot.slane %v7251_v26, 4  ;;  %v2576_v12 = vrot.slane %v7251_v26, 5  ;;  %v10673_v14 = vld [vmem:[#allocation13_spill] sm:$0xff] }
 0x1f1   : > { %v7270_v21 = vsel %vm1405_vm6, %v10670_v52, %v10669_v20  ;;  %10672 = vst [vmem:[#allocation89_spill] sm:$0xff] %v7274_v18  ;;  %v2593_v35 = vrot.slane %v7251_v26, 6  ;;  %v7282_v40 = vsel %vm1405_vm6, %v10674_v55, %v10673_v14  ;;  %v2633_v9 = vrot.slane %v7253_v2, 4  ;;  %v1146_v55 = vpop.f32.mrb[96].mxu0 }
 0x1f2   : > { %10671 = vst [vmem:[#allocation85_spill] sm:$0xff] %v7270_v21  ;;  %10675 = vst [vmem:[#allocation93_spill] sm:$0xff] %v7282_v40  ;;  %v2650_v29 = vrot.slane %v7253_v2, 5  ;;  %v2667_v20 = vrot.slane %v7253_v2, 6  ;;  %v1255_v52 = vmax.f32 %v1139_v33, 0.0  ;;  %v1256_v54 = vmax.f32 %v1142_v24, 0.0 }
 0x1f3   : > { %v7289_v18 = vsel %vm1399_vm2, %v2559_v63, %v6912_v28  ;;  %v7293_v26 = vsel %vm1399_vm2, %v2576_v12, %v6916_v34  ;;  %v7297_v14 = vsel %vm1399_vm2, %v2593_v35, %v6921_v11  ;;  %v7301_v40 = vsel %vm1399_vm2, %v2633_v9, %v6926_v10  ;;  %v1148_v2 = vpop.f32.mrb[97].mxu0 }
 0x1f4   : > { %v7305_v33 = vsel %vm1399_vm2, %v2650_v29, %v6930_v17  ;;  %v7309_v28 = vsel %vm1399_vm2, %v2667_v20, %v6935_v8  ;;  %v7313_v34 = vsel %vm1405_vm6, %v2559_v63, %v6940_v53  ;;  %v1296_v24 = vpack.c.bf16 %v1256_v54, %v1255_v52  ;;  %v1149_v21 = vpop.f32.mrb[98].mxu0 }
 0x1f5   : > { %10676 = vst [vmem:[#allocation90_spill] sm:$0xff] %v7313_v34  ;;  %v1147_v11 = vadd.f32 %v6741_v19, %v1146_v55  ;;  %v7318_v10 = vsel %vm1405_vm6, %v2633_v9, %v6945_v31  ;;  %v7322_v17 = vsel %vm1405_vm6, %v2576_v12, %v6950_v38  ;;  %v7326_v8 = vsel %vm1405_vm6, %v2650_v29, %v6955_v62  ;;  %v1151_v62 = vpop.f32.mrb[99].mxu0  ;;  %v10684_v55 = vld [vmem:[#allocation37_spill] sm:$0xff] }
 0x1f6   : > { %10677 = vst [vmem:[#allocation94_spill] sm:$0xff] %v7318_v10  ;;  %10678 = vst [vmem:[#allocation91_spill] sm:$0xff] %v7322_v17  ;;  %v7330_v53 = vsel %vm1405_vm6, %v2593_v35, %v6961_v46  ;;  %v7334_v2 = vsel %vm1405_vm6, %v2667_v20, %v6966_v61  ;;  %v7338_v31 = vsel %vm1387_vm0, %v2559_v63, %v6889_v36  ;;  %v7340_v52 = vunpack.c.l.b16 %v1296_v24  ;;  %v10689_v63 = vld [vmem:[#allocation105_spill] sm:$0xff]  ;;  %v10690_v17 = vld [vmem:[#allocation103_spill] sm:$0xff] }
 0x1f7   : > { %10679 = vst [vmem:[#allocation95_spill] sm:$0xff] %v7326_v8  ;;  %10680 = vst [vmem:[#allocation35_spill] sm:$0xff] %v7330_v53  ;;  %v7342_v38 = vunpack.c.h.b16 %v1296_v24  ;;  %v1150_v54 = vadd.f32 %v6741_v19, %v1149_v21  ;;  %v10685_v8 = vld [vmem:[#allocation51_spill] sm:$0xff]  ;;  %v10687_v53 = vld [vmem:[#allocation104_spill] sm:$0xff]  ;;  %v7360_v24 = vsel %vm1387_vm0, %v2650_v29, %v10689_v63  ;;  %v7364_v21 = vsel %vm1387_vm0, %v2593_v35, %v10690_v17 }
 0x1f8   : > { %10681 = vst [vmem:[#allocation49_spill] sm:$0xff] %v7334_v2  ;;  %10682 = vst [vmem:[#allocation13_spill] sm:$0xff] %v7340_v52  ;;  %v7348_v46 = vsel %vm1405_vm6, %v10685_v8, %v10684_v55  ;;  %v7352_v61 = vsel %vm1387_vm0, %v2633_v9, %v10687_v53  ;;  %v10688_v2 = vld [vmem:[#allocation102_spill] sm:$0xff]  ;;  %v3153_v62 = vrot.slane %v7340_v52, 4  ;;  %v7368_v8 = vrot.slane %v7340_v52, 5  ;;  %v10691_v53 = vld [vmem:[#allocation39_spill] sm:$0xff] }
 0x1f9   : > { %10683 = vst [vmem:[#allocation18_spill] sm:$0xff] %v7342_v38  ;;  %10686 = vst [vmem:[#allocation37_spill] sm:$0xff] %v7348_v46  ;;  %v7356_v36 = vsel %vm1387_vm0, %v2576_v12, %v10688_v2  ;;  %v7371_v9 = vrot.slane %v7340_v52, 6  ;;  %v10692_v55 = vld [vmem:[#allocation54_spill] sm:$0xff]  ;;  %v3227_v29 = vrot.slane %v7342_v38, 4  ;;  %v7380_v2 = vrot.slane %v7342_v38, 5 }
 0x1fa   : > { %v7376_v12 = vsel %vm1405_vm6, %v10692_v55, %v10691_v53  ;;  %v7383_v35 = vrot.slane %v7342_v38, 6  ;;  %v1257_v17 = vmax.f32 %v1147_v11, 0.0  ;;  %v1258_v63 = vmax.f32 %v1150_v54, 0.0  ;;  %v10694_v46 = vld [vmem:[#allocation106_spill] sm:$0xff]  ;;  %v1154_v55 = vpop.f32.mrb[100].mxu0  ;;  %v5144_v38 = vld [vmem:[%s10133_s3 + $0x40] sm:$0xff]  }
 0x1fb   : > { %10693 = vst [vmem:[#allocation51_spill] sm:$0xff] %v7376_v12  ;;  %v7387_v10 = vsel %vm1387_vm0, %v2667_v20, %v10694_v46  ;;  %v7391_v52 = vsel %vm1399_vm2, %v3153_v62, %v7014_v51  ;;  %v7396_v53 = vsel %vm1399_vm2, %v7368_v8, %v7018_v43  ;;  %v7403_v11 = vsel %vm1399_vm2, %v3227_v29, %v7026_v1  ;;  %v1156_v1 = vpop.f32.mrb[101].mxu0 }
 0x1fc   : > { %v7408_v20 = vsel %vm1399_vm2, %v7380_v2, %v7030_v16  ;;  %v7413_v51 = vsel %vm1399_vm2, %v7371_v9, %v7022_v45  ;;  %v7418_v43 = vsel %vm1399_vm2, %v7383_v35, %v7034_v27  ;;  %v1297_v54 = vpack.c.bf16 %v1258_v63, %v1257_v17  ;;  %v1157_v34 = vpop.f32.mrb[102].mxu0  ;;  %4626 = vmatprep.subr.bf16.mxu1 %v5144_v38  ;;  %v10699_v45 = vld [vmem:[#allocation14_spill] sm:$0xff]  ;;  %v10702_v27 = vld [vmem:[#allocation15_spill] sm:$0xff]  ;;  %v10703_v17 = vld [vmem:[#allocation45_spill] sm:$0xff] }
 0x1fd   : > { %10695 = vst [vmem:[#allocation104_spill] sm:$0xff] %v7408_v20  ;;  %10696 = vst [vmem:[#allocation102_spill] sm:$0xff] %v7413_v51  ;;  %v1155_v46 = vadd.f32 %v6741_v19, %v1154_v55  ;;  %v7423_v12 = vsel %vm1405_vm6, %v3153_v62, %v7038_v5  ;;  %v7427_v16 = vsel %vm1405_vm6, %v3227_v29, %v7042_v3  ;;  %v10700_v51 = vld [vmem:[#allocation44_spill] sm:$0xff] }
 0x1fe   : > { %10697 = vst [vmem:[#allocation105_spill] sm:$0xff] %v7423_v12  ;;  %10698 = vst [vmem:[#allocation103_spill] sm:$0xff] %v7427_v16  ;;  %v7432_v20 = vsel %vm1405_vm6, %v10700_v51, %v10699_v45  ;;  %v7437_v63 = vsel %vm1405_vm6, %v10703_v17, %v10702_v27  ;;  %v7442_v5 = vsel %vm1405_vm6, %v7368_v8, %v7046_v58  ;;  %v7449_v38 = vunpack.c.l.b16 %v1297_v54  ;;  %v1159_v45 = vpop.f32.mrb[103].mxu0  ;;  %v10709_v51 = vld [vmem:[#allocation41_spill] sm:$0xff] }
 0x1ff   : > { %10701 = vst [vmem:[#allocation39_spill] sm:$0xff] %v7432_v20  ;;  %10704 = vst [vmem:[#allocation54_spill] sm:$0xff] %v7437_v63  ;;  %v7447_v3 = vsel %vm1405_vm6, %v7380_v2, %v7050_v42  ;;  %v7451_v55 = vunpack.c.h.b16 %v1297_v54  ;;  %v1158_v1 = vadd.f32 %v6741_v19, %v1157_v34  ;;  %v7457_v27 = vsel %vm1393_vm1, %v7092_v37, %v10709_v51  ;;  %v5145_v58 = vld [vmem:[%s10133_s3] sm:$0xff]   ;;  %v5146_v42 = vld [vmem:[%s10133_s3 + $0x48] sm:$0xff]  }
 0x200   : > { %10705 = vst [vmem:[#allocation106_spill] sm:$0xff] %v7442_v5  ;;  %10706 = vst [vmem:[#allocation14_spill] sm:$0xff] %v7447_v3  ;;  %v7468_v54 = vsel %vm1405_vm6, %v7371_v9, %v7055_v49  ;;  %v7473_v34 = vsel %vm1405_vm6, %v7383_v35, %v7059_v50  ;;  %v10712_v51 = vld [vmem:[#allocation46_spill] sm:$0xff]  ;;  %v10713_v17 = vld [vmem:[#allocation109_spill] sm:$0xff]  ;;  %v1259_v5 = vmax.f32 %v1155_v46, 0.0  ;;  %4627 = vmatpush3.bf16.msra.mxu1 %v5145_v58 }
 0x201   : > { %10707 = vst [vmem:[#allocation15_spill] sm:$0xff] %v7449_v38  ;;  %10708 = vst [vmem:[#allocation125_spill] sm:$0xff] %v7451_v55  ;;  %v7477_v45 = vsel %vm1387_vm0, %v3153_v62, %v10712_v51  ;;  %v7481_v3 = vsel %vm1387_vm0, %v3227_v29, %v10713_v17  ;;  %v1260_v16 = vmax.f32 %v1158_v1, 0.0  ;;  %v7484_v12 = vrot.slane %v7451_v55, 4  ;;  %v10715_v49 = vld [vmem:[#allocation42_spill] sm:$0xff]  ;;  %4628 = vmatprep.subr.bf16.mxu1 %v5146_v42 }
 0x202   : > { %10710 = vst [vmem:[#allocation41_spill] sm:$0xff] %v7468_v54  ;;  %10711 = vst [vmem:[#allocation126_spill] sm:$0xff] %v7473_v34  ;;  %v7489_v54 = vsel %vm1399_vm2, %v6624_v39, %v10715_v49  ;;  %v7492_v50 = vrot.slane %v7451_v55, 3  ;;  %v7495_v62 = vrot.slane %v7449_v38, 4  ;;  %v7498_v51 = vrot.slane %v7449_v38, 3  ;;  %v1162_v34 = vpop.f32.mrb[104].mxu0 }
 0x203   : > { %10714 = vst [vmem:[#allocation46_spill] sm:$0xff] %v7484_v12  ;;  %v7501_v29 = vrot.slane %v7449_v38, 5  ;;  %v1298_v46 = vpack.c.bf16 %v1260_v16, %v1259_v5  ;;  %v7506_v17 = vsel %vm1402_vm5, %v7484_v12, %v7111_v47  ;;  %v7509_v1 = vrot.slane %v7451_v55, 5  ;;  %v5148_v5 = vld [vmem:[%s10133_s3 + $0x50] sm:$0xff]   ;;  %v1164_v39 = vpop.f32.mrb[105].mxu0 }
 0x204   : > { %v7514_v49 = vsel %vm1390_vm3, %v7484_v12, %v7224_v0  ;;  %v7519_v58 = vsel %vm1402_vm5, %v7492_v50, %v7123_v13  ;;  %v7524_v47 = vsel %vm1402_vm5, %v7495_v62, %v7099_v59  ;;  %v7529_v16 = vsel %vm1402_vm5, %v7498_v51, %v7103_v22  ;;  %v5147_v13 = vld [vmem:[%s10133_s3 + $0x8] sm:$0xff]   ;;  %v1165_v63 = vpop.f32.mrb[106].mxu0  ;;  %v10730_v12 = vld [vmem:[#allocation92_spill] sm:$0xff] }
 0x205   : > { %10716 = vst [vmem:[#allocation109_spill] sm:$0xff] %v7501_v29  ;;  %10717 = vst [vmem:[#allocation42_spill] sm:$0xff] %v7509_v1  ;;  %v7534_v0 = vsel %vm1402_vm5, %v7501_v29, %v7107_v25  ;;  %v7542_v59 = vunpack.c.l.b16 %v1298_v46  ;;  %v7544_v42 = vunpack.c.h.b16 %v1298_v46  ;;  %v1163_v22 = vadd.f32 %v6741_v19, %v1162_v34  ;;  %v10723_v46 = vld [vmem:[#allocation120_spill] sm:$0xff]  ;;  %4629 = vmatpush3.bf16.msra.mxu1 %v5147_v13  ;;  %v1167_v38 = vpop.f32.mrb[107].mxu0 }
 0x206   : > { %10718 = vst [vmem:[#allocation127_spill] sm:$0xff] %v7514_v49  ;;  %v7550_v25 = vsel %vm1402_vm5, %v7509_v1, %v7115_v15  ;;  %v7555_v20 = vsel %vm1390_vm3, %v7498_v51, %v7152_v4  ;;  %v7560_v55 = vsel %vm1390_vm3, %v7492_v50, %v7156_v6  ;;  %v7565_v39 = vsel %vm1390_vm3, %v7495_v62, %v10723_v46  ;;  %v10726_v49 = vld [vmem:[#allocation50_spill] sm:$0xff] }
 0x207   : > { %10719 = vst [vmem:[#allocation128_spill] sm:$0xff] %v7542_v59  ;;  %10720 = vst [vmem:[#allocation129_spill] sm:$0xff] %v7544_v42  ;;  %v7570_v15 = vsel %vm1390_vm3, %v7501_v29, %v7229_v57  ;;  %v1261_v34 = vmax.f32 %v1163_v22, 0.0  ;;  %v1166_v4 = vadd.f32 %v6741_v19, %v1165_v63  ;;  %4630 = vmatprep.subr.bf16.mxu1 %v5148_v5  ;;  %v7587_v57 = vrot.slane %v7544_v42, 3  ;;  %v10738_v22 = vld [vmem:[#allocation96_spill] sm:$0xff]  ;;  %v10743_v29 = vld [vmem:[#allocation122_spill] sm:$0xff] }
 0x208   : > { %10721 = vst [vmem:[#allocation130_spill] sm:$0xff] %v7555_v20  ;;  %10722 = vst [vmem:[#allocation131_spill] sm:$0xff] %v7560_v55  ;;  %v10727_v20 = vld [vmem:[#allocation88_spill] sm:$0xff]  ;;  %v7590_v63 = vrot.slane %v7542_v59, 4  ;;  %v7593_v38 = vrot.slane %v7544_v42, 4  ;;  %v7605_v13 = vrot.slane %v7544_v42, 5  ;;  %v7610_v5 = vsel %vm1390_vm3, %v7509_v1, %v7233_v32 }
 0x209   : > { %10724 = vst [vmem:[#allocation120_spill] sm:$0xff] %v7565_v39  ;;  %10725 = vst [vmem:[#allocation132_spill] sm:$0xff] %v7570_v15  ;;  %v7576_v6 = vsel %vm1405_vm6, %v10727_v20, %v10726_v49  ;;  %v10729_v55 = vld [vmem:[#allocation16_spill] sm:$0xff]  ;;  %v7584_v39 = vrot.slane %v7542_v59, 3  ;;  %v5149_v20 = vld [vmem:[%s10133_s3 + $0x10] sm:$0xff]   ;;  %v7602_v49 = vrot.slane %v7542_v59, 5 }
 0x20a   : > { %10728 = vst [vmem:[#allocation50_spill] sm:$0xff] %v7576_v6  ;;  %v7581_v46 = vsel %vm1405_vm6, %v10730_v12, %v10729_v55  ;;  %10732 = vst [vmem:[#allocation16_spill] sm:$0xff] %v7587_v57  ;;  %v5150_v12 = vld [vmem:[%s10133_s3 + $0x58] sm:$0xff]   ;;  %v1262_v55 = vmax.f32 %v1166_v4, 0.0  ;;  %v10739_v6 = vld [vmem:[#allocation99_spill] sm:$0xff]  ;;  %4631 = vmatpush3.bf16.msra.mxu1 %v5149_v20 }
 0x20b   : > { %10731 = vst [vmem:[#allocation88_spill] sm:$0xff] %v7581_v46  ;;  %10733 = vst [vmem:[#allocation92_spill] sm:$0xff] %v7590_v63  ;;  %v7615_v46 = vsel %vm1402_vm5, %v7584_v39, %v10738_v22  ;;  %v7620_v4 = vsel %vm1402_vm5, %v7587_v57, %v10739_v6  ;;  %v10740_v59 = vld [vmem:[#allocation97_spill] sm:$0xff]  ;;  %v10741_v15 = vld [vmem:[#allocation100_spill] sm:$0xff]  ;;  %v7640_v6 = vsel %vm1402_vm5, %v7605_v13, %v10743_v29  ;;  %4632 = vmatprep.subr.bf16.mxu1 %v5150_v12 }
 0x20c   : > { %10734 = vst [vmem:[#allocation133_spill] sm:$0xff] %v7593_v38  ;;  %10735 = vst [vmem:[#allocation134_spill] sm:$0xff] %v7602_v49  ;;  %v7625_v42 = vsel %vm1402_vm5, %v7590_v63, %v10740_v59  ;;  %v7630_v32 = vsel %vm1402_vm5, %v7593_v38, %v10741_v15  ;;  %v10742_v1 = vld [vmem:[#allocation98_spill] sm:$0xff]  ;;  %v7645_v59 = vsel %vm1390_vm3, %v7584_v39, %v7237_v44  ;;  %v1170_v15 = vpop.f32.mrb[108].mxu0  ;;  %v5152_v20 = vld [vmem:[%s10133_s3 + $0x60] sm:$0xff]  }
 0x20d   : > { %10736 = vst [vmem:[#allocation135_spill] sm:$0xff] %v7605_v13  ;;  %10737 = vst [vmem:[#allocation136_spill] sm:$0xff] %v7610_v5  ;;  %v1299_v5 = vpack.c.bf16 %v1262_v55, %v1261_v34  ;;  %v7635_v22 = vsel %vm1402_vm5, %v7602_v49, %v10742_v1  ;;  %v7650_v34 = vsel %vm1390_vm3, %v7587_v57, %v7241_v30  ;;  %v5151_v30 = vld [vmem:[%s10133_s3 + $0x18] sm:$0xff]   ;;  %v1172_v55 = vpop.f32.mrb[109].mxu0  ;;  %v10761_v57 = vld [vmem:[#allocation82_spill] sm:$0xff] }
 0x20e   : > { %10744 = vst [vmem:[#allocation96_spill] sm:$0xff] %v7645_v59  ;;  %10745 = vst [vmem:[#allocation99_spill] sm:$0xff] %v7650_v34  ;;  %v7655_v1 = vsel %vm1390_vm3, %v7590_v63, %v7245_v41  ;;  %v7660_v29 = vsel %vm1390_vm3, %v7593_v38, %v7249_v23  ;;  %v7665_v44 = vsel %vm1390_vm3, %v7602_v49, %v7261_v60  ;;  %4633 = vmatpush3.bf16.msra.mxu1 %v5151_v30  ;;  %v10755_v59 = vld [vmem:[#allocation17_spill] sm:$0xff]  ;;  %v10758_v38 = vld [vmem:[#allocation20_spill] sm:$0xff] }
 0x20f   : > { %10746 = vst [vmem:[#allocation97_spill] sm:$0xff] %v7655_v1  ;;  %10747 = vst [vmem:[#allocation100_spill] sm:$0xff] %v7660_v29  ;;  %v7673_v41 = vunpack.c.l.b16 %v1299_v5  ;;  %v7675_v12 = vunpack.c.h.b16 %v1299_v5  ;;  %v1171_v23 = vadd.f32 %v6741_v19, %v1170_v15  ;;  %v7681_v60 = vsel %vm1390_vm3, %v7605_v13, %v7265_v56  ;;  %v10752_v29 = vld [vmem:[#allocation19_spill] sm:$0xff]  ;;  %v10756_v49 = vld [vmem:[#allocation101_spill] sm:$0xff]  ;;  %4634 = vmatprep.subr.bf16.mxu1 %v5152_v20 }
 0x210   : > { %10748 = vst [vmem:[#allocation98_spill] sm:$0xff] %v7665_v44  ;;  %10751 = vst [vmem:[#allocation138_spill] sm:$0xff] %v7681_v60  ;;  %v1173_v44 = vpop.f32.mrb[110].mxu0  ;;  %v10753_v1 = vld [vmem:[#allocation75_spill] sm:$0xff]  ;;  %v7691_v5 = vsel %vm1405_vm6, %v10756_v49, %v10755_v59  ;;  %v10759_v15 = vld [vmem:[#allocation52_spill] sm:$0xff]  ;;  %v2007_v49 = vsel %vm1402_vm5, %v7163_v48, %v7489_v54 }
 0x211   : > { %10749 = vst [vmem:[#allocation122_spill] sm:$0xff] %v7673_v41  ;;  %10750 = vst [vmem:[#allocation137_spill] sm:$0xff] %v7675_v12  ;;  %v7686_v34 = vsel %vm1405_vm6, %v10753_v1, %v10752_v29  ;;  %v2040_v55 = vsel %vm1399_vm2, %v10759_v15, %v10758_v38  ;;  %v10760_v63 = vld [vmem:[#allocation60_spill] sm:$0xff]  ;;  %v10763_v30 = vld [vmem:[#allocation59_spill] sm:$0xff]  ;;  %v1263_v13 = vmax.f32 %v1171_v23, 0.0  ;;  %v1174_v1 = vadd.f32 %v6741_v19, %v1173_v44  ;;  %v1175_v29 = vpop.f32.mrb[111].mxu0 }
 0x212   : > { %10754 = vst [vmem:[#allocation19_spill] sm:$0xff] %v7686_v34  ;;  %10757 = vst [vmem:[#allocation75_spill] sm:$0xff] %v7691_v5  ;;  %v7699_v56 = vsel %vm1405_vm6, %v10761_v57, %v10760_v63  ;;  %v7702_v60 = vrot.slane %v10763_v30, 4  ;;  %v7709_v59 = vrot.slane %v7673_v41, 3  ;;  %v7712_v38 = vrot.slane %v7675_v12, 3  ;;  %v5153_v44 = vld [vmem:[%s10133_s3 + $0x20] sm:$0xff]  }
 0x213   : > { %10762 = vst [vmem:[#allocation17_spill] sm:$0xff] %v7699_v56  ;;  %v7715_v63 = vrot.slane %v7673_v41, 4  ;;  %v7718_v30 = vrot.slane %v7675_v12, 4  ;;  %v5154_v54 = vld [vmem:[%s10133_s3 + $0x68] sm:$0xff]   ;;  %v1264_v20 = vmax.f32 %v1174_v1, 0.0  ;;  %v7727_v23 = vrot.slane %v7673_v41, 5  ;;  %4635 = vmatpush3.bf16.msra.mxu1 %v5153_v44 }
 0x214   : > { %10764 = vst [vmem:[#allocation101_spill] sm:$0xff] %v7702_v60  ;;  %v7730_v29 = vrot.slane %v7675_v12, 5  ;;  %v10765_v57 = vld [vmem:[#allocation47_spill] sm:$0xff]  ;;  %v7738_v56 = vsel %vm1402_vm5, %v7709_v59, %v7289_v18  ;;  %v7743_v5 = vsel %vm1402_vm5, %v7712_v38, %v7301_v40  ;;  %4636 = vmatprep.subr.bf16.mxu1 %v5154_v54  ;;  %v7808_v34 = vsel %vm1405_vm6, %v7168_v7, %v2007_v49  ;;  %v10775_v48 = vld [vmem:[#allocation84_spill] sm:$0xff] }
 0x215   : > { %v3557_v15 = vsel %vm1387_vm0, %v7368_v8, %v10765_v57  ;;  %v7748_v1 = vsel %vm1402_vm5, %v7715_v63, %v7293_v26  ;;  %v7753_v12 = vsel %vm1402_vm5, %v7718_v30, %v7305_v33  ;;  %v1300_v8 = vpack.c.bf16 %v1264_v20, %v1263_v13  ;;  %v1178_v33 = vpop.f32.mrb[112].mxu0  ;;  %v5156_v49 = vld [vmem:[%s10133_s3 + $0x70] sm:$0xff]   ;;  %v10802_v7 = vld [vmem:[#allocation28_spill] sm:$0xff] }
 0x216   : > { %v7758_v18 = vsel %vm1402_vm5, %v7727_v23, %v7297_v14  ;;  %v7763_v40 = vsel %vm1402_vm5, %v7730_v29, %v7309_v28  ;;  %v7768_v26 = vsel %vm1390_vm3, %v7709_v59, %v7338_v31  ;;  %v7773_v57 = vsel %vm1390_vm3, %v7712_v38, %v7352_v61  ;;  %v5155_v61 = vld [vmem:[%s10133_s3 + $0x28] sm:$0xff]   ;;  %v1180_v54 = vpop.f32.mrb[113].mxu0 }
 0x217   : > { %v7778_v14 = vsel %vm1390_vm3, %v7715_v63, %v7356_v36  ;;  %v7783_v28 = vsel %vm1390_vm3, %v7718_v30, %v7360_v24  ;;  %v7788_v31 = vsel %vm1390_vm3, %v7727_v23, %v7364_v21  ;;  %v7793_v13 = vunpack.c.l.b16 %v1300_v8  ;;  %v1181_v20 = vpop.f32.mrb[114].mxu0  ;;  %4637 = vmatpush3.bf16.msra.mxu1 %v5155_v61  ;;  %v10772_v21 = vld [vmem:[#allocation110_spill] sm:$0xff]  ;;  %v10777_v54 = vld [vmem:[#allocation21_spill] sm:$0xff] }
 0x218   : > { %10766 = vst [vmem:[#allocation20_spill] sm:$0xff] %v7778_v14  ;;  %10767 = vst [vmem:[#allocation60_spill] sm:$0xff] %v7783_v28  ;;  %v7795_v44 = vunpack.c.h.b16 %v1300_v8  ;;  %v1179_v36 = vadd.f32 %v6741_v19, %v1178_v33  ;;  %v7801_v24 = vsel %vm1390_vm3, %v7730_v29, %v7387_v10  ;;  %v3591_v41 = vsel %vm1387_vm0, %v7380_v2, %v10772_v21  ;;  %v10774_v8 = vld [vmem:[#allocation25_spill] sm:$0xff]  ;;  %v1183_v28 = vpop.f32.mrb[115].mxu0  ;;  %v10779_v14 = vld [vmem:[#allocation48_spill] sm:$0xff] }
 0x219   : > { %10768 = vst [vmem:[#allocation59_spill] sm:$0xff] %v7788_v31  ;;  %10769 = vst [vmem:[#allocation47_spill] sm:$0xff] %v7793_v13  ;;  %v7813_v33 = vsel %vm1405_vm6, %v10775_v48, %v10774_v8  ;;  %v10778_v31 = vld [vmem:[#allocation38_spill] sm:$0xff]  ;;  %v1182_v61 = vadd.f32 %v6741_v19, %v1181_v20  ;;  %v7822_v2 = vsel %vm1396_vm4, %v7702_v60, %v10779_v14  ;;  %v7832_v8 = vrot.slane %v7793_v13, 3  ;;  %v5157_v20 = vld [vmem:[%s10133_s3 + $0x30] sm:$0xff]  }
 0x21a   : > { %10770 = vst [vmem:[#allocation139_spill] sm:$0xff] %v7795_v44  ;;  %10771 = vst [vmem:[#allocation140_spill] sm:$0xff] %v7801_v24  ;;  %v2073_v10 = vsel %vm1396_vm4, %v10778_v31, %v10777_v54  ;;  %v1265_v24 = vmax.f32 %v1179_v36, 0.0  ;;  %v7829_v21 = vsel %vm1402_vm5, %v7702_v60, %v2040_v55  ;;  %v7835_v36 = vrot.slane %v7795_v44, 3  ;;  %4638 = vmatprep.subr.bf16.mxu1 %v5156_v49  ;;  %v10787_v31 = vld [vmem:[#allocation108_spill] sm:$0xff] }
 0x21b   : > { %10773 = vst [vmem:[#allocation110_spill] sm:$0xff] %v7808_v34  ;;  %10776 = vst [vmem:[#allocation25_spill] sm:$0xff] %v7813_v33  ;;  %v7838_v28 = vrot.slane %v7793_v13, 4  ;;  %v7841_v14 = vrot.slane %v7795_v44, 4  ;;  %v1266_v54 = vmax.f32 %v1182_v61, 0.0  ;;  %v7847_v55 = vrot.slane %v7793_v13, 5  ;;  %4639 = vmatpush3.bf16.msra.mxu1 %v5157_v20 }
 0x21c   : > { %10780 = vst [vmem:[#allocation21_spill] sm:$0xff] %v7829_v21  ;;  %10781 = vst [vmem:[#allocation48_spill] sm:$0xff] %v7832_v8  ;;  %v7850_v48 = vrot.slane %v7795_v44, 5  ;;  %v3566_v60 = vsel %vm1387_vm0, %v7371_v9, %v10787_v31  ;;  %v7858_v33 = vsel %vm1402_vm5, %v7832_v8, %v7391_v52  ;;  %v7863_v61 = vsel %vm1402_vm5, %v7835_v36, %v7403_v11  ;;  %v10791_v44 = vld [vmem:[#allocation104_spill] sm:$0xff]  ;;  %v10793_v31 = vld [vmem:[#allocation102_spill] sm:$0xff] }
 0x21d   : > { %10782 = vst [vmem:[#allocation141_spill] sm:$0xff] %v7835_v36  ;;  %10783 = vst [vmem:[#allocation142_spill] sm:$0xff] %v7838_v28  ;;  %v7868_v49 = vsel %vm1402_vm5, %v7838_v28, %v7396_v53  ;;  %v7873_v13 = vsel %vm1402_vm5, %v7841_v14, %v10791_v44  ;;  %v1301_v9 = vpack.c.bf16 %v1266_v54, %v1265_v24  ;;  %v5158_v53 = vld [vmem:[%s10133_s3 + $0x78] sm:$0xff]   ;;  %v1186_v24 = vpop.f32.mrb[116].mxu0  ;;  %v10801_v34 = vld [vmem:[#allocation111_spill] sm:$0xff] }
 0x21e   : > { %10784 = vst [vmem:[#allocation143_spill] sm:$0xff] %v7841_v14  ;;  %10785 = vst [vmem:[#allocation144_spill] sm:$0xff] %v7847_v55  ;;  %v7878_v52 = vsel %vm1402_vm5, %v7847_v55, %v10793_v31  ;;  %v7883_v11 = vsel %vm1402_vm5, %v7850_v48, %v7418_v43  ;;  %v7891_v44 = vsel %vm1390_vm3, %v7832_v8, %v7477_v45  ;;  %v5159_v20 = vld [vmem:[%s10133_s3 + $0x38] sm:$0xff]   ;;  %4640 = vmatprep.subr.bf16.mxu1 %v5158_v53 }
 0x21f   : > { %10786 = vst [vmem:[#allocation145_spill] sm:$0xff] %v7850_v48  ;;  %10788 = vst [vmem:[#allocation108_spill] sm:$0xff] %v7858_v33  ;;  %v7899_v54 = vsel %vm1390_vm3, %v7835_v36, %v7481_v3  ;;  %v7903_v43 = vsel %vm1390_vm3, %v7838_v28, %v3557_v15  ;;  %v7907_v31 = vsel %vm1390_vm3, %v7841_v14, %v3591_v41  ;;  %v1188_v3 = vpop.f32.mrb[117].mxu0  ;;  %4641 = vmatpush3.bf16.msra.mxu1 %v5159_v20 }
 0x220   : > { %10789 = vst [vmem:[#allocation146_spill] sm:$0xff] %v7863_v61  ;;  %10790 = vst [vmem:[#allocation147_spill] sm:$0xff] %v7868_v49  ;;  %v7911_v45 = vsel %vm1390_vm3, %v7847_v55, %v3566_v60  ;;  %v7915_v49 = vunpack.c.h.b16 %v1301_v9  ;;  %v1187_v33 = vadd.f32 %v6741_v19, %v1186_v24  ;;  %v3600_v15 = vsel %vm1387_vm0, %v7383_v35, %v10801_v34  ;;  %v1189_v41 = vpop.f32.mrb[118].mxu0  ;;  %v7927_v60 = vld [vmem:[%s10133_s3 + $0xc0] sm:$0xff]   ;;  %v10806_v24 = vld [vmem:[#allocation6_spill] sm:$0xff] }
 0x221   : > { %10792 = vst [vmem:[#allocation104_spill] sm:$0xff] %v7873_v13  ;;  %10794 = vst [vmem:[#allocation102_spill] sm:$0xff] %v7878_v52  ;;  %v7913_v52 = vunpack.c.l.b16 %v1301_v9  ;;  %v7931_v9 = vsel %vm1390_vm3, %v7850_v48, %v3600_v15  ;;  %v7935_v53 = vsel %vm1399_vm2, %v7092_v37, %v2073_v10  ;;  %v10807_v35 = vld [vmem:[#allocation22_spill] sm:$0xff]  ;;  %v1190_v20 = vadd.f32 %v6741_v19, %v1189_v41  ;;  %v1191_v3 = vpop.f32.mrb[119].mxu0  ;;  %v10817_v48 = vld [vmem:[#allocation113_spill] sm:$0xff] }
 0x222   : > { %10795 = vst [vmem:[#allocation148_spill] sm:$0xff] %v7883_v11  ;;  %10796 = vst [vmem:[#allocation149_spill] sm:$0xff] %v7891_v44  ;;  %v1267_v34 = vmax.f32 %v1187_v33, 0.0  ;;  %v7959_v33 = vrot.slane %v7915_v49, 4  ;;  %4648 = vmatprep.subr.bf16.mxu1 %v7927_v60  ;;  %4824 = vmatprep.subr.bf16.mxu0 %v7927_v60  ;;  %v10828_v11 = vld [vmem:[#allocation42_spill] sm:$0xff] }
 0x223   : > { %10797 = vst [vmem:[#allocation150_spill] sm:$0xff] %v7899_v54  ;;  %10798 = vst [vmem:[#allocation151_spill] sm:$0xff] %v7903_v43  ;;  %v7922_v43 = vrot.slane %v10802_v7, 4  ;;  %v7940_v7 = vsel %vm1399_vm2, %v10807_v35, %v10806_v24  ;;  %v7950_v15 = vrot.slane %v7913_v52, 3  ;;  %v7953_v10 = vrot.slane %v7913_v52, 2 }
 0x224   : > { %10799 = vst [vmem:[#allocation152_spill] sm:$0xff] %v7907_v31  ;;  %10800 = vst [vmem:[#allocation153_spill] sm:$0xff] %v7911_v45  ;;  %v7944_v45 = vrot.slane %v7915_v49, 3  ;;  %v7947_v31 = vrot.slane %v7915_v49, 2  ;;  %v7956_v37 = vrot.slane %v7913_v52, 4  ;;  %v1268_v41 = vmax.f32 %v1190_v20, 0.0 }
 0x225   : > { %10803 = vst [vmem:[#allocation111_spill] sm:$0xff] %v7922_v43  ;;  %10804 = vst [vmem:[#allocation28_spill] sm:$0xff] %v7931_v9  ;;  %v1438_v54 = vsel %vm1405_vm6, %v7950_v15, %v7524_v47  ;;  %v1421_v20 = vsel %vm1405_vm6, %v7953_v10, %v7529_v16  ;;  %v10811_v47 = vld [vmem:[#allocation26_spill] sm:$0xff]  ;;  %v1194_v16 = vpop.f32.mrb[120].mxu0  ;;  %v8024_v14 = vsel %vm1387_vm0, %v7950_v15, %v7495_v62 }
 0x226   : > { %10805 = vst [vmem:[#allocation154_spill] sm:$0xff] %v7935_v53  ;;  %10808 = vst [vmem:[#allocation6_spill] sm:$0xff] %v7940_v7  ;;  %v1512_v24 = vsel %vm1405_vm6, %v7944_v45, %v7506_v17  ;;  %v1495_v35 = vsel %vm1405_vm6, %v7947_v31, %v7519_v58  ;;  %v7972_v3 = vsel %vm1387_vm0, %v7947_v31, %v7492_v50  ;;  %v7986_v50 = vld [vmem:[%s10133_s3 + $0x80] sm:$0xff]   ;;  %v8042_v62 = vld [vmem:[%s10133_s3 + $0x88] sm:$0xff]  }
 0x227   : > { %v1513_v9 = vpack.c.b16 %v1512_v24, %v1512_v24  ;;  %v1496_v21 = vpack.c.b16 %v1495_v35, %v1495_v35  ;;  %v1302_v17 = vpack.c.bf16 %v1268_v41, %v1267_v34  ;;  %v1439_v44 = vpack.c.b16 %v1438_v54, %v1438_v54  ;;  %10809 = vst [vmem:[#allocation22_spill] sm:$0xff] %v7986_v50  ;;  %v8009_v34 = vld [vmem:[%s10133_s3 + $0xc8] sm:$0xff]   ;;  %v10833_v53 = vld [vmem:[#allocation119_spill] sm:$0xff] }
 0x228   : > { %v1455_v58 = vsel %vm1405_vm6, %v7956_v37, %v7534_v0  ;;  %v7991_v24 = vsel %vm1396_vm4, %v7922_v43, %v7457_v27  ;;  %v7994_v35 = vrot.slane %v10811_v47, 7  ;;  %v1422_v0 = vpack.c.b16 %v1421_v20, %v1421_v20  ;;  %10813 = vst [vmem:[#allocation156_spill] sm:$0xff] %v8009_v34  ;;  %v1196_v20 = vpop.f32.mrb[121].mxu0  ;;  %4825 = vmatpush3.bf16.msra.mxu0 %v7986_v50  ;;  %v10837_v43 = vld [vmem:[#allocation92_spill] sm:$0xff] }
 0x229   : > { %10810 = vst [vmem:[#allocation155_spill] sm:$0xff] %v7991_v24  ;;  %1514 = vrot.lane.b32.xlu1 %v1513_v9, %s5335_s27  ;;  %1497 = vrot.lane.b32.xlu0 %v1496_v21, %s5336_s28  ;;  %v1529_v54 = vsel %vm1405_vm6, %v7959_v33, %v7550_v25  ;;  %v8004_v27 = vsel %vm1387_vm0, %v7953_v10, %v7498_v51  ;;  %v8011_v41 = vunpack.c.l.b16 %v1302_v17  ;;  %v8013_v9 = vunpack.c.h.b16 %v1302_v17  ;;  %v1197_v25 = vpop.f32.mrb[122].mxu0  ;;  %v10818_v17 = vld [vmem:[#allocation46_spill] sm:$0xff] }
 0x22a   : > { %10812 = vst [vmem:[#allocation26_spill] sm:$0xff] %v7994_v35  ;;  %v1195_v21 = vadd.f32 %v6741_v19, %v1194_v16  ;;  %v1456_v47 = vpack.c.b16 %v1455_v58, %v1455_v58  ;;  %v10816_v35 = vld [vmem:[#allocation67_spill] sm:$0xff]  ;;  %v8029_v16 = vsel %vm1387_vm0, %v7944_v45, %v10818_v17  ;;  %4826 = vmatprep.subr.bf16.mxu0 %v8009_v34  ;;  %v1199_v50 = vpop.f32.mrb[123].mxu0  ;;  %v10821_v24 = vld [vmem:[#allocation114_spill] sm:$0xff] }
 0x22b   : > { %10814 = vst [vmem:[#allocation157_spill] sm:$0xff] %v8011_v41  ;;  %10815 = vst [vmem:[#allocation158_spill] sm:$0xff] %v8013_v9  ;;  %v1198_v20 = vadd.f32 %v6741_v19, %v1197_v25  ;;  %v8034_v51 = vrot.slane %v8011_v41, 2  ;;  %v8037_v55 = vrot.slane %v8013_v9, 2  ;;  %v8050_v19 = vrot.slane %v8013_v9, 3  ;;  %v8061_v17 = vld [vmem:[%s10133_s3 + $0xd0] sm:$0xff]  }
 0x22c   : > { %v1269_v58 = vmax.f32 %v1195_v21, 0.0  ;;  %10819 = vst [vmem:[#allocation67_spill] sm:$0xff] %v8042_v62  ;;  %v8047_v21 = vrot.slane %v8011_v41, 3  ;;  %v8053_v50 = vrot.slane %v8011_v41, 4  ;;  %v8056_v25 = vrot.slane %v8013_v9, 4  ;;  %10820 = vst [vmem:[#allocation113_spill] sm:$0xff] %v8061_v17  ;;  %4827 = vmatpush3.bf16.msra.mxu0 %v8042_v62 }
 0x22d   : > { %1440 = vrot.lane.b32.xlu1 %v1439_v44, %s5335_s27  ;;  %1423 = vrot.lane.b32.xlu0 %v1422_v0, %s5336_s28  ;;  %v1270_v44 = vmax.f32 %v1198_v20, 0.0  ;;  %v1577_v0 = vsel %vm1405_vm6, %v8034_v51, %v7615_v46  ;;  %v1651_v34 = vsel %vm1405_vm6, %v8037_v55, %v7620_v4  ;;  %v1530_v9 = vpack.c.b16 %v1529_v54, %v1529_v54  ;;  %v8087_v54 = vld [vmem:[%s10133_s3 + $0x90] sm:$0xff]   ;;  %v1202_v62 = vpop.f32.mrb[124].mxu0 }
 0x22e   : > { %v1578_v28 = vpack.c.b16 %v1577_v0, %v1577_v0  ;;  %v1594_v36 = vsel %vm1405_vm6, %v8047_v21, %v7625_v42  ;;  %v1668_v20 = vsel %vm1405_vm6, %v8050_v19, %v7630_v32  ;;  %4828 = vmatprep.subr.bf16.mxu0 %v8061_v17  ;;  %v1652_v8 = vpack.c.b16 %v1651_v34, %v1651_v34  ;;  %v10823_v42 = vld [vmem:[#allocation27_spill] sm:$0xff]  ;;  %v10827_v17 = vld [vmem:[#allocation109_spill] sm:$0xff] }
 0x22f   : > { %v1303_v46 = vpack.c.bf16 %v1270_v44, %v1269_v58  ;;  %v1595_v4 = vpack.c.b16 %v1594_v36, %v1594_v36  ;;  %v8082_v41 = vsel %vm1405_vm6, %v8053_v50, %v7635_v22  ;;  %10822 = vst [vmem:[#allocation46_spill] sm:$0xff] %v8087_v54  ;;  %v8090_v0 = vrot.slane %v10823_v42, 7  ;;  %v10825_v36 = vld [vmem:[#allocation115_spill] sm:$0xff]  ;;  %v8104_v58 = vld [vmem:[%s10133_s3 + $0xd8] sm:$0xff]  }
 0x230   : > { %v1669_v32 = vpack.c.b16 %v1668_v20, %v1668_v20  ;;  %v8097_v22 = vsel %vm1405_vm6, %v8056_v25, %v7640_v6  ;;  %10826 = vst [vmem:[#allocation27_spill] sm:$0xff] %v8104_v58  ;;  %v1204_v20 = vpop.f32.mrb[125].mxu0  ;;  %v1612_v6 = vpack.c.b16 %v8082_v41, %v8082_v41  ;;  %4829 = vmatpush3.bf16.msra.mxu0 %v8087_v54  ;;  %v10832_v54 = vld [vmem:[#allocation118_spill] sm:$0xff] }
 0x231   : > { %10824 = vst [vmem:[#allocation114_spill] sm:$0xff] %v8090_v0  ;;  %1457 = vrot.lane.b32.xlu1 %v1456_v47, %s5337_s21  ;;  %1531 = vrot.lane.b32.xlu0 %v1530_v9, %s5337_s21  ;;  %v8106_v44 = vunpack.c.l.b16 %v1303_v46  ;;  %v5237_v9 = vld [vmem:[%s10132_s2] ss:$0 sm:$0xff]  ;;  %v1686_v42 = vpack.c.b16 %v8097_v22, %v8097_v22  ;;  %v1205_v34 = vpop.f32.mrb[126].mxu0  ;;  %v8119_v0 = vsel %vm1387_vm0, %v7956_v37, %v10827_v17  ;;  %v8146_v61 = vunpack.c.h.b16 %v1303_v46 }
 0x232   : > { %v1203_v47 = vadd.f32 %v5237_v9, %v1202_v62  ;;  %v8124_v7 = vsel %vm1387_vm0, %v7959_v33, %v10828_v11  ;;  %v8129_v41 = vsel %vm1387_vm0, %v8034_v51, %v7584_v39  ;;  %v10830_v62 = vld [vmem:[#allocation16_spill] sm:$0xff]  ;;  %4830 = vmatprep.subr.bf16.mxu0 %v8104_v58  ;;  %v1206_v17 = vadd.f32 %v5237_v9, %v1205_v34  ;;  %v1207_v13 = vpop.f32.mrb[127].mxu0  ;;  %v10840_v58 = vld [vmem:[#allocation133_spill] sm:$0xff] }
 0x233   : > { %10829 = vst [vmem:[#allocation115_spill] sm:$0xff] %v8129_v41  ;;  %v8134_v22 = vsel %vm1387_vm0, %v8037_v55, %v10830_v62  ;;  %v8144_v39 = vld [vmem:[%s10133_s3 + $0x98] sm:$0xff]   ;;  %v8157_v11 = vsel %vm1387_vm0, %v8047_v21, %v10837_v43  ;;  %v8162_v13 = vld [vmem:[%s10133_s3 + $0xe0] sm:$0xff]   ;;  %v8169_v34 = vsel %vm1387_vm0, %v8050_v19, %v10840_v58  ;;  %v10841_v62 = vld [vmem:[#allocation134_spill] sm:$0xff] }
 0x234   : > { %10831 = vst [vmem:[#allocation109_spill] sm:$0xff] %v8134_v22  ;;  %v1271_v20 = vmax.f32 %v1203_v47, 0.0  ;;  %10834 = vst [vmem:[#allocation42_spill] sm:$0xff] %v8144_v39  ;;  %v1272_v46 = vmax.f32 %v1206_v17, 0.0  ;;  %v8174_v9 = vsel %vm1387_vm0, %v8053_v50, %v10841_v62  ;;  %4831 = vmatpush3.bf16.msra.mxu0 %v8144_v39  ;;  %v10844_v41 = vld [vmem:[#allocation135_spill] sm:$0xff]  ;;  %v10845_v58 = vld [vmem:[#allocation130_spill] sm:$0xff] }
 0x235   : > { %1579 = vrot.lane.b32.xlu1 %v1578_v28, %s5336_s28  ;;  %1653 = vrot.lane.b32.xlu0 %v1652_v8, %s5336_s28  ;;  %10838 = vst [vmem:[#allocation16_spill] sm:$0xff] %v8162_v13  ;;  %v8184_v8 = vsel %vm1387_vm0, %v8056_v25, %v10844_v41  ;;  %v8189_v28 = vsel %vm1393_vm1, %v7953_v10, %v10845_v58  ;;  %v10846_v39 = vld [vmem:[#allocation74_spill] sm:$0xff]  ;;  %v10848_v47 = vld [vmem:[#allocation131_spill] sm:$0xff]  ;;  %v8206_v10 = vld [vmem:[%s10133_s3 + $0xa0] sm:$0xff]  }
 0x236   : > { %4832 = vmatprep.subr.bf16.mxu0 %v8162_v13  ;;  %v8192_v62 = vpack.c.bf16 %v1272_v46, %v1271_v20  ;;  %v8201_v41 = vsel %vm1393_vm1, %v7947_v31, %v10848_v47  ;;  %10850 = vst [vmem:[#allocation119_spill] sm:$0xff] %v8206_v10  ;;  %v10851_v58 = vld [vmem:[#allocation112_spill] sm:$0xff]  ;;  %v10855_v47 = vld [vmem:[#allocation127_spill] sm:$0xff]  ;;  %v8235_v20 = vrot.slane %v8106_v44, 2 }
 0x237   : > { %10849 = vst [vmem:[#allocation118_spill] sm:$0xff] %v8201_v41  ;;  %v8209_v13 = vrot.slane %v10851_v58, 3  ;;  %v10853_v17 = vld [vmem:[#allocation120_spill] sm:$0xff]  ;;  %v8223_v22 = vsel %vm1393_vm1, %v7944_v45, %v10855_v47  ;;  %v8228_v58 = vld [vmem:[%s10133_s3 + $0xe8] sm:$0xff]   ;;  %v10863_v43 = vld [vmem:[#allocation99_spill] sm:$0xff] }
 0x238   : > { %v8218_v31 = vsel %vm1393_vm1, %v7950_v15, %v10853_v17  ;;  %10856 = vst [vmem:[#allocation133_spill] sm:$0xff] %v8223_v22  ;;  %10857 = vst [vmem:[#allocation134_spill] sm:$0xff] %v8228_v58  ;;  %v8238_v15 = vrot.slane %v8146_v61, 2  ;;  %4833 = vmatpush3.bf16.msra.mxu0 %v8206_v10  ;;  %v10860_v45 = vld [vmem:[#allocation132_spill] sm:$0xff]  ;;  %v8259_v22 = vsel %vm1393_vm1, %v8037_v55, %v10863_v43  ;;  %v10865_v10 = vld [vmem:[#allocation69_spill] sm:$0xff] }
 0x239   : > { %1596 = vrot.lane.b32.xlu1 %v1595_v4, %s5335_s27  ;;  %1670 = vrot.lane.b32.xlu0 %v1669_v32, %s5335_s27  ;;  %10854 = vst [vmem:[#allocation92_spill] sm:$0xff] %v8218_v31  ;;  %v8244_v17 = vsel %vm1393_vm1, %v7956_v37, %v10860_v45  ;;  %v10861_v47 = vld [vmem:[#allocation136_spill] sm:$0xff]  ;;  %10864 = vst [vmem:[#allocation135_spill] sm:$0xff] %v8259_v22  ;;  %v10866_v45 = vld [vmem:[#allocation70_spill] sm:$0xff] }
 0x23a   : > { %v8249_v32 = vsel %vm1393_vm1, %v7959_v33, %v10861_v47  ;;  %v10862_v4 = vld [vmem:[#allocation96_spill] sm:$0xff]  ;;  %4834 = vmatprep.subr.bf16.mxu0 %v8228_v58  ;;  %v10870_v55 = vld [vmem:[#allocation97_spill] sm:$0xff]  ;;  %v2580_v58 = vrot.slane %v8106_v44, 3  ;;  %v10877_v22 = vld [vmem:[#allocation138_spill] sm:$0xff]  ;;  %v8320_v41 = vsel %vm1405_vm6, %v8238_v15, %v7743_v5 }
 0x23b   : > { %v8254_v46 = vsel %vm1393_vm1, %v8034_v51, %v10862_v4  ;;  %v8273_v4 = vld [vmem:[%s10133_s3 + $0xa8] sm:$0xff]   ;;  %v8280_v43 = vsel %vm1393_vm1, %v8047_v21, %v10870_v55  ;;  %v10871_v31 = vld [vmem:[#allocation100_spill] sm:$0xff]  ;;  %v10875_v55 = vld [vmem:[#allocation81_spill] sm:$0xff]  ;;  %v8315_v21 = vsel %vm1405_vm6, %v8235_v20, %v7738_v56 }
 0x23c   : > { %10869 = vst [vmem:[#allocation130_spill] sm:$0xff] %v8273_v4  ;;  %v8285_v47 = vsel %vm1393_vm1, %v8050_v19, %v10871_v31  ;;  %v10872_v51 = vld [vmem:[#allocation98_spill] sm:$0xff]  ;;  %v10876_v19 = vld [vmem:[#allocation31_spill] sm:$0xff]  ;;  %4835 = vmatpush3.bf16.msra.mxu0 %v8273_v4  ;;  %10879 = vst [vmem:[#allocation131_spill] sm:$0xff] %v8315_v21  ;;  %v8324_v31 = vsel %vm1405_vm6, %v2580_v58, %v7748_v1  ;;  %v2654_v21 = vrot.slane %v8146_v61, 3 }
 0x23d   : > { %1613 = vrot.lane.b32.xlu1 %v1612_v6, %s5337_s21  ;;  %1687 = vrot.lane.b32.xlu0 %v1686_v42, %s5337_s21  ;;  %v8290_v37 = vsel %vm1393_vm1, %v8053_v50, %v10872_v51  ;;  %v8296_v6 = vld [vmem:[%s10133_s3 + $0xf0] sm:$0xff]   ;;  %v10874_v42 = vld [vmem:[#allocation80_spill] sm:$0xff]  ;;  %v8307_v50 = vsel %vm1393_vm1, %v8056_v25, %v10877_v22  ;;  %10880 = vst [vmem:[#allocation112_spill] sm:$0xff] %v8324_v31  ;;  %v10883_v51 = vld [vmem:[#allocation125_spill] sm:$0xff] }
 0x23e   : > { %10873 = vst [vmem:[#allocation74_spill] sm:$0xff] %v8296_v6  ;;  %4836 = vmatprep.subr.bf16.mxu0 %v8296_v6  ;;  %v10881_v25 = vld [vmem:[#allocation116_spill] sm:$0xff]  ;;  %v10882_v33 = vld [vmem:[#allocation15_spill] sm:$0xff]  ;;  %v8334_v56 = vrot.slane %v10883_v51, 2  ;;  %v10885_v1 = vpack.c.b16 %v8004_v27, %v10816_v35  ;;  %v2597_v51 = vrot.slane %v8106_v44, 4  ;;  %v8355_v6 = vsel %vm1387_vm0, %v8235_v20, %v7709_v59 }
 0x23f   : > { %v8328_v22 = vrot.slane %v10881_v25, 3  ;;  %v8331_v4 = vrot.slane %v10882_v33, 2  ;;  %v8340_v5 = vld [vmem:[%s10133_s3 + $0xb0] sm:$0xff]   ;;  %v10886_v33 = vpack.c.b16 %v7972_v3, %v10817_v48  ;;  %v2671_v25 = vrot.slane %v8146_v61, 4  ;;  %v8365_v35 = vld [vmem:[%s10133_s3 + $0xf8] sm:$0xff]  }
 0x240   : > { %10884 = vst [vmem:[#allocation120_spill] sm:$0xff] %v8340_v5  ;;  %v8360_v31 = vsel %vm1387_vm0, %v8238_v15, %v7712_v38  ;;  %10887 = vst [vmem:[#allocation127_spill] sm:$0xff] %v8365_v35  ;;  %v8369_v48 = vsel %vm1405_vm6, %v2654_v21, %v7753_v12  ;;  %4837 = vmatpush3.bf16.msra.mxu0 %v8340_v5  ;;  %v8382_v38 = vsel %vm1405_vm6, %v2597_v51, %v7758_v18  ;;  %v10899_v5 = vld [vmem:[#allocation35_spill] sm:$0xff] }
 0x241   : > { %2018 = vrot.lane.b32.xlu1 %v10885_v1, %s5336_s28  ;;  %2052 = vrot.lane.b32.xlu0 %v10886_v33, %s5336_s28  ;;  %10888 = vst [vmem:[#allocation132_spill] sm:$0xff] %v8369_v48  ;;  %v8377_v33 = vsel %vm1387_vm0, %v2580_v58, %v7715_v63  ;;  %v8386_v12 = vsel %vm1405_vm6, %v2671_v25, %v7763_v40  ;;  %v8391_v3 = vrot.slane %v7915_v49, 1  ;;  %v8395_v63 = vunpack.c.l.b16 %v8192_v62  ;;  %v8411_v49 = vld [vmem:[%s10133_s3 + $0xb8] sm:$0xff]  }
 0x242   : > { %10891 = vst [vmem:[#allocation136_spill] sm:$0xff] %v8377_v33  ;;  %4838 = vmatprep.subr.bf16.mxu0 %v8365_v35  ;;  %v8399_v59 = vsel %vm1387_vm0, %v2654_v21, %v7718_v30  ;;  %v8403_v18 = vsel %vm1387_vm0, %v2597_v51, %v7727_v23  ;;  %v8406_v40 = vrot.slane %v7913_v52, 1  ;;  %10894 = vst [vmem:[#allocation99_spill] sm:$0xff] %v8411_v49  ;;  %v8414_v27 = vunpack.c.h.b16 %v8192_v62  ;;  %v10898_v52 = vld [vmem:[#allocation95_spill] sm:$0xff]  ;;  %v10900_v33 = vld [vmem:[#allocation49_spill] sm:$0xff] }
 0x243   : > { %10893 = vst [vmem:[#allocation96_spill] sm:$0xff] %v8395_v63  ;;  %v10896_v30 = vpack.c.b16 %v8024_v14, %v10821_v24  ;;  %v10897_v23 = vpack.c.b16 %v8029_v16, %v10825_v36  ;;  %v8430_v62 = vsel %vm1387_vm0, %v2671_v25, %v7730_v29  ;;  %v8437_v14 = vsel %vm1393_vm1, %v8235_v20, %v7768_v26  ;;  %v10903_v16 = vld [vmem:[#allocation20_spill] sm:$0xff] }
 0x244   : > { %10895 = vst [vmem:[#allocation69_spill] sm:$0xff] %v8414_v27  ;;  %10901 = vst [vmem:[#allocation70_spill] sm:$0xff] %v8437_v14  ;;  %v8442_v24 = vsel %vm1393_vm1, %v8238_v15, %v7773_v57  ;;  %v8446_v36 = vsel %vm1393_vm1, %v2580_v58, %v10903_v16  ;;  %4839 = vmatpush3.bf16.msra.mxu0 %v8411_v49  ;;  %v10908_v20 = vld [vmem:[#allocation60_spill] sm:$0xff]  ;;  %v10911_v15 = vld [vmem:[#allocation59_spill] sm:$0xff]  ;;  %v1476_v26 = vsel %vm1399_vm2, %v8209_v13, %v7822_v2 }
 0x245   : > { %2027 = vrot.lane.b32.xlu1 %v10896_v30, %s5335_s27  ;;  %2061 = vrot.lane.b32.xlu0 %v10897_v23, %s5335_s27  ;;  %10902 = vst [vmem:[#allocation97_spill] sm:$0xff] %v8442_v24  ;;  %10904 = vst [vmem:[#allocation100_spill] sm:$0xff] %v8446_v36  ;;  %v8457_v35 = vsel %vm1393_vm1, %v2654_v21, %v10908_v20  ;;  %v8464_v16 = vsel %vm1393_vm1, %v2597_v51, %v10911_v15  ;;  %v10913_v30 = vld [vmem:[#allocation140_spill] sm:$0xff]  ;;  %v8489_v58 = vrot.slane %v8395_v63, 2  ;;  %v10930_v51 = vld [vmem:[#allocation58_spill] sm:$0xff] }
 0x246   : > { %10909 = vst [vmem:[#allocation98_spill] sm:$0xff] %v8457_v35  ;;  %4868 = vmatprep.subr.bf16.mxu0 %v7927_v60  ;;  %10912 = vst [vmem:[#allocation80_spill] sm:$0xff] %v8464_v16  ;;  %v8468_v49 = vsel %vm1393_vm1, %v2671_v25, %v10913_v30  ;;  %v10915_v21 = vpack.c.b16 %v8119_v0, %v10832_v54  ;;  %v10916_v60 = vpack.c.b16 %v8124_v7, %v10833_v53  ;;  %v10920_v7 = vld [vmem:[#allocation89_spill] sm:$0xff]  ;;  %v10924_v1 = vld [vmem:[#allocation128_spill] sm:$0xff] }
 0x247   : > { %10914 = vst [vmem:[#allocation81_spill] sm:$0xff] %v8468_v49  ;;  %v3231_v30 = vrot.slane %v8414_v27, 2  ;;  %v1478_v2 = vsel %vm1402_vm5, %v8334_v56, %v1476_v26  ;;  %v3248_v54 = vrot.slane %v8414_v27, 3  ;;  %v1403_v0 = vsel %vm1402_vm5, %v8331_v4, %v10920_v7  ;;  %v10927_v7 = vld [vmem:[#allocation154_spill] sm:$0xff]  ;;  %v10928_v49 = vld [vmem:[#allocation111_spill] sm:$0xff]  ;;  %v10939_v36 = vld [vmem:[#allocation5_spill] sm:$0xff] }
 0x248   : > { %v8494_v53 = vsel %vm1405_vm6, %v8391_v3, %v1478_v2  ;;  %v8504_v25 = vrot.slane %v8395_v63, 3  ;;  %v3265_v26 = vrot.slane %v8414_v27, 4  ;;  %v8509_v20 = vsel %vm1405_vm6, %v8406_v40, %v1403_v0  ;;  %v10931_v57 = vld [vmem:[#allocation115_spill] sm:$0xff]  ;;  %v10942_v24 = vld [vmem:[#allocation32_spill] sm:$0xff] }
 0x249   : > { %2036 = vrot.lane.b32.xlu1 %v10915_v21, %s5337_s21  ;;  %2070 = vrot.lane.b32.xlu0 %v10916_v60, %s5337_s21  ;;  %10919 = vst [vmem:[#allocation31_spill] sm:$0xff] %v8494_v53  ;;  %v10921_v21 = vld [vmem:[#allocation146_spill] sm:$0xff]  ;;  %10923 = vst [vmem:[#allocation116_spill] sm:$0xff] %v8509_v20  ;;  %v8512_v2 = vrot.slane %v10924_v1, 2  ;;  %v10925_v53 = vld [vmem:[#allocation104_spill] sm:$0xff] }
 0x24a   : > { %v8501_v60 = vsel %vm1405_vm6, %v3231_v30, %v10921_v21  ;;  %v8516_v15 = vsel %vm1405_vm6, %v3248_v54, %v10925_v53  ;;  %v2075_v21 = vsel %vm1402_vm5, %v10928_v49, %v10927_v7  ;;  %v10932_v35 = vld [vmem:[#allocation123_spill] sm:$0xff]  ;;  %v10934_v1 = vld [vmem:[#allocation109_spill] sm:$0xff]  ;;  %v10935_v20 = vld [vmem:[#allocation124_spill] sm:$0xff]  ;;  %v8533_v53 = vrot.slane %v8395_v63, 4 }
 0x24b   : > { %10922 = vst [vmem:[#allocation138_spill] sm:$0xff] %v8501_v60  ;;  %10926 = vst [vmem:[#allocation15_spill] sm:$0xff] %v8516_v15  ;;  %v10929_v60 = vld [vmem:[#allocation6_spill] sm:$0xff]  ;;  %v10933_v0 = vpack.c.b16 %v10931_v57, %v10932_v35  ;;  %v10936_v48 = vpack.c.b16 %v10934_v1, %v10935_v20  ;;  %v10937_v15 = vld [vmem:[#allocation53_spill] sm:$0xff] }
 0x24c   : > { %v2263_v16 = vsel %vm1402_vm5, %v10930_v51, %v10929_v60  ;;  %v10940_v23 = vld [vmem:[#allocation23_spill] sm:$0xff]  ;;  %v10943_v57 = vld [vmem:[#allocation148_spill] sm:$0xff]  ;;  %v10946_v1 = vld [vmem:[#allocation141_spill] sm:$0xff] }
 0x24d   : > { %2086 = vrot.lane.b32.xlu1 %v10933_v0, %s5336_s28  ;;  %2120 = vrot.lane.b32.xlu0 %v10936_v48, %s5336_s28  ;;  %v8537_v7 = vsel %vm1405_vm6, %v10937_v15, %v2263_v16  ;;  %v2296_v51 = vsel %vm1399_vm2, %v10940_v23, %v10939_v36  ;;  %v10941_v60 = vld [vmem:[#allocation7_spill] sm:$0xff]  ;;  %v8547_v0 = vsel %vm1405_vm6, %v3265_v26, %v10943_v57  ;;  %v10945_v48 = vld [vmem:[#allocation48_spill] sm:$0xff]  ;;  %v10948_v15 = vld [vmem:[#allocation57_spill] sm:$0xff] }
 0x24e   : > { %10938 = vst [vmem:[#allocation125_spill] sm:$0xff] %v8537_v7  ;;  %v2330_v35 = vsel %vm1399_vm2, %v10942_v24, %v10941_v60  ;;  %10944 = vst [vmem:[#allocation95_spill] sm:$0xff] %v8547_v0  ;;  %v8552_v20 = vsel %vm1387_vm0, %v8489_v58, %v10945_v48  ;;  %v8556_v16 = vsel %vm1387_vm0, %v3231_v30, %v10946_v1  ;;  %v10951_v57 = vld [vmem:[#allocation142_spill] sm:$0xff]  ;;  %v10953_v48 = vld [vmem:[#allocation155_spill] sm:$0xff] }
 0x24f   : > { %10947 = vst [vmem:[#allocation35_spill] sm:$0xff] %v8556_v16  ;;  %v2297_v36 = vsel %vm1402_vm5, %v10948_v15, %v2296_v51  ;;  %v8567_v0 = vsel %vm1387_vm0, %v8504_v25, %v10951_v57  ;;  %v1558_v29 = vsel %vm1399_vm2, %v8328_v22, %v10953_v48  ;;  %v10955_v27 = vld [vmem:[#allocation143_spill] sm:$0xff]  ;;  %v10957_v60 = vld [vmem:[#allocation157_spill] sm:$0xff]  ;;  %v10958_v24 = vld [vmem:[#allocation76_spill] sm:$0xff] }
 0x250   : > { %10952 = vst [vmem:[#allocation49_spill] sm:$0xff] %v8567_v0  ;;  %v8576_v51 = vsel %vm1387_vm0, %v3248_v54, %v10955_v27  ;;  %v1560_v15 = vsel %vm1402_vm5, %v8512_v2, %v1558_v29  ;;  %v1561_v63 = vrot.slane %v10957_v60, 1  ;;  %v8582_v16 = vrot.slane %v10958_v24, 4  ;;  %v10959_v57 = vld [vmem:[#allocation71_spill] sm:$0xff]  ;;  %v10961_v48 = vld [vmem:[#allocation72_spill] sm:$0xff]  ;;  %v10965_v24 = vld [vmem:[#allocation145_spill] sm:$0xff] }
 0x251   : > { %10956 = vst [vmem:[#allocation20_spill] sm:$0xff] %v8576_v51  ;;  %v10960_v23 = vpack.c.b16 %v8157_v11, %v10959_v57  ;;  %v10962_v14 = vpack.c.b16 %v8169_v34, %v10961_v48  ;;  %v10964_v0 = vld [vmem:[#allocation144_spill] sm:$0xff]  ;;  %v8601_v60 = vsel %vm1387_vm0, %v3265_v26, %v10965_v24  ;;  %v10970_v48 = vld [vmem:[#allocation149_spill] sm:$0xff]  ;;  %v10973_v51 = vld [vmem:[#allocation150_spill] sm:$0xff] }
 0x252   : > { %v8597_v29 = vsel %vm1387_vm0, %v8533_v53, %v10964_v0  ;;  %10966 = vst [vmem:[#allocation60_spill] sm:$0xff] %v8601_v60  ;;  %v8604_v11 = vsel %vm1405_vm6, %v1561_v63, %v1560_v15  ;;  %v8613_v1 = vsel %vm1393_vm1, %v8489_v58, %v10970_v48  ;;  %v8619_v24 = vsel %vm1393_vm1, %v3231_v30, %v10973_v51  ;;  %v10975_v15 = vld [vmem:[#allocation21_spill] sm:$0xff]  ;;  %v10979_v34 = vld [vmem:[#allocation151_spill] sm:$0xff]  ;;  %v10980_v0 = vld [vmem:[#allocation152_spill] sm:$0xff] }
 0x253   : > { %2095 = vrot.lane.b32.xlu1 %v10960_v23, %s5335_s27  ;;  %2129 = vrot.lane.b32.xlu0 %v10962_v14, %s5335_s27  ;;  %10967 = vst [vmem:[#allocation59_spill] sm:$0xff] %v8604_v11  ;;  %10971 = vst [vmem:[#allocation140_spill] sm:$0xff] %v8613_v1  ;;  %v8624_v11 = vsel %vm1405_vm6, %v8209_v13, %v10975_v15  ;;  %v8628_v14 = vsel %vm1405_vm6, %v8328_v22, %v2075_v21  ;;  %v10982_v51 = vld [vmem:[#allocation55_spill] sm:$0xff]  ;;  %v10983_v1 = vld [vmem:[#allocation121_spill] sm:$0xff] }
 0x254   : > { %10974 = vst [vmem:[#allocation89_spill] sm:$0xff] %v8619_v24  ;;  %10976 = vst [vmem:[#allocation146_spill] sm:$0xff] %v8624_v11  ;;  %v8635_v27 = vsel %vm1393_vm1, %v8504_v25, %v10979_v34  ;;  %v8639_v30 = vsel %vm1393_vm1, %v3248_v54, %v10980_v0  ;;  %v2265_v15 = vsel %vm1387_vm0, %v10983_v1, %v10982_v51  ;;  %v10984_v60 = vld [vmem:[#allocation77_spill] sm:$0xff]  ;;  %v10988_v57 = vld [vmem:[#allocation19_spill] sm:$0xff] }
 0x255   : > { %10977 = vst [vmem:[#allocation128_spill] sm:$0xff] %v8628_v14  ;;  %10981 = vst [vmem:[#allocation104_spill] sm:$0xff] %v8639_v30  ;;  %v8645_v23 = vrot.slane %v10984_v60, 4  ;;  %v10985_v21 = vld [vmem:[#allocation73_spill] sm:$0xff]  ;;  %v10987_v34 = vpack.c.b16 %v8184_v8, %v10846_v39  ;;  %v8662_v1 = vsel %vm1387_vm0, %v8406_v40, %v8331_v4  ;;  %v10995_v51 = vld [vmem:[#allocation28_spill] sm:$0xff] }
 0x256   : > { %v10986_v48 = vpack.c.b16 %v8174_v9, %v10985_v21  ;;  %10990 = vst [vmem:[#allocation154_spill] sm:$0xff] %v8662_v1  ;;  %v10993_v39 = vld [vmem:[#allocation153_spill] sm:$0xff]  ;;  %v8678_v21 = vsel %vm1393_vm1, %v3265_v26, %v10995_v51  ;;  %v8688_v1 = vsel %vm1387_vm0, %v1561_v63, %v8512_v2  ;;  %v2266_v26 = vsel %vm1390_vm3, %v8331_v4, %v2265_v15  ;;  %v11000_v51 = vld [vmem:[#allocation52_spill] sm:$0xff]  ;;  %v11003_v60 = vld [vmem:[#allocation63_spill] sm:$0xff] }
 0x257   : > { %2138 = vrot.lane.b32.xlu0 %v10987_v34, %s5337_s21  ;;  %v8674_v8 = vsel %vm1393_vm1, %v8533_v53, %v10993_v39  ;;  %10996 = vst [vmem:[#allocation58_spill] sm:$0xff] %v8678_v21  ;;  %10999 = vst [vmem:[#allocation115_spill] sm:$0xff] %v8688_v1  ;;  %v8696_v0 = vsel %vm1405_vm6, %v11000_v51, %v2297_v36  ;;  %v11002_v34 = vld [vmem:[#allocation101_spill] sm:$0xff]  ;;  %v11004_v11 = vpack.c.b16 %v8189_v28, %v11003_v60  ;;  %v11006_v54 = vld [vmem:[#allocation64_spill] sm:$0xff] }
 0x258   : > { %2104 = vrot.lane.b32.xlu1 %v10986_v48, %s5337_s21  ;;  %v8669_v48 = vsel %vm1387_vm0, %v8391_v3, %v8334_v56  ;;  %10994 = vst [vmem:[#allocation6_spill] sm:$0xff] %v8674_v8  ;;  %11001 = vst [vmem:[#allocation123_spill] sm:$0xff] %v8696_v0  ;;  %v2299_v9 = vsel %vm1387_vm0, %v8209_v13, %v11002_v34  ;;  %v8711_v4 = vsel %vm1393_vm1, %v8406_v40, %v2266_v26  ;;  %v11009_v15 = vld [vmem:[#allocation38_spill] sm:$0xff]  ;;  %v11010_v34 = vld [vmem:[#allocation56_spill] sm:$0xff] }
 0x259   : > { %10992 = vst [vmem:[#allocation111_spill] sm:$0xff] %v8669_v48  ;;  %v11005_v48 = vld [vmem:[#allocation118_spill] sm:$0xff]  ;;  %11008 = vst [vmem:[#allocation109_spill] sm:$0xff] %v8711_v4  ;;  %v2300_v36 = vsel %vm1390_vm3, %v8334_v56, %v2299_v9  ;;  %v2331_v13 = vsel %vm1402_vm5, %v11009_v15, %v2330_v35  ;;  %v8718_v51 = vrot.slane %v11010_v34, 6  ;;  %v2333_v40 = vsel %vm1387_vm0, %v8328_v22, %v10928_v49  ;;  %v11016_v26 = vld [vmem:[#allocation83_spill] sm:$0xff] }
 0x25a   : > { %v11007_v39 = vpack.c.b16 %v11005_v48, %v11006_v54  ;;  %v11012_v54 = vld [vmem:[#allocation44_spill] sm:$0xff]  ;;  %v11013_v56 = vld [vmem:[#allocation86_spill] sm:$0xff]  ;;  %v11019_v49 = vld [vmem:[#allocation9_spill] sm:$0xff] }
 0x25b   : > { %v8730_v60 = vrot.slane %v11012_v54, 5  ;;  %v2544_v9 = vrot.slane %v11013_v56, 3  ;;  %v11014_v48 = vld [vmem:[#allocation62_spill] sm:$0xff]  ;;  %v11021_v35 = vld [vmem:[#allocation137_spill] sm:$0xff]  ;;  %v11051_v21 = vld [vmem:[#allocation84_spill] sm:$0xff] }
 0x25c   : > { %2276 = vrot.lane.b32.xlu1 %v11004_v11, %s5336_s28  ;;  %2310 = vrot.lane.b32.xlu0 %v11007_v39, %s5336_s28  ;;  %v8724_v11 = vsel %vm1393_vm1, %v8391_v3, %v2300_v36  ;;  %v8737_v39 = vsel %vm1405_vm6, %v11014_v48, %v2331_v13  ;;  %v2334_v3 = vsel %vm1390_vm3, %v8512_v2, %v2333_v40  ;;  %v2618_v36 = vrot.slane %v11016_v26, 3  ;;  %v11017_v15 = vld [vmem:[#allocation122_spill] sm:$0xff]  ;;  %v11022_v13 = vld [vmem:[#allocation92_spill] sm:$0xff]  ;;  %v11023_v48 = vld [vmem:[#allocation65_spill] sm:$0xff] }
 0x25d   : > { %11011 = vst [vmem:[#allocation124_spill] sm:$0xff] %v8724_v11  ;;  %11015 = vst [vmem:[#allocation53_spill] sm:$0xff] %v8737_v39  ;;  %v8743_v34 = vrot.slane %v11017_v15, 2  ;;  %v8746_v22 = vsel %vm1393_vm1, %v1561_v63, %v2334_v3  ;;  %v11020_v54 = vld [vmem:[#allocation26_spill] sm:$0xff]  ;;  %v8752_v28 = vrot.slane %v11021_v35, 2  ;;  %v11024_v0 = vpack.c.b16 %v11022_v13, %v11023_v48  ;;  %v11025_v2 = vld [vmem:[#allocation133_spill] sm:$0xff] }
 0x25e   : > { %11018 = vst [vmem:[#allocation5_spill] sm:$0xff] %v8746_v22  ;;  %v2537_v56 = vsel %vm1387_vm0, %v11020_v54, %v11019_v49  ;;  %v11026_v40 = vld [vmem:[#allocation66_spill] sm:$0xff]  ;;  %v11028_v15 = vld [vmem:[#allocation61_spill] sm:$0xff]  ;;  %v3208_v24 = vrot.slane %v11051_v21, 5 }
 0x25f   : > { %v11027_v26 = vpack.c.b16 %v11025_v2, %v11026_v40  ;;  %v2539_v3 = vsel %vm1390_vm3, %v8718_v51, %v2537_v56  ;;  %v8767_v11 = vrot.slane %v11028_v15, 6  ;;  %v11029_v7 = vld [vmem:[#allocation10_spill] sm:$0xff]  ;;  %v11031_v48 = vld [vmem:[#allocation45_spill] sm:$0xff]  ;;  %v2774_v2 = vsel %vm1393_vm1, %v11020_v54, %v11019_v49 }
 0x260   : > { %2285 = vrot.lane.b32.xlu1 %v11024_v0, %s5335_s27  ;;  %v2541_v35 = vsel %vm1393_vm1, %v8730_v60, %v2539_v3  ;;  %v11030_v13 = vld [vmem:[#allocation114_spill] sm:$0xff]  ;;  %v8775_v4 = vrot.slane %v11031_v48, 5 }
 0x261   : > { %2319 = vrot.lane.b32.xlu0 %v11027_v26, %s5335_s27  ;;  %v2611_v0 = vsel %vm1387_vm0, %v11030_v13, %v11029_v7  ;;  %v2543_v56 = vsel %vm1396_vm4, %v8582_v16, %v2541_v35  ;;  %v2775_v26 = vsel %vm1396_vm4, %v8718_v51, %v2774_v2  ;;  %v2808_v3 = vsel %vm1393_vm1, %v11030_v13, %v11029_v7 }
 0x262   : > { %v2613_v40 = vsel %vm1390_vm3, %v8767_v11, %v2611_v0  ;;  %v2545_v15 = vsel %vm1399_vm2, %v2544_v9, %v2543_v56  ;;  %v2776_v63 = vsel %vm1399_vm2, %v8730_v60, %v2775_v26  ;;  %v2809_v35 = vsel %vm1396_vm4, %v8767_v11, %v2808_v3  ;;  %v11034_v3 = vld [vmem:[#allocation34_spill] sm:$0xff] }
 0x263   : > { %v2615_v48 = vsel %vm1393_vm1, %v8775_v4, %v2613_v40  ;;  %v11032_v0 = vpack.c.b16 %v8244_v17, %v10865_v10  ;;  %v11033_v2 = vpack.c.b16 %v8249_v32, %v10866_v45  ;;  %v2777_v40 = vsel %vm1402_vm5, %v8582_v16, %v2776_v63  ;;  %v11035_v17 = vld [vmem:[#allocation36_spill] sm:$0xff] }
 0x264   : > { %v2617_v56 = vsel %vm1396_vm4, %v8645_v23, %v2615_v48  ;;  %v2810_v26 = vsel %vm1399_vm2, %v8775_v4, %v2809_v35  ;;  %v3130_v39 = vrot.slane %v11034_v3, 7  ;;  %v8813_v10 = vsel %vm1405_vm6, %v2544_v9, %v2777_v40  ;;  %v11036_v35 = vld [vmem:[#allocation29_spill] sm:$0xff]  ;;  %v11037_v3 = vld [vmem:[#allocation40_spill] sm:$0xff] }
 0x265   : > { %2294 = vrot.lane.b32.xlu1 %v11032_v0, %s5337_s21  ;;  %2328 = vrot.lane.b32.xlu0 %v11033_v2, %s5337_s21  ;;  %v2619_v22 = vsel %vm1399_vm2, %v2618_v36, %v2617_v56  ;;  %v2811_v32 = vsel %vm1402_vm5, %v8645_v23, %v2810_v26  ;;  %v3204_v45 = vrot.slane %v11035_v17, 7  ;;  %v8823_v63 = vsel %vm1387_vm0, %v2544_v9, %v8582_v16  ;;  %v11038_v16 = vld [vmem:[#allocation78_spill] sm:$0xff]  ;;  %v11040_v17 = vld [vmem:[#allocation135_spill] sm:$0xff] }
 0x266   : > { %v8819_v48 = vsel %vm1405_vm6, %v2618_v36, %v2811_v32  ;;  %v3132_v0 = vrot.slane %v11036_v35, 6  ;;  %v2547_v2 = vsel %vm1402_vm5, %v8743_v34, %v2545_v15  ;;  %v8829_v56 = vrot.slane %v8106_v44, 1  ;;  %v11041_v35 = vld [vmem:[#allocation79_spill] sm:$0xff] }
 0x267   : > { %v2621_v40 = vsel %vm1402_vm5, %v8752_v28, %v2619_v22  ;;  %v8834_v26 = vrot.slane %v8146_v61, 1  ;;  %v3136_v32 = vrot.slane %v11037_v3, 4  ;;  %v11039_v9 = vpack.c.b16 %v8254_v46, %v11038_v16  ;;  %v11043_v22 = vld [vmem:[#allocation82_spill] sm:$0xff]  ;;  %v11046_v46 = vld [vmem:[#allocation11_spill] sm:$0xff] }
 0x268   : > { %v11042_v15 = vpack.c.b16 %v11040_v17, %v11041_v35  ;;  %v8847_v44 = vsel %vm1387_vm0, %v2618_v36, %v8645_v23  ;;  %v3134_v14 = vrot.slane %v11043_v22, 5  ;;  %v8852_v61 = vsel %vm1405_vm6, %v8829_v56, %v2547_v2  ;;  %v11048_v35 = vld [vmem:[#allocation13_spill] sm:$0xff]  ;;  %v11049_v36 = vld [vmem:[#allocation12_spill] sm:$0xff] }
 0x269   : > { %2344 = vrot.lane.b32.xlu1 %v11039_v9, %s5336_s28  ;;  %11044 = vst [vmem:[#allocation23_spill] sm:$0xff] %v8852_v61  ;;  %v8856_v3 = vsel %vm1405_vm6, %v8834_v26, %v2621_v40  ;;  %v3131_v16 = vsel %vm1387_vm0, %v3130_v39, %v11046_v46  ;;  %v11047_v9 = vld [vmem:[#allocation107_spill] sm:$0xff]  ;;  %v3205_v22 = vsel %vm1387_vm0, %v3204_v45, %v11049_v36  ;;  %v11050_v2 = vld [vmem:[#allocation33_spill] sm:$0xff] }
 0x26a   : > { %2378 = vrot.lane.b32.xlu0 %v11042_v15, %s5336_s28  ;;  %11045 = vst [vmem:[#allocation7_spill] sm:$0xff] %v8856_v3  ;;  %v3210_v17 = vrot.slane %v11047_v9, 4  ;;  %v3138_v15 = vrot.slane %v11048_v35, 3  ;;  %v3133_v23 = vsel %vm1390_vm3, %v3132_v0, %v3131_v16  ;;  %v3206_v61 = vrot.slane %v11050_v2, 6  ;;  %v11052_v3 = vld [vmem:[#allocation18_spill] sm:$0xff] }
 0x26b   : > { %v3135_v1 = vsel %vm1393_vm1, %v3134_v14, %v3133_v23  ;;  %v3368_v40 = vsel %vm1393_vm1, %v3130_v39, %v11046_v46  ;;  %v3212_v8 = vrot.slane %v11052_v3, 3  ;;  %v11053_v9 = vpack.c.b16 %v8280_v43, %v10874_v42 }
 0x26c   : > { %v11054_v16 = vpack.c.b16 %v8285_v47, %v10875_v55  ;;  %v3137_v35 = vsel %vm1396_vm4, %v3136_v32, %v3135_v1  ;;  %v3369_v23 = vsel %vm1396_vm4, %v3132_v0, %v3368_v40  ;;  %v3402_v21 = vsel %vm1393_vm1, %v3204_v45, %v11049_v36 }
 0x26d   : > { %2353 = vrot.lane.b32.xlu1 %v11053_v9, %s5335_s27  ;;  %v3207_v2 = vsel %vm1390_vm3, %v3206_v61, %v3205_v22  ;;  %v3370_v3 = vsel %vm1399_vm2, %v3134_v14, %v3369_v23  ;;  %v3403_v30 = vsel %vm1396_vm4, %v3206_v61, %v3402_v21  ;;  %v3538_v43 = vsel %vm1399_vm2, %v3130_v39, %v11046_v46  ;;  %v11057_v46 = vld [vmem:[#allocation43_spill] sm:$0xff] }
 0x26e   : > { %2387 = vrot.lane.b32.xlu0 %v11054_v16, %s5335_s27  ;;  %v3139_v42 = vsel %vm1399_vm2, %v3138_v15, %v3137_v35  ;;  %v3209_v47 = vsel %vm1393_vm1, %v3208_v24, %v3207_v2  ;;  %v3371_v55 = vsel %vm1402_vm5, %v3136_v32, %v3370_v3  ;;  %v3404_v1 = vsel %vm1399_vm2, %v3208_v24, %v3403_v30 }
 0x26f   : > { %v3211_v40 = vsel %vm1396_vm4, %v3210_v17, %v3209_v47  ;;  %v8894_v9 = vsel %vm1405_vm6, %v3138_v15, %v3371_v55  ;;  %v3405_v22 = vsel %vm1402_vm5, %v3210_v17, %v3404_v1  ;;  %v3539_v16 = vsel %vm1402_vm5, %v3132_v0, %v3538_v43 }
 0x270   : > { %11055 = vst [vmem:[#allocation32_spill] sm:$0xff] %v8894_v9  ;;  %v11056_v39 = vpack.c.b16 %v8290_v37, %v10876_v19  ;;  %v11058_v35 = vpack.c.b16 %v8307_v50, %v11057_v46  ;;  %v3213_v30 = vsel %vm1399_vm2, %v3212_v8, %v3211_v40  ;;  %v8908_v23 = vsel %vm1405_vm6, %v3212_v8, %v3405_v22  ;;  %v11060_v19 = vld [vmem:[#allocation131_spill] sm:$0xff] }
 0x271   : > { %v8911_v21 = vsel %vm1405_vm6, %v3134_v14, %v3539_v16  ;;  %v3541_v0 = vsel %vm1387_vm0, %v3138_v15, %v3136_v32  ;;  %v3572_v2 = vsel %vm1399_vm2, %v3204_v45, %v11049_v36  ;;  %v3575_v37 = vsel %vm1387_vm0, %v3212_v8, %v3210_v17  ;;  %v11063_v15 = vld [vmem:[#allocation132_spill] sm:$0xff] }
 0x272   : > { %2362 = vrot.lane.b32.xlu1 %v11056_v39, %s5337_s21  ;;  %2396 = vrot.lane.b32.xlu0 %v11058_v35, %s5337_s21  ;;  %11059 = vst [vmem:[#allocation148_spill] sm:$0xff] %v8911_v21  ;;  %v2565_v3 = vpack.c.b16 %v11060_v19, %v11060_v19  ;;  %v2639_v50 = vpack.c.b16 %v8320_v41, %v8320_v41 }
 0x273   : > { %v3573_v43 = vsel %vm1402_vm5, %v3206_v61, %v3572_v2  ;;  %v8925_v14 = vsel %vm1387_vm0, %v8829_v56, %v8743_v34  ;;  %v8930_v32 = vsel %vm1387_vm0, %v8834_v26, %v8752_v28  ;;  %v11062_v61 = vld [vmem:[#allocation112_spill] sm:$0xff]  ;;  %v2656_v36 = vpack.c.b16 %v11063_v15, %v11063_v15  ;;  %v11086_v15 = vld [vmem:[#allocation98_spill] sm:$0xff] }
 0x274   : > { %v8933_v8 = vsel %vm1405_vm6, %v3208_v24, %v3573_v43  ;;  %v2582_v17 = vpack.c.b16 %v11062_v61, %v11062_v61  ;;  %v2599_v24 = vpack.c.b16 %v8382_v38, %v8382_v38  ;;  %v2673_v47 = vpack.c.b16 %v8386_v12, %v8386_v12 }
 0x275   : > { %11061 = vst [vmem:[#allocation48_spill] sm:$0xff] %v8933_v8  ;;  %v2944_v55 = vsel %vm1399_vm2, %v11020_v54, %v11019_v49  ;;  %v2978_v40 = vsel %vm1399_vm2, %v11030_v13, %v11029_v7  ;;  %v2948_v12 = vsel %vm1390_vm3, %v8743_v34, %v8823_v63  ;;  %v2982_v49 = vsel %vm1390_vm3, %v8752_v28, %v8847_v44  ;;  %v11066_v7 = vld [vmem:[#allocation94_spill] sm:$0xff]  ;;  %v11069_v63 = vld [vmem:[#allocation91_spill] sm:$0xff]  ;;  %v9323_v13 = vld [vmem:[%s10133_s3 + $0x60] sm:$0xff]  }
 0x276   : > { %2566 = vrot.lane.b32.xlu1 %v2565_v3, %s5336_s28  ;;  %2640 = vrot.lane.b32.xlu0 %v2639_v50, %s5336_s28  ;;  %v2945_v1 = vsel %vm1402_vm5, %v8718_v51, %v2944_v55  ;;  %v2979_v22 = vsel %vm1402_vm5, %v8767_v11, %v2978_v40  ;;  %v11064_v51 = vld [vmem:[#allocation90_spill] sm:$0xff]  ;;  %v8983_v34 = vsel %vm1393_vm1, %v8829_v56, %v2948_v12  ;;  %v11072_v56 = vld [vmem:[#allocation47_spill] sm:$0xff]  ;;  %v11078_v50 = vld [vmem:[#allocation85_spill] sm:$0xff] }
 0x277   : > { %v8963_v38 = vsel %vm1405_vm6, %v8730_v60, %v2945_v1  ;;  %v11065_v54 = vpack.c.b16 %v8355_v6, %v11064_v51  ;;  %v11067_v60 = vpack.c.b16 %v8360_v31, %v11066_v7  ;;  %v8987_v11 = vsel %vm1405_vm6, %v8775_v4, %v2979_v22  ;;  %v11068_v31 = vld [vmem:[#allocation136_spill] sm:$0xff]  ;;  %v11077_v3 = vld [vmem:[#allocation70_spill] sm:$0xff]  ;;  %v11092_v22 = vld [vmem:[#allocation39_spill] sm:$0xff] }
 0x278   : > { %v8991_v28 = vsel %vm1393_vm1, %v8834_v26, %v2982_v49  ;;  %v11070_v44 = vpack.c.b16 %v11068_v31, %v11069_v63  ;;  %v11071_v4 = vpack.c.b16 %v8399_v59, %v10898_v52  ;;  %v3140_v16 = vrot.slane %v11072_v56, 2  ;;  %v11073_v26 = vld [vmem:[#allocation139_spill] sm:$0xff]  ;;  %v11076_v52 = vld [vmem:[#allocation69_spill] sm:$0xff]  ;;  %v11089_v55 = vld [vmem:[#allocation108_spill] sm:$0xff] }
 0x279   : > { %v3214_v39 = vrot.slane %v11073_v26, 2  ;;  %v11074_v46 = vpack.c.b16 %v8403_v18, %v10899_v5  ;;  %v11075_v35 = vpack.c.b16 %v8430_v62, %v10900_v33  ;;  %v3216_v19 = vrot.slane %v11076_v52, 1  ;;  %v11080_v5 = vld [vmem:[#allocation97_spill] sm:$0xff]  ;;  %v11090_v40 = vld [vmem:[#allocation96_spill] sm:$0xff]  ;;  %v11097_v31 = vld [vmem:[#allocation138_spill] sm:$0xff] }
 0x27a   : > { %2583 = vrot.lane.b32.xlu1 %v2582_v17, %s5335_s27  ;;  %2657 = vrot.lane.b32.xlu0 %v2656_v36, %s5335_s27  ;;  %v9016_v2 = vsel %vm1402_vm5, %v3140_v16, %v3139_v42  ;;  %v11079_v43 = vpack.c.b16 %v11077_v3, %v11078_v50  ;;  %v11081_v18 = vld [vmem:[#allocation93_spill] sm:$0xff]  ;;  %v3542_v62 = vsel %vm1390_vm3, %v3140_v16, %v3541_v0  ;;  %v11083_v42 = vld [vmem:[#allocation100_spill] sm:$0xff]  ;;  %v11087_v36 = vld [vmem:[#allocation51_spill] sm:$0xff]  ;;  %v9045_v12 = vrot.slane %v11090_v40, 1 }
 0x27b   : > { %v3215_v59 = vsel %vm1402_vm5, %v3214_v39, %v3213_v30  ;;  %v11082_v61 = vpack.c.b16 %v11080_v5, %v11081_v18  ;;  %v11084_v30 = vld [vmem:[#allocation37_spill] sm:$0xff]  ;;  %v3158_v1 = vsel %vm1405_vm6, %v8489_v58, %v11089_v55  ;;  %v11091_v0 = vld [vmem:[#allocation80_spill] sm:$0xff]  ;;  %v11098_v63 = vld [vmem:[#allocation147_spill] sm:$0xff] }
 0x27c   : > { %v9029_v33 = vsel %vm1405_vm6, %v3216_v19, %v3215_v59  ;;  %v11085_v17 = vpack.c.b16 %v11083_v42, %v11084_v30  ;;  %v11093_v49 = vpack.c.b16 %v11091_v0, %v11092_v22  ;;  %v11094_v51 = vld [vmem:[#allocation81_spill] sm:$0xff]  ;;  %v3175_v58 = vsel %vm1405_vm6, %v8504_v25, %v11098_v63  ;;  %v11101_v59 = vld [vmem:[#allocation102_spill] sm:$0xff]  ;;  %v11102_v50 = vld [vmem:[#allocation95_spill] sm:$0xff] }
 0x27d   : > { %v11103_v5 = vld [vmem:[#allocation31_spill] sm:$0xff]  ;;  %v11105_v42 = vld [vmem:[#allocation24_spill] sm:$0xff]  ;;  %v9098_v40 = vsel %vm1393_vm1, %v9045_v12, %v3542_v62  ;;  %v11109_v22 = vld [vmem:[#allocation105_spill] sm:$0xff] }
 0x27e   : > { %2600 = vrot.lane.b32.xlu1 %v2599_v24, %s5337_s21  ;;  %2674 = vrot.lane.b32.xlu0 %v2673_v47, %s5337_s21  ;;  %v11088_v24 = vpack.c.b16 %v11086_v15, %v11087_v36  ;;  %v3576_v47 = vsel %vm1390_vm3, %v3214_v39, %v3575_v37  ;;  %v3233_v37 = vpack.c.b16 %v11097_v31, %v11097_v31  ;;  %v9089_v30 = vrot.slane %v11105_v42, 7  ;;  %v11106_v36 = vld [vmem:[#allocation30_spill] sm:$0xff]  ;;  %v9287_v62 = vld [vmem:[%s10133_s3 + $0x10] sm:$0xff]   ;;  %v9312_v26 = vld [vmem:[%s10133_s3 + $0x18] sm:$0xff]  }
 0x27f   : > { %v1481_v18 = vpack.c.b16 %v11103_v5, %v11103_v5  ;;  %11107 = vst [vmem:[#allocation57_spill] sm:$0xff] %v9098_v40  ;;  %v9101_v0 = vsel %vm1393_vm1, %v3216_v19, %v3576_v47  ;;  %v11115_v47 = vld [vmem:[#allocation87_spill] sm:$0xff]  ;;  %v11123_v42 = vld [vmem:[#allocation14_spill] sm:$0xff] }
 0x280   : > { %11108 = vst [vmem:[#allocation142_spill] sm:$0xff] %v9101_v0 }
 0x282   : > { %2788 = vrot.lane.b32.xlu1 %v11065_v54, %s5336_s28  ;;  %2822 = vrot.lane.b32.xlu0 %v11067_v60, %s5336_s28  ;;  %v11095_v54 = vld [vmem:[#allocation54_spill] sm:$0xff]  ;;  %v3159_v60 = vpack.c.b16 %v3158_v1, %v3158_v1 }
 0x283   : > { %v11096_v7 = vpack.c.b16 %v11094_v51, %v11095_v54  ;;  %v11111_v51 = vld [vmem:[#allocation35_spill] sm:$0xff] }
 0x284   : > { %v11112_v54 = vld [vmem:[#allocation103_spill] sm:$0xff] }
 0x286   : > { %2797 = vrot.lane.b32.xlu1 %v11070_v44, %s5335_s27  ;;  %2831 = vrot.lane.b32.xlu0 %v11071_v4, %s5335_s27  ;;  %v9062_v44 = vsel %vm1387_vm0, %v9045_v12, %v3140_v16  ;;  %v9065_v4 = vsel %vm1387_vm0, %v3216_v19, %v3214_v39  ;;  %v3192_v16 = vsel %vm1405_vm6, %v8533_v53, %v11101_v59  ;;  %v11117_v59 = vld [vmem:[#allocation8_spill] sm:$0xff] }
 0x287   : > { %11099 = vst [vmem:[#allocation141_spill] sm:$0xff] %v9062_v44  ;;  %v3193_v3 = vpack.c.b16 %v3192_v16, %v3192_v16  ;;  %v1624_v16 = vsel %vm1387_vm0, %v9089_v30, %v11117_v59 }
 0x28a   : > { %2806 = vrot.lane.b32.xlu1 %v11074_v46, %s5337_s21  ;;  %2840 = vrot.lane.b32.xlu0 %v11075_v35, %s5337_s21  ;;  %v3176_v46 = vpack.c.b16 %v3175_v58, %v3175_v58  ;;  %v11100_v35 = vld [vmem:[#allocation15_spill] sm:$0xff] }
 0x28b   : > { %v3250_v25 = vpack.c.b16 %v11100_v35, %v11100_v35 }
 0x28e   : > { %2958 = vrot.lane.b32.xlu1 %v11079_v43, %s5336_s28  ;;  %2992 = vrot.lane.b32.xlu0 %v11082_v61, %s5336_s28  ;;  %v3267_v43 = vpack.c.b16 %v11102_v50, %v11102_v50  ;;  %v11104_v61 = vld [vmem:[#allocation116_spill] sm:$0xff] }
 0x28f   : > { %v1407_v53 = vpack.c.b16 %v11104_v61, %v11104_v61  ;;  %v11120_v61 = vld [vmem:[#allocation106_spill] sm:$0xff] }
 0x292   : > { %2967 = vrot.lane.b32.xlu1 %v11085_v17, %s5335_s27  ;;  %3001 = vrot.lane.b32.xlu0 %v11088_v24, %s5335_s27  ;;  %v9092_v24 = vrot.slane %v11106_v36, 6  ;;  %v11125_v36 = vld [vmem:[#allocation158_spill] sm:$0xff] }
 0x294   : > { %v1626_v5 = vsel %vm1390_vm3, %v9092_v24, %v1624_v16 }
 0x296   : > { %2976 = vrot.lane.b32.xlu1 %v11093_v49, %s5337_s21  ;;  %3010 = vrot.lane.b32.xlu0 %v11096_v7, %s5337_s21  ;;  %v11110_v49 = vpack.c.b16 %v8552_v20, %v11109_v22  ;;  %v11113_v7 = vpack.c.b16 %v11111_v51, %v11112_v54  ;;  %v11116_v20 = vld [vmem:[#allocation117_spill] sm:$0xff]  ;;  %v11126_v54 = vld [vmem:[#allocation22_spill] sm:$0xff] }
 0x297   : > { %v9122_v63 = vrot.slane %v11116_v20, 3 }
 0x29a   : > { %3160 = vrot.lane.b32.xlu1 %v3159_v60, %s5336_s28  ;;  %3234 = vrot.lane.b32.xlu0 %v3233_v37, %s5336_s28  ;;  %v11114_v60 = vld [vmem:[#allocation68_spill] sm:$0xff]  ;;  %v9119_v37 = vrot.slane %v11115_v47, 4  ;;  %v11127_v47 = vld [vmem:[#allocation41_spill] sm:$0xff] }
 0x29b   : > { %v1515_v39 = vpop.permute.xlu1 %1514  ;;  %v1498_v52 = vpop.permute.xlu0 %1497  ;;  %v9112_v31 = vrot.slane %v11114_v60, 5  ;;  %v11128_v20 = vpack.c.b16 %v8597_v29, %v11127_v47  ;;  %v11137_v29 = vld [vmem:[#allocation89_spill] sm:$0xff]  ;;  %v11145_v47 = vld [vmem:[#allocation75_spill] sm:$0xff] }
 0x29c   : > { %v1702_v55 = vsel %vm1689_vm7, %v1481_v18, %v1498_v52  ;;  %v11118_v52 = vld [vmem:[#allocation129_spill] sm:$0xff] }
 0x29d   : > { %v1704_v35 = vsel %vm1693_vm8, %v1702_v55, %v1515_v39  ;;  %v11119_v18 = vld [vmem:[#allocation49_spill] sm:$0xff]  ;;  %v9147_v55 = vrot.slane %v11125_v36, 1 }
 0x29e   : > { %3177 = vrot.lane.b32.xlu1 %v3176_v46, %s5335_s27  ;;  %3251 = vrot.lane.b32.xlu0 %v3250_v25, %s5335_s27  ;;  %v11121_v39 = vpack.c.b16 %v11119_v18, %v11120_v61  ;;  %v11135_v18 = vld [vmem:[#allocation50_spill] sm:$0xff] }
 0x29f   : > { %v1441_v17 = vpop.permute.xlu1 %1440  ;;  %v1424_v15 = vpop.permute.xlu0 %1423 }
 0x2a0   : > { %v1692_v1 = vsel %vm1689_vm7, %v1407_v53, %v1424_v15  ;;  %v11122_v53 = vld [vmem:[#allocation20_spill] sm:$0xff]  ;;  %v1628_v15 = vsel %vm1393_vm1, %v9112_v31, %v1626_v5 }
 0x2a1   : > { %v1695_v25 = vsel %vm1693_vm8, %v1692_v1, %v1441_v17  ;;  %v11124_v17 = vpack.c.b16 %v11122_v53, %v11123_v42  ;;  %v1630_v1 = vsel %vm1396_vm4, %v9119_v37, %v1628_v15  ;;  %v11134_v5 = vld [vmem:[#allocation140_spill] sm:$0xff] }
 0x2a2   : > { %3194 = vrot.lane.b32.xlu1 %v3193_v3, %s5337_s21  ;;  %3268 = vrot.lane.b32.xlu0 %v3267_v43, %s5337_s21  ;;  %v9130_v3 = vrot.slane %v11118_v52, 2  ;;  %v11136_v61 = vpack.c.b16 %v11134_v5, %v11135_v18  ;;  %v11155_v5 = vld [vmem:[#allocation16_spill] sm:$0xff] }
 0x2a3   : > { %v1458_v58 = vpop.permute.xlu1 %1457  ;;  %v1532_v46 = vpop.permute.xlu0 %1531 }
 0x2a4   : > { %v1706_v50 = vsel %vm1696_vm9, %v1704_v35, %v1532_v46  ;;  %v1698_v43 = vsel %vm1696_vm9, %v1695_v25, %v1458_v58  ;;  %v11129_v58 = vld [vmem:[#allocation60_spill] sm:$0xff]  ;;  %v11130_v46 = vld [vmem:[#allocation126_spill] sm:$0xff] }
 0x2a5   : > { %1954 = vmatprep.mubr.bf16.mxu1 %v1706_v50  ;;  %v11131_v35 = vpack.c.b16 %v11129_v58, %v11130_v46  ;;  %v11132_v25 = vld [vmem:[#allocation156_spill] sm:$0xff] }
 0x2a6   : > { %3382 = vrot.lane.b32.xlu1 %v11110_v49, %s5336_s28  ;;  %3416 = vrot.lane.b32.xlu0 %v11113_v7, %s5336_s28  ;;  %v1632_v49 = vsel %vm1399_vm2, %v9122_v63, %v1630_v1 }
 0x2a7   : > { %1955 = vmatmul.mubr.bf16.vlgmr.msra.gmra.mrb[0].mxu1 %v1698_v43  ;;  %v1580_v22 = vpop.permute.xlu1 %1579  ;;  %v1654_v51 = vpop.permute.xlu0 %1653  ;;  %v1634_v7 = vsel %vm1402_vm5, %v9130_v3, %v1632_v49  ;;  %v11133_v43 = vld [vmem:[#allocation67_spill] sm:$0xff]  ;;  %v11141_v49 = vld [vmem:[#allocation46_spill] sm:$0xff] }
 0x2a8   : > { %4649 = vmatpush3.bf16.msra.mxu1 %v11126_v54  ;;  %v1636_v60 = vsel %vm1405_vm6, %v9147_v55, %v1634_v7  ;;  %v11143_v7 = vpack.c.b16 %v8635_v27, %v10988_v57  ;;  %v11152_v27 = vld [vmem:[#allocation58_spill] sm:$0xff]  ;;  %v11153_v57 = vld [vmem:[#allocation25_spill] sm:$0xff] }
 0x2a9   : > { %4650 = vmatprep.subr.bf16.mxu1 %v11132_v25  ;;  %v1637_v50 = vpack.c.b16 %v1636_v60, %v1636_v60  ;;  %v11144_v60 = vld [vmem:[#allocation104_spill] sm:$0xff]  ;;  %v11149_v25 = vld [vmem:[#allocation6_spill] sm:$0xff] }
 0x2aa   : > { %3391 = vrot.lane.b32.xlu1 %v11121_v39, %s5335_s27  ;;  %3425 = vrot.lane.b32.xlu0 %v11124_v17, %s5335_s27  ;;  %v11138_v39 = vld [vmem:[#allocation88_spill] sm:$0xff]  ;;  %v11140_v17 = vld [vmem:[#allocation113_spill] sm:$0xff] }
 0x2ab   : > { %v1597_v16 = vpop.permute.xlu1 %1596  ;;  %v1671_v52 = vpop.permute.xlu0 %1670  ;;  %v11139_v53 = vpack.c.b16 %v11137_v29, %v11138_v39  ;;  %v1718_v42 = vsel %vm1689_vm7, %v1637_v50, %v1654_v51  ;;  %v11146_v51 = vpack.c.b16 %v11144_v60, %v11145_v47  ;;  %v11156_v29 = vld [vmem:[#allocation119_spill] sm:$0xff]  ;;  %v11157_v39 = vld [vmem:[#allocation134_spill] sm:$0xff]  ;;  %v11162_v47 = vld [vmem:[#allocation128_spill] sm:$0xff] }
 0x2ac   : > { %4651 = vmatpush3.bf16.msra.mxu1 %v11133_v43  ;;  %v1720_v15 = vsel %vm1693_vm8, %v1718_v42, %v1671_v52  ;;  %v11150_v52 = vld [vmem:[#allocation17_spill] sm:$0xff]  ;;  %v11154_v43 = vpack.c.b16 %v11152_v27, %v11153_v57  ;;  %v11161_v60 = vld [vmem:[#allocation115_spill] sm:$0xff] }
 0x2ad   : > { %4652 = vmatprep.subr.bf16.mxu1 %v11140_v17  ;;  %v11151_v50 = vpack.c.b16 %v11149_v25, %v11150_v52  ;;  %v11158_v17 = vld [vmem:[#allocation130_spill] sm:$0xff]  ;;  %v11167_v27 = vld [vmem:[#allocation127_spill] sm:$0xff] }
 0x2ae   : > { %3400 = vrot.lane.b32.xlu1 %v11128_v20, %s5337_s21  ;;  %3434 = vrot.lane.b32.xlu0 %v11131_v35, %s5337_s21  ;;  %v11147_v20 = vld [vmem:[#allocation27_spill] sm:$0xff]  ;;  %v11148_v35 = vld [vmem:[#allocation42_spill] sm:$0xff] }
 0x2af   : > { %v1614_v36 = vpop.permute.xlu1 %1613  ;;  %v1688_v1 = vpop.permute.xlu0 %1687  ;;  %v11165_v25 = vld [vmem:[#allocation146_spill] sm:$0xff]  ;;  %v11168_v57 = vld [vmem:[#allocation59_spill] sm:$0xff] }
 0x2b0   : > { %4653 = vmatpush3.bf16.msra.mxu1 %v11141_v49  ;;  %v9181_v54 = vsel %vm1696_vm9, %v1720_v15, %v1688_v1  ;;  %v11159_v15 = vld [vmem:[#allocation74_spill] sm:$0xff] }
 0x2b1   : > { %11142 = vst [vmem:[#allocation155_spill] sm:$0xff] %v9181_v54  ;;  %4654 = vmatprep.subr.bf16.mxu1 %v11147_v20  ;;  %1994 = vmatprep.mubr.bf16.mxu1 %v9181_v54 }
 0x2b2   : > { %3552 = vrot.lane.b32.xlu1 %v11136_v61, %s5336_s28  ;;  %3586 = vrot.lane.b32.xlu0 %v11139_v53, %s5336_s28 }
 0x2b3   : > { %v9193_v58 = vpop.permute.xlu1 %2018  ;;  %v2053_v46 = vpop.permute.xlu0 %2052 }
 0x2b4   : > { %4655 = vmatpush3.bf16.msra.mxu1 %v11148_v35  ;;  %v11164_v35 = vld [vmem:[#allocation111_spill] sm:$0xff] }
 0x2b5   : > { %4656 = vmatprep.subr.bf16.mxu1 %v11155_v5  ;;  %v11166_v52 = vpack.c.b16 %v11164_v35, %v11165_v25 }
 0x2b6   : > { %3561 = vrot.lane.b32.xlu1 %v11143_v7, %s5335_s27  ;;  %3595 = vrot.lane.b32.xlu0 %v11146_v51, %s5335_s27  ;;  %v11160_v7 = vld [vmem:[#allocation120_spill] sm:$0xff]  ;;  %v11163_v51 = vpack.c.b16 %v11161_v60, %v11162_v47  ;;  %v11169_v47 = vld [vmem:[#allocation99_spill] sm:$0xff] }
 0x2b7   : > { %v9205_v18 = vpop.permute.xlu1 %2027  ;;  %v2062_v61 = vpop.permute.xlu0 %2061 }
 0x2b8   : > { %4657 = vmatpush3.bf16.msra.mxu1 %v11156_v29 }
 0x2b9   : > { %4658 = vmatprep.subr.bf16.mxu1 %v11157_v39 }
 0x2ba   : > { %3570 = vrot.lane.b32.xlu1 %v11151_v50, %s5337_s21  ;;  %3604 = vrot.lane.b32.xlu0 %v11154_v43, %s5337_s21  ;;  %v2149_v50 = vsel %vm1689_vm7, %v11166_v52, %v2053_v46  ;;  %v1563_v43 = vpack.c.b16 %v11168_v57, %v11168_v57  ;;  %v9241_v46 = vld [vmem:[%s10133_s3 + $0x40] sm:$0xff]   ;;  %s10086_s21 = scalar_lea.hbm %s10139_s9, %s4625_s26 }
 0x2bb   : > { %v9209_v53 = vpop.permute.xlu1 %2036  ;;  %v2071_v42 = vpop.permute.xlu0 %2070  ;;  %v2151_v5 = vsel %vm1693_vm8, %v2149_v50, %v2062_v61  ;;  %v9269_v50 = vld [vmem:[%s10133_s3 + $0x8] sm:$0xff]   ;;  %v11171_v57 = vld [vmem:[#allocation109_spill] sm:$0xff] }
 0x2bc   : > { %4659 = vmatpush3.bf16.msra.mxu1 %v11158_v17  ;;  %v2153_v29 = vsel %vm1696_vm9, %v2151_v5, %v2071_v42 }
 0x2bd   : > { %4660 = vmatprep.subr.bf16.mxu1 %v11159_v15  ;;  %v2173_v42 = vrot.slane %v2153_v29, 1 }
 0x2bf   : > { %v2087_v1 = vpop.permute.xlu1 %2086  ;;  %v9213_v49 = vpop.permute.xlu0 %2120 }
 0x2c0   : > { %4661 = vmatpush3.bf16.msra.mxu1 %v11160_v7  ;;  %v9220_v20 = vsel %vm1689_vm7, %v11163_v51, %v2087_v1  ;;  %v1710_v1 = vsel %vm1689_vm7, %v1563_v43, %v1580_v22  ;;  %v11172_v43 = vld [vmem:[#allocation125_spill] sm:$0xff] }
 0x2c1   : > { %4662 = vmatprep.subr.bf16.mxu1 %v11167_v27  ;;  %v1712_v51 = vsel %vm1693_vm8, %v1710_v1, %v1597_v16  ;;  %v9255_v16 = vld [vmem:[%s10133_s3] sm:$0xff]   ;;  %v11173_v5 = vpack.c.b16 %v11171_v57, %v11172_v43  ;;  %v9279_v1 = vld [vmem:[%s10133_s3 + $0x50] sm:$0xff]   ;;  %v2367_v43 = vsel %vm1387_vm0, %v9122_v63, %v9119_v37 }
 0x2c2   : > { %v9245_v61 = vsel %vm1696_vm9, %v1712_v51, %v1614_v36  ;;  %v9261_v36 = vld [vmem:[%s10133_s3 + $0x48] sm:$0xff]  }
 0x2c3   : > { %11170 = vst [vmem:[#allocation143_spill] sm:$0xff] %v9245_v61 }
 0x2c4   : > { %4663 = vmatpush3.bf16.msra.mxu1 %v11169_v47 }
 0x2c5   : > { %v9231_v39 = vpop.permute.xlu1 %2095  ;;  %v9233_v60 = vpop.permute.xlu0 %2129  ;;  %4670 = vmatprep.subr.bf16.mxu1 %v9241_v46 }
 0x2c7   : > { %1995 = vmatmul.mubr.bf16.vlgmr.msra.gmra.mrb[4].mxu1 %v9245_v61 }
 0x2c8   : > { %4671 = vmatpush3.bf16.msra.mxu1 %v9255_v16  ;;  %2212 = vmatprep.mubr.bf16.mxu1 %v2173_v42 }
 0x2c9   : > { %v9250_v22 = vpop.permute.xlu0 %2138  ;;  %4672 = vmatprep.subr.bf16.mxu1 %v9261_v36 }
 0x2ca   : > { %v9248_v35 = vpop.permute.xlu1 %2104 }
 0x2cc   : > { %4673 = vmatpush3.bf16.msra.mxu1 %v9269_v50 }
 0x2cd   : > { %4674 = vmatprep.subr.bf16.mxu1 %v9279_v1 }
 0x2ce   : > { %v2277_v25 = vpop.permute.xlu1 %2276  ;;  %v9264_v52 = vpop.permute.xlu0 %2310 }
 0x2cf   : > { %v2400_v29 = vsel %vm1689_vm7, %v11173_v5, %v2277_v25  ;;  %v9294_v25 = vld [vmem:[%s10133_s3 + $0x58] sm:$0xff]   ;;  %v2368_v5 = vsel %vm1390_vm3, %v9130_v3, %v2367_v43 }
 0x2d0   : > { %4675 = vmatpush3.bf16.msra.mxu1 %v9287_v62 }
 0x2d1   : > { %4676 = vmatprep.subr.bf16.mxu1 %v9294_v25 }
 0x2d2   : > { %v2286_v51 = vpop.permute.xlu1 %2285 }
 0x2d3   : > { %v9282_v42 = vpop.permute.xlu0 %2319  ;;  %v2402_v57 = vsel %vm1693_vm8, %v2400_v29, %v2286_v51  ;;  %v2364_v29 = vsel %vm1399_vm2, %v9089_v30, %v11117_v59  ;;  %v2369_v51 = vsel %vm1393_vm1, %v9147_v55, %v2368_v5 }
 0x2d4   : > { %4677 = vmatpush3.bf16.msra.mxu1 %v9312_v26  ;;  %v2365_v43 = vsel %vm1402_vm5, %v9092_v24, %v2364_v29  ;;  %v11175_v29 = vld [vmem:[#allocation53_spill] sm:$0xff] }
 0x2d5   : > { %4678 = vmatprep.subr.bf16.mxu1 %v9323_v13  ;;  %v2366_v5 = vsel %vm1405_vm6, %v9112_v31, %v2365_v43  ;;  %v2106_v43 = vsel %vm1393_vm1, %v9089_v30, %v11117_v59 }
 0x2d6   : > { %v2370_v45 = vpack.c.b16 %v2369_v51, %v2366_v5  ;;  %v9342_v51 = vld [vmem:[%s10133_s3 + $0x68] sm:$0xff]   ;;  %v2107_v5 = vsel %vm1396_vm4, %v9092_v24, %v2106_v43 }
 0x2d7   : > { %v2295_v19 = vpop.permute.xlu1 %2294  ;;  %v9302_v56 = vpop.permute.xlu0 %2328 }
 0x2d8   : > { %v9316_v6 = vsel %vm1696_vm9, %v2402_v57, %v2295_v19  ;;  %v9331_v19 = vld [vmem:[%s10133_s3 + $0x20] sm:$0xff]  }
 0x2d9   : > { %4679 = vmatpush3.bf16.msra.mxu1 %v9331_v19  ;;  %v11174_v57 = vld [vmem:[#allocation5_spill] sm:$0xff] }
 0x2da   : > { %v11176_v40 = vpack.c.b16 %v11174_v57, %v11175_v29  ;;  %4680 = vmatprep.subr.bf16.mxu1 %v9342_v51 }
 0x2db   : > { %v2345_v41 = vpop.permute.xlu1 %2344 }
 0x2dc   : > { %v2379_v21 = vpop.permute.xlu0 %2378  ;;  %v2414_v61 = vsel %vm1689_vm7, %v11176_v40, %v2345_v41  ;;  %v2108_v41 = vsel %vm1399_vm2, %v9112_v31, %v2107_v5  ;;  %v9368_v31 = vld [vmem:[%s10133_s3 + $0x70] sm:$0xff]  }
 0x2dd   : > { %v2421_v8 = vsel %vm1689_vm7, %v2370_v45, %v2379_v21  ;;  %v2111_v21 = vsel %vm1387_vm0, %v9147_v55, %v9130_v3  ;;  %v9358_v45 = vld [vmem:[%s10133_s3 + $0x28] sm:$0xff]   ;;  %v2109_v40 = vsel %vm1402_vm5, %v9119_v37, %v2108_v41  ;;  %v9381_v37 = vld [vmem:[%s10133_s3 + $0x30] sm:$0xff]  }
 0x2de   : > { %4681 = vmatpush3.bf16.msra.mxu1 %v9358_v45  ;;  %v2110_v59 = vsel %vm1405_vm6, %v9122_v63, %v2109_v40 }
 0x2df   : > { %v2354_v0 = vpop.permute.xlu1 %2353  ;;  %4682 = vmatprep.subr.bf16.mxu1 %v9368_v31  ;;  %v2112_v3 = vpack.c.b16 %v2111_v21, %v2110_v59 }
 0x2e0   : > { %v2388_v57 = vpop.permute.xlu0 %2387  ;;  %v2416_v30 = vsel %vm1693_vm8, %v2414_v61, %v2354_v0  ;;  %v11177_v0 = vld [vmem:[#allocation154_spill] sm:$0xff] }
 0x2e1   : > { %v2423_v24 = vsel %vm1693_vm8, %v2421_v8, %v2388_v57  ;;  %v11178_v61 = vld [vmem:[#allocation110_spill] sm:$0xff]  ;;  %v2163_v41 = vsel %vm1689_vm7, %v2112_v3, %v9213_v49 }
 0x2e2   : > { %v11179_v8 = vpack.c.b16 %v11177_v0, %v11178_v61  ;;  %4683 = vmatpush3.bf16.msra.mxu1 %v9381_v37  ;;  %v9423_v61 = vld [vmem:[%s10133_s3 + $0xc0] sm:$0xff]  }
 0x2e4   : > { %v2363_v55 = vpop.permute.xlu1 %2362  ;;  %v2397_v29 = vpop.permute.xlu0 %2396  ;;  %v2142_v43 = vsel %vm1689_vm7, %v11179_v8, %v9193_v58  ;;  %v9397_v58 = vld [vmem:[%s10133_s3 + $0x78] sm:$0xff]  }
 0x2e5   : > { %v9385_v5 = vsel %vm1696_vm9, %v2416_v30, %v2363_v55  ;;  %v9388_v63 = vsel %vm1696_vm9, %v2423_v24, %v2397_v29  ;;  %v2144_v57 = vsel %vm1693_vm8, %v2142_v43, %v9205_v18  ;;  %4684 = vmatprep.subr.bf16.mxu1 %v9397_v58  ;;  %v2165_v30 = vsel %vm1693_vm8, %v2163_v41, %v9233_v60  ;;  %v11181_v24 = vld [vmem:[#allocation23_spill] sm:$0xff]  ;;  %v9415_v29 = vld [vmem:[%s10133_s3 + $0x38] sm:$0xff]  }
 0x2e6   : > { %11180 = vst [vmem:[#allocation157_spill] sm:$0xff] %v9385_v5  ;;  %v2146_v21 = vsel %vm1696_vm9, %v2144_v57, %v9209_v53  ;;  %v2550_v40 = vpack.c.b16 %v11181_v24, %v11181_v24  ;;  %v11182_v18 = vld [vmem:[#allocation7_spill] sm:$0xff]  ;;  %v9410_v49 = vsel %vm1696_vm9, %v2165_v30, %v9250_v22  ;;  %4685 = vmatpush3.bf16.msra.mxu1 %v9415_v29  ;;  %v9430_v57 = vld [vmem:[%s10133_s3 + $0x80] sm:$0xff]   ;;  %v9440_v30 = vld [vmem:[%s10133_s3 + $0xc8] sm:$0xff]  }
 0x2e7   : > { %v2624_v59 = vpack.c.b16 %v11182_v18, %v11182_v18  ;;  %11183 = vst [vmem:[#allocation76_spill] sm:$0xff] %v9410_v49  ;;  %v2172_v0 = vrot.slane %v2146_v21, 1  ;;  %4692 = vmatprep.subr.bf16.mxu1 %v9423_v61  ;;  %v10386_v22 = vrot.slane %v9410_v49, 1  ;;  %v9446_v18 = vld [vmem:[%s10133_s3 + $0x88] sm:$0xff]   ;;  %v11187_v49 = vpack.c.b16 %v8930_v32, %v8819_v48  ;;  %v9498_v5 = vld [vmem:[%s10133_s3 + $0xa0] sm:$0xff]  }
 0x2e8   : > { %v2567_v3 = vpop.permute.xlu1 %2566  ;;  %v2641_v55 = vpop.permute.xlu0 %2640 }
 0x2e9   : > { %v2678_v53 = vsel %vm1689_vm7, %v2550_v40, %v2567_v3  ;;  %v2686_v60 = vsel %vm1689_vm7, %v2624_v59, %v2641_v55  ;;  %2213 = vmatmul.mubr.bf16.vlgmr.msra.gmra.mrb[8].mxu1 %v2172_v0  ;;  %v9458_v55 = vld [vmem:[%s10133_s3 + $0xd0] sm:$0xff]  }
 0x2ea   : > { %4693 = vmatpush3.bf16.msra.mxu1 %v9430_v57  ;;  %2252 = vmatprep.mubr.bf16.mxu1 %v10386_v22  ;;  %v9464_v0 = vld [vmem:[%s10133_s3 + $0x90] sm:$0xff]  }
 0x2eb   : > { %4694 = vmatprep.subr.bf16.mxu1 %v9440_v30 }
 0x2ec   : > { %v2584_v8 = vpop.permute.xlu1 %2583  ;;  %v2658_v43 = vpop.permute.xlu0 %2657 }
 0x2ed   : > { %v2680_v41 = vsel %vm1693_vm8, %v2678_v53, %v2584_v8  ;;  %v2688_v21 = vsel %vm1693_vm8, %v2686_v60, %v2658_v43  ;;  %v9470_v8 = vld [vmem:[%s10133_s3 + $0xd8] sm:$0xff]  }
 0x2ee   : > { %4695 = vmatpush3.bf16.msra.mxu1 %v9446_v18 }
 0x2ef   : > { %4696 = vmatprep.subr.bf16.mxu1 %v9458_v55 }
 0x2f0   : > { %v2601_v24 = vpop.permute.xlu1 %2600  ;;  %v2675_v40 = vpop.permute.xlu0 %2674 }
 0x2f1   : > { %v9450_v59 = vsel %vm1696_vm9, %v2680_v41, %v2601_v24  ;;  %v9453_v3 = vsel %vm1696_vm9, %v2688_v21, %v2675_v40  ;;  %v9476_v21 = vld [vmem:[%s10133_s3 + $0x98] sm:$0xff]   ;;  %v9482_v24 = vld [vmem:[%s10133_s3 + $0xe0] sm:$0xff]   ;;  %v11186_v40 = vpack.c.b16 %v8925_v14, %v8813_v10 }
 0x2f2   : > { %11184 = vst [vmem:[#allocation71_spill] sm:$0xff] %v9450_v59  ;;  %11185 = vst [vmem:[#allocation72_spill] sm:$0xff] %v9453_v3  ;;  %4697 = vmatpush3.bf16.msra.mxu1 %v9464_v0 }
 0x2f3   : > { %4698 = vmatprep.subr.bf16.mxu1 %v9470_v8 }
 0x2f4   : > { %v2789_v53 = vpop.permute.xlu1 %2788  ;;  %v2823_v60 = vpop.permute.xlu0 %2822 }
 0x2f5   : > { %v2844_v22 = vsel %vm1689_vm7, %v11186_v40, %v2789_v53  ;;  %v2851_v59 = vsel %vm1689_vm7, %v11187_v49, %v2823_v60  ;;  %v9512_v49 = vld [vmem:[%s10133_s3 + $0xe8] sm:$0xff]  }
 0x2f6   : > { %4699 = vmatpush3.bf16.msra.mxu1 %v9476_v21 }
 0x2f7   : > { %4700 = vmatprep.subr.bf16.mxu1 %v9482_v24 }
 0x2f8   : > { %v2798_v43 = vpop.permute.xlu1 %2797  ;;  %v2832_v41 = vpop.permute.xlu0 %2831 }
 0x2f9   : > { %v2846_v3 = vsel %vm1693_vm8, %v2844_v22, %v2798_v43  ;;  %v2853_v9 = vsel %vm1693_vm8, %v2851_v59, %v2832_v41  ;;  %v11189_v59 = vld [vmem:[#allocation123_spill] sm:$0xff]  ;;  %v9573_v43 = vld [vmem:[%s10133_s3 + $0xa8] sm:$0xff]  }
 0x2fa   : > { %4701 = vmatpush3.bf16.msra.mxu1 %v9498_v5  ;;  %v9580_v41 = vld [vmem:[%s10133_s3 + $0xf0] sm:$0xff]  }
 0x2fb   : > { %4702 = vmatprep.subr.bf16.mxu1 %v9512_v49 }
 0x2fc   : > { %v2807_v44 = vpop.permute.xlu1 %2806  ;;  %v2841_v54 = vpop.permute.xlu0 %2840 }
 0x2fd   : > { %v9502_v10 = vsel %vm1696_vm9, %v2846_v3, %v2807_v44  ;;  %v9505_v48 = vsel %vm1696_vm9, %v2853_v9, %v2841_v54  ;;  %v2158_v44 = vsel %vm1693_vm8, %v9220_v20, %v9231_v39  ;;  %v11188_v54 = vld [vmem:[#allocation124_spill] sm:$0xff]  ;;  %v11191_v20 = vpack.c.b16 %v8991_v28, %v8987_v11 }
 0x2fe   : > { %v2858_v14 = vrot.slane %v9502_v10, 1  ;;  %v2859_v32 = vrot.slane %v9505_v48, 1  ;;  %4703 = vmatpush3.bf16.msra.mxu1 %v11158_v17  ;;  %v11190_v17 = vpack.c.b16 %v11188_v54, %v11189_v59  ;;  %v9591_v54 = vld [vmem:[%s10133_s3 + $0xb0] sm:$0xff]  }
 0x2ff   : > { %4704 = vmatprep.subr.bf16.mxu1 %v11159_v15  ;;  %v9536_v15 = vsel %vm1696_vm9, %v2158_v44, %v9248_v35 }
 0x300   : > { %2934 = vmatprep.mubr.bf16.mxu0 %v2859_v32  ;;  %v2993_v22 = vpop.permute.xlu0 %2992  ;;  %v2407_v3 = vsel %vm1689_vm7, %v11190_v17, %v9264_v52  ;;  %v2959_v28 = vpop.permute.xlu1 %2958  ;;  %v9599_v17 = vld [vmem:[%s10133_s3 + $0xf8] sm:$0xff]  }
 0x301   : > { %2935 = vmatmul.mubr.bf16.vlgmr.msra.gmra.mrb[128].mxu0 %v2858_v14  ;;  %v3021_v39 = vsel %vm1689_vm7, %v11191_v20, %v2993_v22 }
 0x302   : > { %4869 = vmatpush3.bf16.msra.mxu0 %v9430_v57  ;;  %4705 = vmatpush3.bf16.msra.mxu1 %v11160_v7  ;;  %v2409_v7 = vsel %vm1693_vm8, %v2407_v3, %v9282_v42  ;;  %v2174_v42 = vrot.slane %v9536_v15, 1 }
 0x303   : > { %4870 = vmatprep.subr.bf16.mxu0 %v9440_v30  ;;  %4706 = vmatprep.subr.bf16.mxu1 %v11167_v27  ;;  %v2411_v52 = vsel %vm1696_vm9, %v2409_v7, %v9302_v56  ;;  %v9611_v7 = vld [vmem:[%s10133_s3 + $0xb8] sm:$0xff]  }
 0x304   : > { %v3002_v9 = vpop.permute.xlu0 %3001  ;;  %v2431_v11 = vrot.slane %v2411_v52, 2 }
 0x305   : > { %v3023_v53 = vsel %vm1693_vm8, %v3021_v39, %v3002_v9  ;;  %v11192_v9 = vpack.c.b16 %v8983_v34, %v8963_v38  ;;  %v3218_v34 = vpack.c.b16 %v9029_v33, %v9029_v33 }
 0x306   : > { %4871 = vmatpush3.bf16.msra.mxu0 %v9446_v18  ;;  %4707 = vmatpush3.bf16.msra.mxu1 %v11169_v47  ;;  %v2968_v47 = vpop.permute.xlu1 %2967 }
 0x307   : > { %4872 = vmatprep.subr.bf16.mxu0 %v9458_v55  ;;  %4714 = vmatprep.subr.bf16.mxu1 %v9241_v46  ;;  %v3014_v44 = vsel %vm1689_vm7, %v11192_v9, %v2959_v28 }
 0x308   : > { %v3011_v27 = vpop.permute.xlu0 %3010  ;;  %v3016_v59 = vsel %vm1693_vm8, %v3014_v44, %v2968_v47  ;;  %v3143_v47 = vsel %vm1405_vm6, %v9045_v12, %v9016_v2 }
 0x309   : > { %v9550_v35 = vsel %vm1696_vm9, %v3023_v53, %v3011_v27  ;;  %2253 = vmatmul.mubr.bf16.vlgmr.msra.gmra.mrb[12].mxu1 %v2174_v42  ;;  %v2430_v53 = vrot.slane %v9316_v6, 2  ;;  %v2433_v27 = vrot.slane %v9388_v63, 2  ;;  %v3144_v44 = vpack.c.b16 %v3143_v47, %v3143_v47  ;;  %v11196_v47 = vld [vmem:[#allocation141_spill] sm:$0xff] }
 0x30a   : > { %v3029_v60 = vrot.slane %v9550_v35, 2  ;;  %4873 = vmatpush3.bf16.msra.mxu0 %v9464_v0  ;;  %4715 = vmatpush3.bf16.msra.mxu1 %v9255_v16  ;;  %v2977_v22 = vpop.permute.xlu1 %2976 }
 0x30b   : > { %4874 = vmatprep.subr.bf16.mxu0 %v9470_v8  ;;  %2470 = vmatprep.mubr.bf16.mxu1 %v2431_v11  ;;  %v9603_v38 = vsel %vm1696_vm9, %v3016_v59, %v2977_v22  ;;  %v11193_v22 = vpack.c.b16 %v9065_v4, %v8908_v23 }
 0x30c   : > { %3104 = vmatprep.mubr.bf16.mxu0 %v3029_v60  ;;  %4716 = vmatprep.subr.bf16.mxu1 %v9261_v36  ;;  %v3235_v56 = vpop.permute.xlu0 %3234  ;;  %v3028_v20 = vrot.slane %v9603_v38, 2  ;;  %v5178_v38 = vld [vmem:[%s10135_s5 + $0x48] sm:$0xff]  }
 0x30d   : > { %v3280_v39 = vsel %vm1689_vm7, %v3218_v34, %v3235_v56 }
 0x30e   : > { %4875 = vmatpush3.bf16.msra.mxu0 %v9476_v21  ;;  %4717 = vmatpush3.bf16.msra.mxu1 %v9269_v50  ;;  %v3161_v6 = vpop.permute.xlu1 %3160 }
 0x30f   : > { %4876 = vmatprep.subr.bf16.mxu0 %v9482_v24  ;;  %4718 = vmatprep.subr.bf16.mxu1 %v9279_v1  ;;  %v3272_v12 = vsel %vm1689_vm7, %v3144_v44, %v3161_v6 }
 0x310   : > { %v3252_v40 = vpop.permute.xlu0 %3251 }
 0x311   : > { %v3282_v33 = vsel %vm1693_vm8, %v3280_v39, %v3252_v40  ;;  %v11194_v39 = vld [vmem:[#allocation157_spill] sm:$0xff] }
 0x312   : > { %4877 = vmatpush3.bf16.msra.mxu0 %v9498_v5  ;;  %4719 = vmatpush3.bf16.msra.mxu1 %v9287_v62  ;;  %v3178_v56 = vpop.permute.xlu1 %3177 }
 0x313   : > { %4878 = vmatprep.subr.bf16.mxu0 %v9512_v49  ;;  %4720 = vmatprep.subr.bf16.mxu1 %v9294_v25  ;;  %v3274_v23 = vsel %vm1693_vm8, %v3272_v12, %v3178_v56 }
 0x314   : > { %v3269_v3 = vpop.permute.xlu0 %3268 }
 0x315   : > { %v3284_v52 = vsel %vm1696_vm9, %v3282_v33, %v3269_v3  ;;  %v2432_v33 = vrot.slane %v11194_v39, 2 }
 0x316   : > { %4879 = vmatpush3.bf16.msra.mxu0 %v9573_v43  ;;  %4721 = vmatpush3.bf16.msra.mxu1 %v9312_v26  ;;  %v3195_v34 = vpop.permute.xlu1 %3194 }
 0x317   : > { %4880 = vmatprep.subr.bf16.mxu0 %v9580_v41  ;;  %4722 = vmatprep.subr.bf16.mxu1 %v9323_v13  ;;  %v3276_v4 = vsel %vm1696_vm9, %v3274_v23, %v3195_v34  ;;  %v11199_v34 = vld [vmem:[#allocation142_spill] sm:$0xff] }
 0x318   : > { %v3417_v11 = vpop.permute.xlu0 %3416 }
 0x319   : > { %v3445_v9 = vsel %vm1689_vm7, %v11193_v22, %v3417_v11 }
 0x31a   : > { %4881 = vmatpush3.bf16.msra.mxu0 %v9591_v54  ;;  %4723 = vmatpush3.bf16.msra.mxu1 %v9331_v19 }
 0x31b   : > { %4882 = vmatprep.subr.bf16.mxu0 %v9599_v17  ;;  %4724 = vmatprep.subr.bf16.mxu1 %v9342_v51 }
 0x31c   : > { %v3426_v28 = vpop.permute.xlu0 %3425 }
 0x31d   : > { %v3447_v59 = vsel %vm1693_vm8, %v3445_v9, %v3426_v28 }
 0x31e   : > { %4883 = vmatpush3.bf16.msra.mxu0 %v9611_v7  ;;  %4725 = vmatpush3.bf16.msra.mxu1 %v9358_v45 }
 0x31f   : > { %4912 = vmatprep.subr.bf16.mxu0 %v9423_v61  ;;  %4726 = vmatprep.subr.bf16.mxu1 %v9368_v31 }
 0x320   : > { %v3435_v40 = vpop.permute.xlu0 %3434 }
 0x321   : > { %3105 = vmatmul.mubr.bf16.vlgmr.msra.gmra.mrb[132].mxu0 %v3028_v20  ;;  %v3449_v2 = vsel %vm1696_vm9, %v3447_v59, %v3435_v40  ;;  %v11197_v40 = vld [vmem:[#allocation32_spill] sm:$0xff] }
 0x322   : > { %4913 = vmatpush3.bf16.msra.mxu0 %v9430_v57  ;;  %3358 = vmatprep.mubr.bf16.mxu0 %v3284_v52  ;;  %v3453_v3 = vrot.slane %v3449_v2, 1  ;;  %v3383_v52 = vpop.permute.xlu1 %3382  ;;  %v11198_v22 = vpack.c.b16 %v11196_v47, %v11197_v40  ;;  %v11200_v2 = vld [vmem:[#allocation48_spill] sm:$0xff] }
 0x323   : > { %4914 = vmatprep.subr.bf16.mxu0 %v9440_v30  ;;  %4727 = vmatpush3.bf16.msra.mxu1 %v9381_v37  ;;  %v11201_v12 = vpack.c.b16 %v11199_v34, %v11200_v2 }
 0x324   : > { %4728 = vmatprep.subr.bf16.mxu1 %v9397_v58  ;;  %v3587_v11 = vpop.permute.xlu0 %3586  ;;  %v3438_v9 = vsel %vm1689_vm7, %v11198_v22, %v3383_v52 }
 0x325   : > { %v3615_v23 = vsel %vm1689_vm7, %v11201_v12, %v3587_v11  ;;  %v11202_v11 = vld [vmem:[#allocation143_spill] sm:$0xff] }
 0x326   : > { %4915 = vmatpush3.bf16.msra.mxu0 %v9446_v18  ;;  %v3392_v6 = vpop.permute.xlu1 %3391 }
 0x327   : > { %4916 = vmatprep.subr.bf16.mxu0 %v9458_v55  ;;  %4729 = vmatpush3.bf16.msra.mxu1 %v9415_v29  ;;  %v3440_v59 = vsel %vm1693_vm8, %v3438_v9, %v3392_v6 }
 0x328   : > { %4736 = vmatprep.subr.bf16.mxu1 %v9423_v61  ;;  %v3596_v28 = vpop.permute.xlu0 %3595 }
 0x32a   : > { %4917 = vmatpush3.bf16.msra.mxu0 %v9464_v0  ;;  %2471 = vmatmul.mubr.bf16.vlgmr.msra.gmra.mrb[16].mxu1 %v2430_v53  ;;  %v11195_v53 = vld [vmem:[#allocation155_spill] sm:$0xff]  ;;  %v3401_v56 = vpop.permute.xlu1 %3400 }
 0x32b   : > { %4918 = vmatprep.subr.bf16.mxu0 %v9470_v8  ;;  %4737 = vmatpush3.bf16.msra.mxu1 %v9430_v57 }
 0x32c   : > { %2510 = vmatprep.mubr.bf16.mxu1 %v2433_v27  ;;  %4738 = vmatprep.subr.bf16.mxu1 %v9440_v30  ;;  %v3605_v44 = vpop.permute.xlu0 %3604 }
 0x32e   : > { %4919 = vmatpush3.bf16.msra.mxu0 %v9476_v21 }
 0x32f   : > { %4920 = vmatprep.subr.bf16.mxu0 %v9482_v24  ;;  %4739 = vmatpush3.bf16.msra.mxu1 %v9446_v18 }
 0x330   : > { %4740 = vmatprep.subr.bf16.mxu1 %v9458_v55 }
 0x332   : > { %4921 = vmatpush3.bf16.msra.mxu0 %v9498_v5 }
 0x333   : > { %4922 = vmatprep.subr.bf16.mxu0 %v9512_v49  ;;  %4741 = vmatpush3.bf16.msra.mxu1 %v9464_v0 }
 0x334   : > { %4742 = vmatprep.subr.bf16.mxu1 %v9470_v8 }
 0x336   : > { %4923 = vmatpush3.bf16.msra.mxu0 %v9573_v43 }
 0x337   : > { %4924 = vmatprep.subr.bf16.mxu0 %v9580_v41  ;;  %4743 = vmatpush3.bf16.msra.mxu1 %v9476_v21 }
 0x338   : > { %4744 = vmatprep.subr.bf16.mxu1 %v9482_v24 }
 0x33a   : > { %4925 = vmatpush3.bf16.msra.mxu0 %v9591_v54 }
 0x33b   : > { %4926 = vmatprep.subr.bf16.mxu0 %v9599_v17  ;;  %4745 = vmatpush3.bf16.msra.mxu1 %v9498_v5 }
 0x33c   : > { %4746 = vmatprep.subr.bf16.mxu1 %v9512_v49 }
 0x33e   : > { %4927 = vmatpush3.bf16.msra.mxu0 %v9611_v7 }
 0x33f   : > { %4956 = vmatprep.subr.bf16.mxu0 %v9423_v61  ;;  %4747 = vmatpush3.bf16.msra.mxu1 %v9573_v43 }
 0x340   : > { %4748 = vmatprep.subr.bf16.mxu1 %v9580_v41 }
 0x341   : > { %3359 = vmatmul.mubr.bf16.vlgmr.msra.gmra.mrb[136].mxu0 %v3276_v4  ;;  %v3442_v4 = vsel %vm1696_vm9, %v3440_v59, %v3401_v56  ;;  %v11203_v56 = vld [vmem:[#allocation72_spill] sm:$0xff] }
 0x342   : > { %4957 = vmatpush3.bf16.msra.mxu0 %v9430_v57  ;;  %3528 = vmatprep.mubr.bf16.mxu0 %v3453_v3  ;;  %v3617_v3 = vsel %vm1693_vm8, %v3615_v23, %v3596_v28  ;;  %v3553_v28 = vpop.permute.xlu1 %3552 }
 0x343   : > { %4958 = vmatprep.subr.bf16.mxu0 %v9440_v30  ;;  %4749 = vmatpush3.bf16.msra.mxu1 %v9591_v54  ;;  %v3619_v52 = vsel %vm1696_vm9, %v3617_v3, %v3605_v44 }
 0x344   : > { %4750 = vmatprep.subr.bf16.mxu1 %v9599_v17  ;;  %v3623_v6 = vrot.slane %v3619_v52, 2 }
 0x346   : > { %4959 = vmatpush3.bf16.msra.mxu0 %v9446_v18 }
 0x347   : > { %4960 = vmatprep.subr.bf16.mxu0 %v9458_v55  ;;  %4751 = vmatpush3.bf16.msra.mxu1 %v9611_v7 }
 0x348   : > { %4758 = vmatprep.subr.bf16.mxu1 %v9241_v46 }
 0x34a   : > { %4961 = vmatpush3.bf16.msra.mxu0 %v9464_v0  ;;  %2511 = vmatmul.mubr.bf16.vlgmr.msra.gmra.mrb[20].mxu1 %v2432_v33 }
 0x34b   : > { %4962 = vmatprep.subr.bf16.mxu0 %v9470_v8  ;;  %4759 = vmatpush3.bf16.msra.mxu1 %v9255_v16 }
 0x34c   : > { %2724 = vmatprep.mubr.bf16.mxu1 %v11195_v53  ;;  %4760 = vmatprep.subr.bf16.mxu1 %v9261_v36  ;;  %v3452_v53 = vrot.slane %v3442_v4, 1 }
 0x34e   : > { %4963 = vmatpush3.bf16.msra.mxu0 %v9476_v21 }
 0x34f   : > { %4964 = vmatprep.subr.bf16.mxu0 %v9482_v24  ;;  %4761 = vmatpush3.bf16.msra.mxu1 %v9269_v50 }
 0x350   : > { %4762 = vmatprep.subr.bf16.mxu1 %v9279_v1 }
 0x352   : > { %4965 = vmatpush3.bf16.msra.mxu0 %v9498_v5 }
 0x353   : > { %4966 = vmatprep.subr.bf16.mxu0 %v9512_v49  ;;  %4763 = vmatpush3.bf16.msra.mxu1 %v9287_v62 }
 0x354   : > { %4764 = vmatprep.subr.bf16.mxu1 %v9294_v25 }
 0x356   : > { %4967 = vmatpush3.bf16.msra.mxu0 %v9573_v43 }
 0x357   : > { %4968 = vmatprep.subr.bf16.mxu0 %v9580_v41  ;;  %4765 = vmatpush3.bf16.msra.mxu1 %v9312_v26 }
 0x358   : > { %4766 = vmatprep.subr.bf16.mxu1 %v9323_v13 }
 0x35a   : > { %4969 = vmatpush3.bf16.msra.mxu0 %v9591_v54 }
 0x35b   : > { %4970 = vmatprep.subr.bf16.mxu0 %v9599_v17  ;;  %4767 = vmatpush3.bf16.msra.mxu1 %v9331_v19 }
 0x35c   : > { %4768 = vmatprep.subr.bf16.mxu1 %v9342_v51 }
 0x35e   : > { %4971 = vmatpush3.bf16.msra.mxu0 %v9611_v7 }
 0x35f   : > { %5000 = vmatprep.subr.bf16.mxu0 %v9423_v61  ;;  %4769 = vmatpush3.bf16.msra.mxu1 %v9358_v45 }
 0x360   : > { %4770 = vmatprep.subr.bf16.mxu1 %v9368_v31 }
 0x361   : > { %3529 = vmatmul.mubr.bf16.vlgmr.msra.gmra.mrb[140].mxu0 %v3452_v53 }
 0x362   : > { %5001 = vmatpush3.bf16.msra.mxu0 %v9430_v57  ;;  %3698 = vmatprep.mubr.bf16.mxu0 %v3623_v6 }
 0x363   : > { %5002 = vmatprep.subr.bf16.mxu0 %v9440_v30  ;;  %4771 = vmatpush3.bf16.msra.mxu1 %v9381_v37 }
 0x364   : > { %4772 = vmatprep.subr.bf16.mxu1 %v9397_v58 }
 0x366   : > { %5003 = vmatpush3.bf16.msra.mxu0 %v9446_v18 }
 0x367   : > { %5004 = vmatprep.subr.bf16.mxu0 %v9458_v55  ;;  %4773 = vmatpush3.bf16.msra.mxu1 %v9415_v29 }
 0x368   : > { %4780 = vmatprep.subr.bf16.mxu1 %v9423_v61  ;;  %v3562_v61 = vpop.permute.xlu1 %3561 }
 0x36a   : > { %5005 = vmatpush3.bf16.msra.mxu0 %v9464_v0  ;;  %2725 = vmatmul.mubr.bf16.vlgmr.msra.gmra.mrb[24].mxu1 %v11202_v11 }
 0x36b   : > { %5006 = vmatprep.subr.bf16.mxu0 %v9470_v8  ;;  %4781 = vmatpush3.bf16.msra.mxu1 %v9430_v57 }
 0x36c   : > { %2764 = vmatprep.mubr.bf16.mxu1 %v11203_v56  ;;  %4782 = vmatprep.subr.bf16.mxu1 %v9440_v30  ;;  %v3571_v57 = vpop.permute.xlu1 %3570  ;;  %v11204_v30 = vld [vmem:[#allocation57_spill] sm:$0xff] }
 0x36e   : > { %5007 = vmatpush3.bf16.msra.mxu0 %v9476_v21 }
 0x36f   : > { %5008 = vmatprep.subr.bf16.mxu0 %v9482_v24  ;;  %4783 = vmatpush3.bf16.msra.mxu1 %v9446_v18  ;;  %v11205_v18 = vld [vmem:[#allocation148_spill] sm:$0xff] }
 0x370   : > { %4784 = vmatprep.subr.bf16.mxu1 %v9458_v55  ;;  %v11206_v47 = vpack.c.b16 %v11204_v30, %v11205_v18 }
 0x372   : > { %5009 = vmatpush3.bf16.msra.mxu0 %v9498_v5  ;;  %v3608_v40 = vsel %vm1689_vm7, %v11206_v47, %v3553_v28 }
 0x373   : > { %5010 = vmatprep.subr.bf16.mxu0 %v9512_v49  ;;  %4785 = vmatpush3.bf16.msra.mxu1 %v9464_v0  ;;  %v3610_v55 = vsel %vm1693_vm8, %v3608_v40, %v3562_v61 }
 0x374   : > { %4786 = vmatprep.subr.bf16.mxu1 %v9470_v8  ;;  %v3612_v0 = vsel %vm1696_vm9, %v3610_v55, %v3571_v57 }
 0x375   : > { %v3622_v8 = vrot.slane %v3612_v0, 2 }
 0x376   : > { %5011 = vmatpush3.bf16.msra.mxu0 %v9573_v43 }
 0x377   : > { %5012 = vmatprep.subr.bf16.mxu0 %v9580_v41  ;;  %4787 = vmatpush3.bf16.msra.mxu1 %v9476_v21 }
 0x378   : > { %4788 = vmatprep.subr.bf16.mxu1 %v9482_v24 }
 0x37a   : > { %5013 = vmatpush3.bf16.msra.mxu0 %v9591_v54  ;;  %v4642_v21 = vpop.f32.mrb[0].mxu1 }
 0x37b   : > { %5014 = vmatprep.subr.bf16.mxu0 %v9599_v17  ;;  %4789 = vmatpush3.bf16.msra.mxu1 %v9498_v5  ;;  %v4643_v22 = vpop.f32.mrb[1].mxu1  ;;  %v11207_v5 = vld [vmem:[#allocation71_spill] sm:$0xff] }
 0x37c   : > { %4790 = vmatprep.subr.bf16.mxu1 %v9512_v49  ;;  %v4644_v9 = vadd.f32 %v4643_v22, %v4642_v21  ;;  %v4645_v44 = vpop.f32.mrb[2].mxu1  ;;  %v11208_v49 = vld [vmem:[#allocation76_spill] sm:$0xff] }
 0x37d   : > { %v4646_v24 = vpop.f32.mrb[3].mxu1  ;;  %v11209_v59 = vrot.slane %v11208_v49, 1 }
 0x37e   : > { %5015 = vmatpush3.bf16.msra.mxu0 %v9611_v7 }
 0x37f   : > { %4791 = vmatpush3.bf16.msra.mxu1 %v9573_v43  ;;  %v9778_v43 = vld [vmem:[%s10134_s4] ss:$0 sm:$0xff] }
 0x380   : > { %4792 = vmatprep.subr.bf16.mxu1 %v9580_v41 }
 0x381   : > { %3699 = vmatmul.mubr.bf16.vlgmr.msra.gmra.mrb[144].mxu0 %v3622_v8 }
 0x383   : > { %4793 = vmatpush3.bf16.msra.mxu1 %v9591_v54 }
 0x384   : > { %4794 = vmatprep.subr.bf16.mxu1 %v9599_v17  ;;  %v1957_v17 = vadd.f32 %v4644_v9, %v9778_v43 }
 0x387   : > { %4795 = vmatpush3.bf16.msra.mxu1 %v9611_v7 }
 0x388   : > { %4802 = vmatprep.subr.bf16.mxu1 %v9241_v46 }
 0x38a   : > { %2765 = vmatmul.mubr.bf16.vlgmr.msra.gmra.mrb[28].mxu1 %v11207_v5 }
 0x38b   : > { %4803 = vmatpush3.bf16.msra.mxu1 %v9255_v16  ;;  %2894 = vmatprep.mubr.bf16.mxu1 %v11209_v59  ;;  %v5180_v59 = vld [vmem:[%s10135_s5 + $0x50] sm:$0xff]  }
 0x38c   : > { %4804 = vmatprep.subr.bf16.mxu1 %v9261_v36 }
 0x38f   : > { %4805 = vmatpush3.bf16.msra.mxu1 %v9269_v50 }
 0x390   : > { %4806 = vmatprep.subr.bf16.mxu1 %v9279_v1 }
 0x393   : > { %4807 = vmatpush3.bf16.msra.mxu1 %v9287_v62 }
 0x394   : > { %4808 = vmatprep.subr.bf16.mxu1 %v9294_v25 }
 0x397   : > { %4809 = vmatpush3.bf16.msra.mxu1 %v9312_v26 }
 0x398   : > { %4810 = vmatprep.subr.bf16.mxu1 %v9323_v13 }
 0x39a   : > { %v4664_v41 = vpop.f32.mrb[4].mxu1 }
 0x39b   : > { %4811 = vmatpush3.bf16.msra.mxu1 %v9331_v19  ;;  %v4665_v54 = vpop.f32.mrb[5].mxu1 }
 0x39c   : > { %4812 = vmatprep.subr.bf16.mxu1 %v9342_v51  ;;  %v4666_v7 = vadd.f32 %v4665_v54, %v4664_v41  ;;  %v4667_v34 = vpop.f32.mrb[6].mxu1  ;;  %v5181_v41 = vld [vmem:[%s10135_s5 + $0x10] sm:$0xff]   ;;  %v5182_v54 = vld [vmem:[%s10135_s5 + $0x58] sm:$0xff]  }
 0x39d   : > { %v4668_v2 = vpop.f32.mrb[7].mxu1 }
 0x39e   : > { %v9784_v12 = vadd.f32 %v4666_v7, %v1957_v17  ;;  %v5183_v17 = vld [vmem:[%s10135_s5 + $0x18] sm:$0xff]   ;;  %v5184_v7 = vld [vmem:[%s10135_s5 + $0x60] sm:$0xff]  }
 0x39f   : > { %4813 = vmatpush3.bf16.msra.mxu1 %v9358_v45  ;;  %v5185_v2 = vld [vmem:[%s10135_s5 + $0x20] sm:$0xff]  }
 0x3a0   : > { %4814 = vmatprep.subr.bf16.mxu1 %v9368_v31 }
 0x3a3   : > { %4815 = vmatpush3.bf16.msra.mxu1 %v9381_v37 }
 0x3a4   : > { %4816 = vmatprep.subr.bf16.mxu1 %v9397_v58 }
 0x3a7   : > { %4817 = vmatpush3.bf16.msra.mxu1 %v9415_v29 }
 0x3a8   : > { %4846 = vmatprep.subr.bf16.mxu1 %v9241_v46 }
 0x3aa   : > { %2895 = vmatmul.mubr.bf16.vlgmr.msra.gmra.mrb[32].mxu1 %v2174_v42 }
 0x3ab   : > { %4847 = vmatpush3.bf16.msra.mxu1 %v9255_v16  ;;  %3064 = vmatprep.mubr.bf16.mxu1 %v2433_v27 }
 0x3ac   : > { %4848 = vmatprep.subr.bf16.mxu1 %v9261_v36 }
 0x3af   : > { %4849 = vmatpush3.bf16.msra.mxu1 %v9269_v50 }
 0x3b0   : > { %4850 = vmatprep.subr.bf16.mxu1 %v9279_v1 }
 0x3b3   : > { %4851 = vmatpush3.bf16.msra.mxu1 %v9287_v62 }
 0x3b4   : > { %4852 = vmatprep.subr.bf16.mxu1 %v9294_v25 }
 0x3b7   : > { %4853 = vmatpush3.bf16.msra.mxu1 %v9312_v26 }
 0x3b8   : > { %4854 = vmatprep.subr.bf16.mxu1 %v9323_v13 }
 0x3bb   : > { %4855 = vmatpush3.bf16.msra.mxu1 %v9331_v19 }
 0x3bc   : > { %4856 = vmatprep.subr.bf16.mxu1 %v9342_v51  ;;  %v4686_v63 = vpop.f32.mrb[8].mxu1 }
 0x3bd   : > { %v4687_v15 = vpop.f32.mrb[9].mxu1 }
 0x3be   : > { %v4688_v42 = vadd.f32 %v4687_v15, %v4686_v63  ;;  %v4689_v27 = vpop.f32.mrb[10].mxu1  ;;  %v5186_v15 = vld [vmem:[%s10135_s5 + $0x68] sm:$0xff]  }
 0x3bf   : > { %4857 = vmatpush3.bf16.msra.mxu1 %v9358_v45  ;;  %v4690_v23 = vpop.f32.mrb[11].mxu1 }
 0x3c0   : > { %4858 = vmatprep.subr.bf16.mxu1 %v9368_v31  ;;  %v2215_v11 = vadd.f32 %v4688_v42, %v9778_v43 }
 0x3c3   : > { %4859 = vmatpush3.bf16.msra.mxu1 %v9381_v37 }
 0x3c4   : > { %4860 = vmatprep.subr.bf16.mxu1 %v9397_v58 }
 0x3c7   : > { %4861 = vmatpush3.bf16.msra.mxu1 %v9415_v29 }
 0x3c8   : > { %4890 = vmatprep.subr.bf16.mxu1 %v9241_v46 }
 0x3ca   : > { %3065 = vmatmul.mubr.bf16.vlgmr.msra.gmra.mrb[36].mxu1 %v2432_v33 }
 0x3cb   : > { %4891 = vmatpush3.bf16.msra.mxu1 %v9255_v16  ;;  %3318 = vmatprep.mubr.bf16.mxu1 %v11203_v56 }
 0x3cc   : > { %4892 = vmatprep.subr.bf16.mxu1 %v9261_v36 }
 0x3cf   : > { %4893 = vmatpush3.bf16.msra.mxu1 %v9269_v50 }
 0x3d0   : > { %4894 = vmatprep.subr.bf16.mxu1 %v9279_v1 }
 0x3d3   : > { %4895 = vmatpush3.bf16.msra.mxu1 %v9287_v62 }
 0x3d4   : > { %v4840_v4 = vpop.f32.mrb[128].mxu0  ;;  %4896 = vmatprep.subr.bf16.mxu1 %v9294_v25 }
 0x3d5   : > { %v4841_v3 = vpop.f32.mrb[129].mxu0 }
 0x3d6   : > { %v9818_v52 = vadd.f32 %v4841_v3, %v4840_v4  ;;  %v4843_v53 = vpop.f32.mrb[130].mxu0  ;;  %v5187_v4 = vld [vmem:[%s10135_s5 + $0x28] sm:$0xff]   ;;  %v5188_v3 = vld [vmem:[%s10135_s5 + $0x70] sm:$0xff]  }
 0x3d7   : > { %v4844_v39 = vpop.f32.mrb[131].mxu0  ;;  %4897 = vmatpush3.bf16.msra.mxu1 %v9312_v26  ;;  %v5189_v53 = vld [vmem:[%s10135_s5 + $0x30] sm:$0xff]  }
 0x3d8   : > { %4898 = vmatprep.subr.bf16.mxu1 %v9323_v13  ;;  %v5190_v39 = vld [vmem:[%s10135_s5 + $0x78] sm:$0xff]  }
 0x3db   : > { %4899 = vmatpush3.bf16.msra.mxu1 %v9331_v19 }
 0x3dc   : > { %4900 = vmatprep.subr.bf16.mxu1 %v9342_v51  ;;  %v4708_v33 = vpop.f32.mrb[12].mxu1 }
 0x3dd   : > { %v4709_v6 = vpop.f32.mrb[13].mxu1 }
 0x3de   : > { %v4710_v28 = vadd.f32 %v4709_v6, %v4708_v33  ;;  %v4711_v56 = vpop.f32.mrb[14].mxu1 }
 0x3df   : > { %4901 = vmatpush3.bf16.msra.mxu1 %v9358_v45  ;;  %v4712_v61 = vpop.f32.mrb[15].mxu1 }
 0x3e0   : > { %4902 = vmatprep.subr.bf16.mxu1 %v9368_v31  ;;  %v2255_v57 = vadd.f32 %v4710_v28, %v2215_v11  ;;  %v5191_v11 = vld [vmem:[%s10135_s5 + $0x38] sm:$0xff]  }
 0x3e2   : > { %v2260_v30 = vmax.f32 %v2255_v57, 0.0 }
 0x3e3   : > { %4903 = vmatpush3.bf16.msra.mxu1 %v9381_v37 }
 0x3e4   : > { %4904 = vmatprep.subr.bf16.mxu1 %v9397_v58  ;;  %v2261_v18 = vpack.c.bf16 %v2260_v30, %v2260_v30 }
 0x3e6   : > { %3782 = vrot.lane.b32.xlu1 %v2261_v18, %s5335_s27 }
 0x3e7   : > { %4905 = vmatpush3.bf16.msra.mxu1 %v9415_v29 }
 0x3e8   : > { %4934 = vmatprep.subr.bf16.mxu1 %v9241_v46 }
 0x3ea   : > { %3319 = vmatmul.mubr.bf16.vlgmr.msra.gmra.mrb[40].mxu1 %v11207_v5 }
 0x3eb   : > { %4935 = vmatpush3.bf16.msra.mxu1 %v9255_v16  ;;  %3488 = vmatprep.mubr.bf16.mxu1 %v2859_v32 }
 0x3ec   : > { %4936 = vmatprep.subr.bf16.mxu1 %v9261_v36 }
 0x3ef   : > { %4937 = vmatpush3.bf16.msra.mxu1 %v9269_v50 }
 0x3f0   : > { %4938 = vmatprep.subr.bf16.mxu1 %v9279_v1 }
 0x3f3   : > { %4939 = vmatpush3.bf16.msra.mxu1 %v9287_v62 }
 0x3f4   : > { %v4884_v47 = vpop.f32.mrb[132].mxu0  ;;  %4940 = vmatprep.subr.bf16.mxu1 %v9294_v25 }
 0x3f5   : > { %v4885_v40 = vpop.f32.mrb[133].mxu0 }
 0x3f6   : > { %v9841_v55 = vadd.f32 %v4885_v40, %v4884_v47  ;;  %v4887_v0 = vpop.f32.mrb[134].mxu0  ;;  %v5338_v40 = vmov 0.0  }
 0x3f7   : > { %v4888_v8 = vpop.f32.mrb[135].mxu0  ;;  %4941 = vmatpush3.bf16.msra.mxu1 %v9312_v26 }
 0x3f8   : > { %4942 = vmatprep.subr.bf16.mxu1 %v9323_v13 }
 0x3fb   : > { %4943 = vmatpush3.bf16.msra.mxu1 %v9331_v19 }
 0x3fc   : > { %4944 = vmatprep.subr.bf16.mxu1 %v9342_v51 }
 0x3fd   : > { %v4730_v48 = vpop.f32.mrb[16].mxu1 }
 0x3fe   : > { %v4731_v32 = vpop.f32.mrb[17].mxu1 }
 0x3ff   : > { %v4732_v21 = vadd.f32 %v4731_v32, %v4730_v48  ;;  %v4733_v22 = vpop.f32.mrb[18].mxu1  ;;  %4945 = vmatpush3.bf16.msra.mxu1 %v9358_v45 }
 0x400   : > { %v4734_v9 = vpop.f32.mrb[19].mxu1  ;;  %4946 = vmatprep.subr.bf16.mxu1 %v9368_v31 }
 0x403   : > { %4947 = vmatpush3.bf16.msra.mxu1 %v9381_v37 }
 0x404   : > { %4948 = vmatprep.subr.bf16.mxu1 %v9397_v58 }
 0x407   : > { %4949 = vmatpush3.bf16.msra.mxu1 %v9415_v29 }
 0x408   : > { %4978 = vmatprep.subr.bf16.mxu1 %v9241_v46 }
 0x40a   : > { %3489 = vmatmul.mubr.bf16.vlgmr.msra.gmra.mrb[44].mxu1 %v2858_v14 }
 0x40b   : > { %4979 = vmatpush3.bf16.msra.mxu1 %v9255_v16  ;;  %3658 = vmatprep.mubr.bf16.mxu1 %v3029_v60 }
 0x40c   : > { %4980 = vmatprep.subr.bf16.mxu1 %v9261_v36 }
 0x40f   : > { %4981 = vmatpush3.bf16.msra.mxu1 %v9269_v50  ;;  %v2473_v50 = vadd.f32 %v4732_v21, %v9778_v43 }
 0x410   : > { %4982 = vmatprep.subr.bf16.mxu1 %v9279_v1 }
 0x413   : > { %4983 = vmatpush3.bf16.msra.mxu1 %v9287_v62 }
 0x414   : > { %v4928_v44 = vpop.f32.mrb[136].mxu0  ;;  %4984 = vmatprep.subr.bf16.mxu1 %v9294_v25 }
 0x415   : > { %v4929_v24 = vpop.f32.mrb[137].mxu0 }
 0x416   : > { %v9863_v5 = vadd.f32 %v4929_v24, %v4928_v44  ;;  %v4931_v46 = vpop.f32.mrb[138].mxu0  ;;  %v5196_v44 = vld [vmem:[%s10135_s5 + $0xc0] sm:$0xff]  }
 0x417   : > { %v4932_v10 = vpop.f32.mrb[139].mxu0  ;;  %4985 = vmatpush3.bf16.msra.mxu1 %v9312_v26  ;;  %v5197_v24 = vld [vmem:[%s10135_s5 + $0x80] sm:$0xff]   ;;  %v5198_v46 = vld [vmem:[%s10135_s5 + $0xc8] sm:$0xff]   ;;  %5044 = vmatprep.subr.bf16.mxu0 %v5196_v44 }
 0x418   : > { %4986 = vmatprep.subr.bf16.mxu1 %v9323_v13  ;;  %v5176_v13 = vld [vmem:[%s10135_s5 + $0x40] sm:$0xff]   ;;  %5045 = vmatpush3.bf16.msra.mxu0 %v5197_v24 }
 0x419   : > { %5046 = vmatprep.subr.bf16.mxu0 %v5198_v46  ;;  %v11210_v46 = vmov 0  }
 0x41b   : > { %4987 = vmatpush3.bf16.msra.mxu1 %v9331_v19 }
 0x41c   : > { %4988 = vmatprep.subr.bf16.mxu1 %v9342_v51 }
 0x41d   : > { %v4752_v16 = vpop.f32.mrb[20].mxu1 }
 0x41e   : > { %v4753_v36 = vpop.f32.mrb[21].mxu1 }
 0x41f   : > { %v4754_v62 = vadd.f32 %v4753_v36, %v4752_v16  ;;  %v4755_v1 = vpop.f32.mrb[22].mxu1  ;;  %4989 = vmatpush3.bf16.msra.mxu1 %v9358_v45 }
 0x420   : > { %v4756_v14 = vpop.f32.mrb[23].mxu1  ;;  %4990 = vmatprep.subr.bf16.mxu1 %v9368_v31  ;;  %v5200_v1 = vld [vmem:[%s10135_s5 + $0xd0] sm:$0xff]  }
 0x421   : > { %v9873_v25 = vadd.f32 %v4754_v62, %v2473_v50 }
 0x423   : > { %4991 = vmatpush3.bf16.msra.mxu1 %v9381_v37  ;;  %v5177_v37 = vld [vmem:[%s10135_s5] sm:$0xff]  }
 0x424   : > { %4992 = vmatprep.subr.bf16.mxu1 %v9397_v58 }
 0x427   : > { %4993 = vmatpush3.bf16.msra.mxu1 %v9415_v29 }
 0x428   : > { %5022 = vmatprep.subr.bf16.mxu1 %v5176_v13 }
 0x42a   : > { %3659 = vmatmul.mubr.bf16.vlgmr.msra.gmra.mrb[48].mxu1 %v3028_v20  ;;  %v5179_v20 = vld [vmem:[%s10135_s5 + $0x8] sm:$0xff]  }
 0x42b   : > { %5023 = vmatpush3.bf16.msra.mxu1 %v5177_v37  ;;  %v5205_v37 = vld [vmem:[%s10135_s5 + $0xa0] sm:$0xff]  }
 0x42c   : > { %5024 = vmatprep.subr.bf16.mxu1 %v5178_v38  ;;  %v5210_v38 = vld [vmem:[%s10135_s5 + $0xf8] sm:$0xff]  }
 0x42f   : > { %5025 = vmatpush3.bf16.msra.mxu1 %v5179_v20  ;;  %v5211_v20 = vld [vmem:[%s10135_s5 + $0xb8] sm:$0xff]  }
 0x430   : > { %5026 = vmatprep.subr.bf16.mxu1 %v5180_v59 }
 0x433   : > { %5027 = vmatpush3.bf16.msra.mxu1 %v5181_v41 }
 0x434   : > { %v4972_v26 = vpop.f32.mrb[140].mxu0  ;;  %5028 = vmatprep.subr.bf16.mxu1 %v5182_v54 }
 0x435   : > { %v4973_v19 = vpop.f32.mrb[141].mxu0 }
 0x436   : > { %v9883_v51 = vadd.f32 %v4973_v19, %v4972_v26  ;;  %v4975_v45 = vpop.f32.mrb[142].mxu0  ;;  %v5201_v26 = vld [vmem:[%s10135_s5 + $0x90] sm:$0xff]   ;;  %v5202_v19 = vld [vmem:[%s10135_s5 + $0xd8] sm:$0xff]  }
 0x437   : > { %v4976_v31 = vpop.f32.mrb[143].mxu0  ;;  %5029 = vmatpush3.bf16.msra.mxu1 %v5183_v17 }
 0x438   : > { %5030 = vmatprep.subr.bf16.mxu1 %v5184_v7 }
 0x43b   : > { %5031 = vmatpush3.bf16.msra.mxu1 %v5185_v2 }
 0x43c   : > { %5032 = vmatprep.subr.bf16.mxu1 %v5186_v15  ;;  %v2002_v15 = vmax.f32 %v9784_v12, 0.0  ;;  %v5193_v12 = vld [vmem:[%s10135_s5 + $0x108] sm:$0xff]  }
 0x43d   : > { %v4774_v35 = vpop.f32.mrb[24].mxu1 }
 0x43e   : > { %v4775_v58 = vpop.f32.mrb[25].mxu1 }
 0x43f   : > { %v4776_v29 = vadd.f32 %v4775_v58, %v4774_v35  ;;  %v4777_v60 = vpop.f32.mrb[26].mxu1  ;;  %5033 = vmatpush3.bf16.msra.mxu1 %v5187_v4  ;;  %v5203_v35 = vld [vmem:[%s10135_s5 + $0x98] sm:$0xff]   ;;  %v5206_v58 = vld [vmem:[%s10135_s5 + $0xe8] sm:$0xff]   ;;  %v2003_v4 = vpack.c.bf16 %v2002_v15, %v2002_v15 }
 0x440   : > { %v4778_v49 = vpop.f32.mrb[27].mxu1  ;;  %5034 = vmatprep.subr.bf16.mxu1 %v5188_v3  ;;  %v5208_v60 = vld [vmem:[%s10135_s5 + $0xf0] sm:$0xff]  }
 0x441   : > { %v2727_v28 = vadd.f32 %v4776_v29, %v9778_v43  ;;  %v5207_v29 = vld [vmem:[%s10135_s5 + $0xa8] sm:$0xff]   ;;  %v5209_v49 = vld [vmem:[%s10135_s5 + $0xb0] sm:$0xff]  }
 0x443   : > { %5035 = vmatpush3.bf16.msra.mxu1 %v5189_v53  ;;  %v5192_v53 = vld [vmem:[%s10135_s5 + $0x100] sm:$0xff]  }
 0x444   : > { %5036 = vmatprep.subr.bf16.mxu1 %v5190_v39 }
 0x447   : > { %5037 = vmatpush3.bf16.msra.mxu1 %v5191_v11 }
 0x448   : > { %5071 = vmatprep.subr.bf16.mxu1 %v5338_v40 }
 0x454   : > { %v5016_v34 = vpop.f32.mrb[144].mxu0 }
 0x455   : > { %v5017_v63 = vpop.f32.mrb[145].mxu0 }
 0x456   : > { %v9915_v42 = vadd.f32 %v5017_v63, %v5016_v34  ;;  %v5019_v27 = vpop.f32.mrb[146].mxu0  ;;  %v2518_v63 = vmax.f32 %v9873_v25, 0.0 }
 0x457   : > { %v5020_v23 = vpop.f32.mrb[147].mxu0 }
 0x458   : > { %v2519_v27 = vpack.c.bf16 %v2518_v63, %v2518_v63  ;;  %v3783_v23 = vpop.permute.xlu1 %3782  ;;  %v4563_v63 = vld [vmem:[%s10136_s6] ss:$0 sm:$0xff] }
 0x45d   : > { %v4796_v33 = vpop.f32.mrb[28].mxu1 }
 0x45e   : > { %v4797_v6 = vpop.f32.mrb[29].mxu1 }
 0x45f   : > { %v4798_v56 = vadd.f32 %v4797_v6, %v4796_v33  ;;  %v4799_v61 = vpop.f32.mrb[30].mxu1  ;;  %v3795_v33 = vsel %vm1693_vm8, %v2003_v4, %v3783_v23 }
 0x460   : > { %v4800_v57 = vpop.f32.mrb[31].mxu1  ;;  %v5194_v61 = vld [vmem:[%s10135_s5 + $0x110] sm:$0xff]  }
 0x461   : > { %v2767_v30 = vadd.f32 %v4798_v56, %v2727_v28 }
 0x463   : > { %v2772_v18 = vmax.f32 %v2767_v30, 0.0 }
 0x465   : > { %v2773_v47 = vpack.c.bf16 %v2772_v18, %v2772_v18  ;;  %v5195_v18 = vld [vmem:[%s10135_s5 + $0x118] sm:$0xff]  }
 0x467   : > { %3785 = vrot.lane.b32.xlu0 %v2773_v47, %s5335_s27 }
 0x47d   : > { %v4818_v0 = vpop.f32.mrb[32].mxu1 }
 0x47e   : > { %v4819_v8 = vpop.f32.mrb[33].mxu1 }
 0x47f   : > { %v4820_v48 = vadd.f32 %v4819_v8, %v4818_v0  ;;  %v4821_v32 = vpop.f32.mrb[34].mxu1 }
 0x480   : > { %v4822_v21 = vpop.f32.mrb[35].mxu1 }
 0x481   : > { %v2897_v22 = vadd.f32 %v4820_v48, %v9778_v43 }
 0x483   : > { %v9937_v9 = vadd.f32 %v9818_v52, %v2897_v22  ;;  %v5199_v52 = vld [vmem:[%s10135_s5 + $0x88] sm:$0xff]  }
 0x484   : > { %5047 = vmatpush3.bf16.msra.mxu0 %v5199_v52 }
 0x485   : > { %5048 = vmatprep.subr.bf16.mxu0 %v5200_v1 }
 0x488   : > { %5049 = vmatpush3.bf16.msra.mxu0 %v5201_v26 }
 0x489   : > { %5050 = vmatprep.subr.bf16.mxu0 %v5202_v19 }
 0x48c   : > { %5051 = vmatpush3.bf16.msra.mxu0 %v5203_v35  ;;  %v5220_v35 = vld [vmem:[%s10137_s7 + $0x24] ss:$16 sps:$4 sm:$0xff]  }
 0x49d   : > { %v4862_v10 = vpop.f32.mrb[36].mxu1 }
 0x49e   : > { %v4863_v16 = vpop.f32.mrb[37].mxu1 }
 0x49f   : > { %v4864_v36 = vadd.f32 %v4863_v16, %v4862_v10  ;;  %v4865_v50 = vpop.f32.mrb[38].mxu1  ;;  %v2942_v10 = vmax.f32 %v9937_v9, 0.0  ;;  %v5215_v9 = vld [vmem:[%s10137_s7 + $0x8] ss:$16 sps:$4 sm:$0xff]  }
 0x4a0   : > { %v4866_v62 = vpop.f32.mrb[39].mxu1 }
 0x4a1   : > { %v3067_v14 = vadd.f32 %v4864_v36, %v9778_v43  ;;  %v2943_v50 = vpack.c.bf16 %v2942_v10, %v2942_v10 }
 0x4a3   : > { %v3107_v13 = vadd.f32 %v9841_v55, %v3067_v14  ;;  %v5204_v55 = vld [vmem:[%s10135_s5 + $0xe0] sm:$0xff]   ;;  %v5217_v14 = vld [vmem:[%s10137_s7 + $0xc] ss:$16 sps:$4 sm:$0xff]  }
 0x4a4   : > { %5052 = vmatprep.subr.bf16.mxu0 %v5204_v55 }
 0x4a5   : > { %v3112_v45 = vmax.f32 %v3107_v13, 0.0  ;;  %5053 = vmatpush3.bf16.msra.mxu0 %v5205_v37  ;;  %v5221_v37 = vld [vmem:[%s10137_s7 + $0x28] ss:$16 sps:$4 sm:$0xff]  }
 0x4a6   : > { %5054 = vmatprep.subr.bf16.mxu0 %v5206_v58  ;;  %v5223_v58 = vld [vmem:[%s10137_s7 + $0x2c] ss:$16 sps:$4 sm:$0xff]  }
 0x4a7   : > { %v3113_v31 = vpack.c.bf16 %v3112_v45, %v3112_v45 }
 0x4a9   : > { %3788 = vrot.lane.b32.xlu1 %v3113_v31, %s5335_s27  ;;  %5055 = vmatpush3.bf16.msra.mxu0 %v5207_v29  ;;  %v5218_v31 = vld [vmem:[%s10137_s7 + $0x20] ss:$16 sps:$4 sm:$0xff]  }
 0x4aa   : > { %5056 = vmatprep.subr.bf16.mxu0 %v5208_v60  ;;  %v5224_v29 = vld [vmem:[%s10137_s7 + $0x40] ss:$16 sps:$4 sm:$0xff]   ;;  %v5226_v60 = vld [vmem:[%s10137_s7 + $0x44] ss:$16 sps:$4 sm:$0xff]  }
 0x4ad   : > { %5057 = vmatpush3.bf16.msra.mxu0 %v5209_v49  ;;  %v5227_v49 = vld [vmem:[%s10137_s7 + $0x48] ss:$16 sps:$4 sm:$0xff]  }
 0x4ae   : > { %5058 = vmatprep.subr.bf16.mxu0 %v5210_v38  ;;  %v5229_v38 = vld [vmem:[%s10137_s7 + $0x4c] ss:$16 sps:$4 sm:$0xff]  }
 0x4b1   : > { %5059 = vmatpush3.bf16.msra.mxu0 %v5211_v20  ;;  %v5232_v20 = vld [vmem:[%s10137_s7 + $0x64] ss:$16 sps:$4 sm:$0xff]  }
 0x4b2   : > { %4318 = vmatprep.subr.bf16.mxu0 %v5217_v14 }
 0x4bd   : > { %v4906_v59 = vpop.f32.mrb[40].mxu1 }
 0x4be   : > { %v4907_v41 = vpop.f32.mrb[41].mxu1 }
 0x4bf   : > { %v4908_v54 = vadd.f32 %v4907_v41, %v4906_v59  ;;  %v4909_v17 = vpop.f32.mrb[42].mxu1  ;;  %v5235_v59 = vld [vmem:[%s10137_s7 + $0x6c] ss:$16 sps:$4 sm:$0xff]   ;;  %v5230_v41 = vld [vmem:[%s10137_s7 + $0x60] ss:$16 sps:$4 sm:$0xff]  }
 0x4c0   : > { %v4910_v7 = vpop.f32.mrb[43].mxu1 }
 0x4c1   : > { %v3321_v34 = vadd.f32 %v4908_v54, %v9778_v43  ;;  %v5233_v54 = vld [vmem:[%s10137_s7 + $0x68] ss:$16 sps:$4 sm:$0xff]  }
 0x4c3   : > { %v3361_v2 = vadd.f32 %v9863_v5, %v3321_v34 }
 0x4d9   : > { %v3786_v3 = vpop.permute.xlu0 %3785 }
 0x4da   : > { %v3799_v39 = vsel %vm1693_vm8, %v2519_v27, %v3786_v3 }
 0x4db   : > { %4066 = vmatprep.mubr.bf16.mxu1 %v3799_v39 }
 0x4dc   : > { %4067 = vmatmul.mubr.bf16.vlgmr.msra.gmra.mrb[52].mxu1 %v3795_v33 }
 0x4dd   : > { %v4950_v6 = vpop.f32.mrb[44].mxu1  ;;  %5072 = vmatpush3.bf16.msra.mxu1 %v5192_v53  ;;  %5079 = vmatprep.mubr.msk.bf16.mxu1 %vm5339_vm10, %v5338_v40 }
 0x4de   : > { %v4951_v5 = vpop.f32.mrb[45].mxu1  ;;  %5073 = vmatprep.subr.bf16.mxu1 %v5338_v40 }
 0x4df   : > { %v4952_v25 = vadd.f32 %v4951_v5, %v4950_v6  ;;  %v4953_v11 = vpop.f32.mrb[46].mxu1  ;;  %v4174_v5 = vlaneseq }
 0x4e0   : > { %v4954_v28 = vpop.f32.mrb[47].mxu1 }
 0x4e1   : > { %v3491_v56 = vadd.f32 %v4952_v25, %v9778_v43  ;;  %5074 = vmatpush3.bf16.msra.mxu1 %v5193_v12  ;;  %v4175_v25 = vshrl.u32 %v4174_v5, 7 }
 0x4e2   : > { %5075 = vmatprep.subr.bf16.mxu1 %v5338_v40 }
 0x4e3   : > { %v3531_v57 = vadd.f32 %v9883_v51, %v3491_v56  ;;  %v4176_v11 = vsub.s32 0, %v4175_v25  ;;  %v4184_v28 = vsub.s32 2, %v4175_v25  ;;  %v4172_v56 = vld [vmem:[%s10138_s8] sm:$0xf] }
 0x4e5   : > { %v3536_v30 = vmax.f32 %v3531_v57, 0.0  ;;  %5076 = vmatpush3.bf16.msra.mxu1 %v5194_v61  ;;  %v4180_v61 = vsub.s32 1, %v4175_v25  ;;  %v4188_v57 = vsub.s32 3, %v4175_v25 }
 0x4e6   : > { %5077 = vmatprep.subr.bf16.mxu1 %v5338_v40  ;;  %v3366_v40 = vmax.f32 %v3361_v2, 0.0 }
 0x4e7   : > { %v3537_v47 = vpack.c.bf16 %v3536_v30, %v3536_v30  ;;  %v4177_v30 = vrot.slane %v4172_v56, %v4176_v11 }
 0x4e8   : > { %v3367_v16 = vpack.c.bf16 %v3366_v40, %v3366_v40 }
 0x4e9   : > { %3791 = vrot.lane.b32.xlu0 %v3537_v47, %s5335_s27  ;;  %5078 = vmatpush3.bf16.msra.mxu1 %v5195_v18  ;;  %v4185_v18 = vrot.slane %v4172_v56, %v4184_v28  ;;  %v4181_v47 = vrot.slane %v4172_v56, %v4180_v61  ;;  %s5276_s27 = scalar_lea.vmem %s5275_s23, 1024 }
 0x4ea   : > { %p5278_p1 = scmp.lt.s32.totalorder %s5276_s27, %s5270_s17 }
 0x4ec   : > { %p5279_p2 = por %p5278_p1, %p5277_p0 }
 0x4ee   : > { %p5280_p3 = pnand %p5279_p2, %p5273_p13 }
 0x4fd   : > { %v4994_v0 = vpop.f32.mrb[48].mxu1 }
 0x4fe   : > { %v4995_v8 = vpop.f32.mrb[49].mxu1 }
 0x4ff   : > { %v4996_v48 = vadd.f32 %v4995_v8, %v4994_v0  ;;  %v4997_v32 = vpop.f32.mrb[50].mxu1  ;;  %v4189_v0 = vrot.slane %v4172_v56, %v4188_v57 }
 0x500   : > { %v4998_v21 = vpop.f32.mrb[51].mxu1 }
 0x501   : > { %v3661_v22 = vadd.f32 %v4996_v48, %v9778_v43  ;;  %v5212_v43 = vld [vmem:[%s10137_s7] ss:$16 sps:$4 sm:$0xff]  }
 0x503   : > { %v3701_v51 = vadd.f32 %v9915_v42, %v3661_v22  ;;  %v5214_v42 = vld [vmem:[%s10137_s7 + $0x4] ss:$16 sps:$4 sm:$0xff]  }
 0x504   : > { %4277 = vmatprep.subr.bf16.mxu1 %v5214_v42 }
 0x505   : > { %v3706_v44 = vmax.f32 %v3701_v51, 0.0 }
 0x507   : > { %v3707_v24 = vpack.c.bf16 %v3706_v44, %v3706_v44 }
 0x509   : > { %5080 = vmatmul.mubr.msk.bf16.vlgmr.msra.gmra.mrb[56].mxu1 %vm1693_vm8, %v3707_v24 }
 0x50a   : > { %4309 = vmatprep.mubr.bf16.mxu1 %v11210_v46  ;;  %4278 = vmatpush1.bf16.msra.mxu1 %v5212_v43 }
 0x50b   : > { %4279 = vmatprep.subr.bf16.mxu1 %v5220_v35 }
 0x50e   : > { %4280 = vmatpush1.bf16.msra.mxu1 %v5218_v31 }
 0x50f   : > { %4281 = vmatprep.subr.bf16.mxu1 %v5226_v60 }
 0x512   : > { %4282 = vmatpush1.bf16.msra.mxu1 %v5224_v29 }
 0x513   : > { %4283 = vmatprep.subr.bf16.mxu1 %v5232_v20 }
 0x516   : > { %4284 = vmatpush1.bf16.msra.mxu1 %v5230_v41 }
 0x51b   : > { %v3789_v36 = vpop.permute.xlu1 %3788 }
 0x51c   : > { %v3803_v1 = vsel %vm1693_vm8, %v2943_v50, %v3789_v36 }
 0x55b   : > { %v3792_v52 = vpop.permute.xlu0 %3791 }
 0x55c   : > { %v3807_v62 = vsel %vm1693_vm8, %v3367_v16, %v3792_v52 }
 0x55d   : > { %4106 = vmatprep.mubr.bf16.mxu0 %v3807_v62 }
 0x55e   : > { %4107 = vmatmul.mubr.bf16.vlgmr.msra.gmra.mrb[148].mxu0 %v3803_v1 }
 0x55f   : > { %4350 = vmatprep.mubr.bf16.mxu0 %v11210_v46  ;;  %4319 = vmatpush1.bf16.msra.mxu0 %v5215_v9 }
 0x560   : > { %4320 = vmatprep.subr.bf16.mxu0 %v5223_v58 }
 0x563   : > { %4321 = vmatpush1.bf16.msra.mxu0 %v5221_v37 }
 0x564   : > { %4322 = vmatprep.subr.bf16.mxu0 %v5229_v38 }
 0x567   : > { %4323 = vmatpush1.bf16.msra.mxu0 %v5227_v49 }
 0x568   : > { %4324 = vmatprep.subr.bf16.mxu0 %v5235_v59 }
 0x56b   : > { %4325 = vmatpush1.bf16.msra.mxu0 %v5233_v54 }
 0x5af   : > { %v5038_v13 = vpop.f32.mrb[52].mxu1 }
 0x5b0   : > { %v5039_v26 = vpop.f32.mrb[53].mxu1 }
 0x5b1   : > { %v5040_v19 = vadd.f32 %v5039_v26, %v5038_v13  ;;  %v5041_v45 = vpop.f32.mrb[54].mxu1 }
 0x5b2   : > { %v5042_v55 = vpop.f32.mrb[55].mxu1 }
 0x5b3   : > { %v4069_v23 = vadd.f32 %v5040_v19, %v4563_v63 }
 0x5dc   : > { %v4148_v17 = vpop.f32.mrb[56].mxu1 }
 0x5dd   : > { %v5081_v7 = vpop.f32.mrb[57].mxu1 }
 0x5de   : > { %v4151_v34 = vpop.f32.mrb[58].mxu1 }
 0x5df   : > { %v5082_v2 = vpop.f32.mrb[59].mxu1 }
 0x631   : > { %v5060_v15 = vpop.f32.mrb[148].mxu0 }
 0x632   : > { %v5061_v27 = vpop.f32.mrb[149].mxu0 }
 0x633   : > { %v5062_v4 = vadd.f32 %v5061_v27, %v5060_v15  ;;  %v5063_v3 = vpop.f32.mrb[150].mxu0 }
 0x634   : > { %v5064_v53 = vpop.f32.mrb[151].mxu0 }
 0x635   : > { %v4109_v39 = vadd.f32 %v5062_v4, %v4069_v23 }
 0x637   : > { %v4149_v33 = vadd.f32 %v4148_v17, %v4109_v39 }
 0x639   : > { %v4154_v6 = vmax.f32 %v4149_v33, 0.0 }
 0x63b   : > { %v4155_v12 = vpack.c.bf16 %v4154_v6, %v4154_v6 }
 0x63d   : > { %4617 = vmatmul.mubr.msk.bf16.vlgmr.msra.gmra.mrb[60].mxu1 %vm1693_vm8, %v4155_v12  ;;  %4618 = vmatmul.mubr.msk.bf16.vlgmr.msra.gmra.mrb[152].mxu0 %vm1693_vm8, %v4155_v12 }
 0x710   : > { %v4311_v8 = vpop.f32.mrb[60].mxu1  ;;  %v4352_v48 = vpop.f32.mrb[152].mxu0 }
 0x711   : > { %v4312_v32 = vadd.f32 %v4311_v8, %v4177_v30  ;;  %v4353_v21 = vadd.f32 %v4352_v48, %v4185_v18  ;;  %v4313_v22 = vpop.f32.mrb[61].mxu1  ;;  %v4354_v51 = vpop.f32.mrb[153].mxu0 }
 0x712   : > { %v4314_v44 = vadd.f32 %v4313_v22, %v4181_v47  ;;  %v4355_v24 = vadd.f32 %v4354_v51, %v4189_v0  ;;  %v4315_v46 = vpop.f32.mrb[62].mxu1  ;;  %v4356_v40 = vpop.f32.mrb[154].mxu0 }
 0x713   : > { %v4359_v10 = vmax.f32 %v4312_v32, 0.0  ;;  %v4361_v16 = vmax.f32 %v4353_v21, 0.0  ;;  %v4316_v36 = vpop.f32.mrb[63].mxu1  ;;  %v4357_v50 = vpop.f32.mrb[155].mxu0 }
 0x714   : > { %v4360_v52 = vmax.f32 %v4314_v44, 0.0  ;;  %v4362_v62 = vmax.f32 %v4355_v24, 0.0 }
 0x715   : > { %4363 = vst [vmem:[%s328_s29] sm:$0xff] %v4359_v10  ;;  %4365 = vst [vmem:[%s328_s29 + $0x10] sm:$0xff] %v4361_v16 }
 0x716   : > { %4364 = vst [vmem:[%s328_s29 + $0x8] sm:$0xff] %v4360_v52  ;;  %4366 = vst [vmem:[%s328_s29 + $0x18] sm:$0xff] %v4362_v62 }
 0x717   : > { %5283 = shalt.err (!%p5280_p3)
}
 0x718   : > { %s5284_s24 = scalar_lea.hbm %s10086_s21, 512  ;;  %s5288_s29 = scalar_lea.hbm %s10139_s9, 1024 }
 0x719   : > { %p5285_p4 = scmp.ne.s32.totalorder %s10086_s21, %s5284_s24  ;;  %p5289_p9 = scmp.lt.u32.totalorder %s10086_s21, %s10139_s9 }
 0x71a   : > { %p5290_p10 = scmp.lt.u32.totalorder %s5288_s29, %s5284_s24  ;;  %p5292_p12 = scmp.lt.u32.totalorder %s5284_s24, %s10086_s21 }
 0x71b   : > { %p5286_p7 = pnand %p5285_p4, %p5429_p5 }
 0x71c   : > { %p5291_p11 = por %p5290_p10, %p5289_p9 }
 0x71d   : > { %p5287_p8 = pneg %p5286_p7 }
 0x71e   : > { %p5293_p13 = por %p5292_p12, %p5291_p11 }
 0x720   : > { %p5294_p0 = pnand %p5293_p13, %p5287_p8 }
 0x722   : > { %5297 = shalt.err (!%p5294_p0)
}
 0x723   : > { %5083 = dma.vmem_to_hbm [thread:$0]  (%p5429_p5), %s10088_s14, 512, %s10086_s21, %s4368_s13  }
 0x724 PF: > { %p5089_p1 = scmp.ge.s32.totalorder %s5332_s12, 2  ;;  %s4394_s17 = sand.u32 1, %s5320_s30  }
 0x725   : > { %s4395_s22 = scalar_lea.sflag [#allocation3], %s4394_s17 }
 0x726   : > { %p5086_p2 = pnand %p5089_p1, %p5433_p6 }
 0x728   : > { %5315 = dma.done.wait (!%p5086_p2), %s4395_s22, 512  }
 0x729   : > { %5317 = vsyncadd (!%p5086_p2), %s4395_s22, 4294966784  ;;  %p19_p3 = scmp.ge.s32.totalorder %s5416_s15, 4   ;;  %s11211_s30 = smov %s5324_s10 }
 0x72a   : > { %s11212_s10 = smov %s5328_s11  ;;  %s11213_s11 = smov %s5427_s18 }
 0x72b   : > { %s11214_s12 = smov %s5416_s15  ;;  %21 = sbr.rel (!%p19_p3) target bundleno = 3 (0x3), region = 91 }
 0x732   :  { %4400 = vsyncpa [#allocation3], 1 }
 0x733   :  { %4402 = vsyncpa [#allocation3 + $0x1], 1 }

</bundles_post_ra>
